<compile_context>
chip_gen: v7x
topology: tpu7x:2x2x1
jax: 0.10.0
libtpu: 0.0.40
codegen_flags: <defaults>
</compile_context>

<pallas_src>
import functools

import jax
import jax.numpy as jnp
from jax.experimental import pallas as pl
from jax.experimental.pallas import tpu as pltpu

IN_DIM = 784        # 28 * 28
HID_DIM = 784
OUT_DIM = 10

LANE = 128
SUBLANE = 8
D_PAD = 896         # round_up(784, 128) = 7 * 128
OUT_PAD = 128       # round_up(10, 128)  -> lane-dense output
NEG_INF = -1e30     # bias padding for the fake logit lanes

TILE_B_DEFAULT = 128  # batch tile cap (128 keeps MXU M dim well fed on all chips)


def _round_up(x, m):
    return (x + m - 1) // m * m


def _pad_to(a, shape, value=0.0):
    pads = [(0, t - s) for s, t in zip(a.shape, shape)]
    return jnp.pad(a, pads, constant_values=value)


def mlp_kernel(x_ref, w1_ref, b1_ref, w2_ref, b2_ref, w3_ref, b3_ref, o_ref):
    """Fused forward pass (3 matmuls + ReLU + log_softmax) for one batch tile.

    x_ref: (tile_b, 896) bf16.  Weights bf16, biases f32, all fully VMEM-resident.
    Output: (tile_b, 128) f32 lane-dense log-probs (first 10 lanes are real).
    """
    x = x_ref[...]  # bf16

    # fc1 + ReLU (f32 accumulation on the MXU, f32 elementwise, bf16 for next matmul)
    h1 = jnp.dot(x, w1_ref[...], preferred_element_type=jnp.float32) + b1_ref[...]
    h1 = jnp.maximum(h1, 0.0).astype(jnp.bfloat16)

    # fc2 + ReLU
    h2 = jnp.dot(h1, w2_ref[...], preferred_element_type=jnp.float32) + b2_ref[...]
    h2 = jnp.maximum(h2, 0.0).astype(jnp.bfloat16)

    # fc3 (padded lanes get bias -1e30 -> exp underflows to 0 in the softmax)
    logits = jnp.dot(h2, w3_ref[...], preferred_element_type=jnp.float32) + b3_ref[...]

    # log_softmax over the class dimension (PyTorch F.log_softmax, dim=1 for 2D input)
    m = jnp.max(logits, axis=-1, keepdims=True)
    shifted = logits - m
    lse = jnp.log(jnp.sum(jnp.exp(shifted), axis=-1, keepdims=True))
    o_ref[...] = (shifted - lse).astype(o_ref.dtype)


@functools.partial(jax.jit, static_argnames=("tile_b",))
def net_forward(x, w1, b1, w2, b2, w3, b3, *, tile_b=TILE_B_DEFAULT):
    """x: (B, 784) f32. Weights in (in, out) layout; biases (1, out). Returns (B, 10) f32."""
    B = x.shape[0]

    # Batch tile: cap at `tile_b`, prefer >= 2 grid steps (megacore sharding on v7x),
    # keep it sublane-aligned.
    eff_tile = min(tile_b, max(SUBLANE, _round_up(pl.cdiv(B, 2), SUBLANE)))
    Bp = _round_up(B, eff_tile)
    grid = (Bp // eff_tile,)

    # Lane-align everything: feature dims -> 896, classes -> 128. Zero padding keeps the
    # matmul results identical; b3 padding = -1e30 keeps log_softmax identical on lanes 0..9.
    xp = _pad_to(x, (Bp, D_PAD)).astype(jnp.bfloat16)
    w1p = _pad_to(w1, (D_PAD, D_PAD)).astype(jnp.bfloat16)
    w2p = _pad_to(w2, (D_PAD, D_PAD)).astype(jnp.bfloat16)
    w3p = _pad_to(w3, (D_PAD, OUT_PAD)).astype(jnp.bfloat16)
    b1p = _pad_to(b1.reshape(1, -1).astype(jnp.float32), (1, D_PAD))
    b2p = _pad_to(b2.reshape(1, -1).astype(jnp.float32), (1, D_PAD))
    b3p = _pad_to(b3.reshape(1, -1).astype(jnp.float32), (1, OUT_PAD), value=NEG_INF)

    # Weights / biases: whole-array VMEM operands -> loaded once, no double-buffering.
    def vmem_resident():
        return pl.BlockSpec(memory_space=pltpu.MemorySpace.VMEM)

    out = pl.pallas_call(
        mlp_kernel,
        out_shape=jax.ShapeDtypeStruct((Bp, OUT_PAD), jnp.float32),
        grid=grid,
        in_specs=[
            pl.BlockSpec((eff_tile, D_PAD), lambda i: (i, 0)),  # x tile (pipelined)
            vmem_resident(),  # W1
            vmem_resident(),  # b1
            vmem_resident(),  # W2
            vmem_resident(),  # b2
            vmem_resident(),  # W3
            vmem_resident(),  # b3
        ],
        out_specs=pl.BlockSpec((eff_tile, OUT_PAD), lambda i: (i, 0)),
        compiler_params=pltpu.CompilerParams(
            dimension_semantics=("parallel",),
        ),
    )(xp, w1p, b1p, w2p, b2p, w3p, b3p)

    return out[:B, :OUT_DIM]


def init_params(key):
    """Deterministic init mimicking nn.Linear's U(-1/sqrt(fan_in), 1/sqrt(fan_in)).

    Stored directly in (in, out) layout (PyTorch stores (out, in); x @ W_in_out == x @ W_pt.T).
    """
    k1, k2, k3, k4, k5, k6 = jax.random.split(key, 6)

    def uniform(k, shape, fan_in):
        bound = 1.0 / jnp.sqrt(fan_in)
        return jax.random.uniform(k, shape, jnp.float32, -bound, bound)

    w1 = uniform(k1, (IN_DIM, HID_DIM), IN_DIM)
    b1 = uniform(k2, (1, HID_DIM), IN_DIM)
    w2 = uniform(k3, (HID_DIM, HID_DIM), HID_DIM)
    b2 = uniform(k4, (1, HID_DIM), HID_DIM)
    w3 = uniform(k5, (HID_DIM, OUT_DIM), HID_DIM)
    b3 = uniform(k6, (1, OUT_DIM), HID_DIM)
    return w1, b1, w2, b2, w3, b3


def reference_forward(x, w1, b1, w2, b2, w3, b3):
    """Pure-JAX reference with the same bf16-input / f32-accumulate numerics."""
    bf = jnp.bfloat16
    h1 = jnp.dot(x.astype(bf), w1.astype(bf), preferred_element_type=jnp.float32) + b1
    h1 = jnp.maximum(h1, 0.0)
    h2 = jnp.dot(h1.astype(bf), w2.astype(bf), preferred_element_type=jnp.float32) + b2
    h2 = jnp.maximum(h2, 0.0)
    logits = jnp.dot(h2.astype(bf), w3.astype(bf), preferred_element_type=jnp.float32) + b3
    return jax.nn.log_softmax(logits, axis=-1)


if __name__ == "__main__":
    key = jax.random.PRNGKey(0)
    kx, kp = jax.random.split(key)

    B = 16  # small batch; tile clamps to 8 -> 2 grid steps
    x = jax.random.normal(kx, (B, IN_DIM), dtype=jnp.float32)
    params = init_params(kp)

    out = jax.block_until_ready(net_forward(x, *params))
    ref = reference_forward(x, *params)

    assert out.shape == (B, OUT_DIM)
    max_err = float(jnp.max(jnp.abs(out - ref)))
    assert jnp.allclose(out, ref, atol=2e-3, rtol=2e-3), f"max abs err = {max_err}"

    print("KERNEL_OK")
</pallas_src>

<mosaic_0001>
module attributes {stable_mosaic.version = 11 : i64} {
  func.func @mlp_kernel(%arg0: i32, %arg1: memref<8x896xbf16, #tpu.memory_space<vmem>>, %arg2: memref<896x896xbf16, #tpu.memory_space<vmem>>, %arg3: memref<1x896xf32, #tpu.memory_space<vmem>>, %arg4: memref<896x896xbf16, #tpu.memory_space<vmem>>, %arg5: memref<1x896xf32, #tpu.memory_space<vmem>>, %arg6: memref<896x128xbf16, #tpu.memory_space<vmem>>, %arg7: memref<1x128xf32, #tpu.memory_space<vmem>>, %arg8: memref<8x128xf32, #tpu.memory_space<vmem>>) attributes {dimension_semantics = [#tpu.dimension_semantics<parallel>], iteration_bounds = array<i64: 2>, scalar_prefetch = 0 : i64, scratch_operands = 0 : i64, tpu.core_type = #tpu.core_type<tc>, window_params = [{transform_indices = @transform_0, window_bounds = array<i64: 8, 896>}, {pipeline_mode = #tpu.pipeline_mode<synchronous>, transform_indices = @transform_1, window_bounds = array<i64: 896, 896>}, {pipeline_mode = #tpu.pipeline_mode<synchronous>, transform_indices = @transform_2, window_bounds = array<i64: 1, 896>}, {pipeline_mode = #tpu.pipeline_mode<synchronous>, transform_indices = @transform_3, window_bounds = array<i64: 896, 896>}, {pipeline_mode = #tpu.pipeline_mode<synchronous>, transform_indices = @transform_4, window_bounds = array<i64: 1, 896>}, {pipeline_mode = #tpu.pipeline_mode<synchronous>, transform_indices = @transform_5, window_bounds = array<i64: 896, 128>}, {pipeline_mode = #tpu.pipeline_mode<synchronous>, transform_indices = @transform_6, window_bounds = array<i64: 1, 128>}, {transform_indices = @transform_7, window_bounds = array<i64: 8, 128>}]} {
    %c0 = arith.constant 0 : index
    %c0_0 = arith.constant 0 : index
    %0 = vector.load %arg1[%c0, %c0_0] : memref<8x896xbf16, #tpu.memory_space<vmem>>, vector<8x896xbf16>
    %c0_1 = arith.constant 0 : index
    %c0_2 = arith.constant 0 : index
    %1 = vector.load %arg2[%c0_1, %c0_2] : memref<896x896xbf16, #tpu.memory_space<vmem>>, vector<896x896xbf16>
    %cst = arith.constant dense<0.000000e+00> : vector<8x896xf32>
    %2 = tpu.matmul %0, %1, %cst {dimension_numbers = #tpu.dot_dimension_numbers<[1], [0], [0], [1], [0, 0, 1, 1], [], []>} : vector<8x896xbf16>, vector<896x896xbf16>, vector<8x896xf32> -> vector<8x896xf32>
    %c0_3 = arith.constant 0 : index
    %c0_4 = arith.constant 0 : index
    %3 = vector.load %arg3[%c0_3, %c0_4] : memref<1x896xf32, #tpu.memory_space<vmem>>, vector<1x896xf32>
    %4 = vector.broadcast %3 : vector<1x896xf32> to vector<8x896xf32>
    %5 = arith.addf %2, %4 : vector<8x896xf32>
    %cst_5 = arith.constant 0.000000e+00 : f32
    %6 = vector.broadcast %cst_5 : f32 to vector<8x896xf32>
    %7 = arith.maximumf %5, %6 : vector<8x896xf32>
    %8 = arith.truncf %7 : vector<8x896xf32> to vector<8x896xbf16>
    %c0_6 = arith.constant 0 : index
    %c0_7 = arith.constant 0 : index
    %9 = vector.load %arg4[%c0_6, %c0_7] : memref<896x896xbf16, #tpu.memory_space<vmem>>, vector<896x896xbf16>
    %cst_8 = arith.constant dense<0.000000e+00> : vector<8x896xf32>
    %10 = tpu.matmul %8, %9, %cst_8 {dimension_numbers = #tpu.dot_dimension_numbers<[1], [0], [0], [1], [0, 0, 1, 1], [], []>} : vector<8x896xbf16>, vector<896x896xbf16>, vector<8x896xf32> -> vector<8x896xf32>
    %c0_9 = arith.constant 0 : index
    %c0_10 = arith.constant 0 : index
    %11 = vector.load %arg5[%c0_9, %c0_10] : memref<1x896xf32, #tpu.memory_space<vmem>>, vector<1x896xf32>
    %12 = vector.broadcast %11 : vector<1x896xf32> to vector<8x896xf32>
    %13 = arith.addf %10, %12 : vector<8x896xf32>
    %cst_11 = arith.constant 0.000000e+00 : f32
    %14 = vector.broadcast %cst_11 : f32 to vector<8x896xf32>
    %15 = arith.maximumf %13, %14 : vector<8x896xf32>
    %16 = arith.truncf %15 : vector<8x896xf32> to vector<8x896xbf16>
    %c0_12 = arith.constant 0 : index
    %c0_13 = arith.constant 0 : index
    %17 = vector.load %arg6[%c0_12, %c0_13] : memref<896x128xbf16, #tpu.memory_space<vmem>>, vector<896x128xbf16>
    %cst_14 = arith.constant dense<0.000000e+00> : vector<8x128xf32>
    %18 = tpu.matmul %16, %17, %cst_14 {dimension_numbers = #tpu.dot_dimension_numbers<[1], [0], [0], [1], [0, 0, 1, 1], [], []>} : vector<8x896xbf16>, vector<896x128xbf16>, vector<8x128xf32> -> vector<8x128xf32>
    %c0_15 = arith.constant 0 : index
    %c0_16 = arith.constant 0 : index
    %19 = vector.load %arg7[%c0_15, %c0_16] : memref<1x128xf32, #tpu.memory_space<vmem>>, vector<1x128xf32>
    %20 = vector.broadcast %19 : vector<1x128xf32> to vector<8x128xf32>
    %21 = arith.addf %18, %20 : vector<8x128xf32>
    %cst_17 = arith.constant dense<0xFF800000> : vector<8xf32>
    %22 = vector.multi_reduction <maximumf>, %21, %cst_17 [1] : vector<8x128xf32> to vector<8xf32>
    %23 = vector.shape_cast %22 : vector<8xf32> to vector<8x1xf32>
    %24 = vector.broadcast %23 : vector<8x1xf32> to vector<8x128xf32>
    %25 = arith.subf %21, %24 : vector<8x128xf32>
    %26 = math.exp %25 : vector<8x128xf32>
    %cst_18 = arith.constant dense<0.000000e+00> : vector<8xf32>
    %27 = vector.multi_reduction <add>, %26, %cst_18 [1] : vector<8x128xf32> to vector<8xf32>
    %28 = vector.shape_cast %27 : vector<8xf32> to vector<8x1xf32>
    %29 = math.log %28 : vector<8x1xf32>
    %30 = vector.broadcast %29 : vector<8x1xf32> to vector<8x128xf32>
    %31 = arith.subf %25, %30 : vector<8x128xf32>
    %c0_19 = arith.constant 0 : index
    %c0_20 = arith.constant 0 : index
    %32 = vector.load %arg8[%c0_19, %c0_20] : memref<8x128xf32, #tpu.memory_space<vmem>>, vector<8x128xf32>
    tpu.vector_store %arg8[%c0_19, %c0_20], %31 {strides = array<i32>} : memref<8x128xf32, #tpu.memory_space<vmem>>, vector<8x128xf32>,
    return
  }
  func.func @transform_0(%arg0: i32) -> (i32, i32) {
    %c0_i32 = arith.constant 0 : i32
    %c0_i32_0 = arith.constant 0 : i32
    return %arg0, %c0_i32 : i32, i32
  }
  func.func @transform_1(%arg0: i32) -> (i32, i32) {
    %c0_i32 = arith.constant 0 : i32
    %c0_i32_0 = arith.constant 0 : i32
    %c0_i32_1 = arith.constant 0 : i32
    return %c0_i32, %c0_i32_0 : i32, i32
  }
  func.func @transform_2(%arg0: i32) -> (i32, i32) {
    %c0_i32 = arith.constant 0 : i32
    %c0_i32_0 = arith.constant 0 : i32
    %c0_i32_1 = arith.constant 0 : i32
    return %c0_i32, %c0_i32_0 : i32, i32
  }
  func.func @transform_3(%arg0: i32) -> (i32, i32) {
    %c0_i32 = arith.constant 0 : i32
    %c0_i32_0 = arith.constant 0 : i32
    %c0_i32_1 = arith.constant 0 : i32
    return %c0_i32, %c0_i32_0 : i32, i32
  }
  func.func @transform_4(%arg0: i32) -> (i32, i32) {
    %c0_i32 = arith.constant 0 : i32
    %c0_i32_0 = arith.constant 0 : i32
    %c0_i32_1 = arith.constant 0 : i32
    return %c0_i32, %c0_i32_0 : i32, i32
  }
  func.func @transform_5(%arg0: i32) -> (i32, i32) {
    %c0_i32 = arith.constant 0 : i32
    %c0_i32_0 = arith.constant 0 : i32
    %c0_i32_1 = arith.constant 0 : i32
    return %c0_i32, %c0_i32_0 : i32, i32
  }
  func.func @transform_6(%arg0: i32) -> (i32, i32) {
    %c0_i32 = arith.constant 0 : i32
    %c0_i32_0 = arith.constant 0 : i32
    %c0_i32_1 = arith.constant 0 : i32
    return %c0_i32, %c0_i32_0 : i32, i32
  }
  func.func @transform_7(%arg0: i32) -> (i32, i32) {
    %c0_i32 = arith.constant 0 : i32
    %c0_i32_0 = arith.constant 0 : i32
    return %arg0, %c0_i32 : i32, i32
  }
}

</mosaic_0001>

<bundles_post_ra>
// kernel: net_forward.1
= control target key start
LH: loop header
LB: loop body
LE: loop exit
PB: predicated region body
PF: predicated region fallthrough
CT: control target
= control target key end

     0   :  { %12 = vsyncpa [#allocation3], 0  ;;  %s12744_s0 = inlined_call_operand.vmem [shape: bf16[16,896], index: 0, kind: input, shape index: {}]   ;;  %s12745_s1 = inlined_call_operand.vmem [shape: bf16[896,896], index: 1, kind: input, shape index: {}]   ;;  %s12746_s2 = inlined_call_operand.vmem [shape: f32[1,896], index: 2, kind: input, shape index: {}]   ;;  %s12747_s3 = inlined_call_operand.vmem [shape: bf16[896,896], index: 3, kind: input, shape index: {}]   ;;  %s12748_s4 = inlined_call_operand.vmem [shape: f32[1,896], index: 4, kind: input, shape index: {}]   ;;  %s12749_s5 = inlined_call_operand.vmem [shape: bf16[896,128], index: 5, kind: input, shape index: {}]   ;;  %s12750_s6 = inlined_call_operand.vmem [shape: f32[1,128], index: 6, kind: input, shape index: {}]   ;;  %s12751_s7 = inlined_call_operand.hbm [shape: f32[16,128], index: 7, kind: output, shape index: {}]  }
   0x1   :  { %14 = vsyncpa [#allocation3 + $0x1], 0  ;;  %s9907_s24 = smov 0   ;;  %s9909_s25 = smov 0  }
   0x2   :  { %s9911_s26 = smov 0   ;;  %s9913_s27 = smov 0  }
   0x3 LB: > { %s9928_s28 = sadd.s32 4294967295, %s9861_s27   ;;  %s7340_s29 = sadd.s32 4294967294, %s9861_s27   ;;  %s9861_s27 = sphi %s9913_s27, %s12757_s27   ;;  %s9857_s26 = sphi %s9911_s26, %s12756_s26   ;;  %s9853_s25 = sphi %s9909_s25, %s12755_s25   ;;  %s9849_s24 = sphi %s9907_s24, %s12754_s24  }
   0x4   : > { %s9932_s30 = sadd.s32 1, %s9861_s27   ;;  %s179_s8 = sadd.s32 1, %s9857_s26 }
   0x5   : > { %s176_s9 = ssub.s32 %s9861_s27, %s9932_s30  ;;  %p189_p0 = scmp.ne.s32.totalorder %s9857_s26, %s9853_s25 }
   0x6   : > { %p177_p1 = scmp.eq.s32.totalorder %s176_s9, 0  ;;  %p190_p2 = scmp.eq.s32.totalorder %s9928_s28, 1 }
   0x7   : > { %p195_p3 = scmp.ne.s32.totalorder %s9853_s25, %s9849_s24  ;;  %p196_p4 = scmp.eq.s32.totalorder %s7340_s29, 1 }
   0x8   : > { %s9943_s10 = scalar_select %p177_p1, %s9857_s26, %s179_s8  }
   0x9   : > { %p9945_p5 = por %p190_p2, %p189_p0  ;;  %p9949_p6 = por %p196_p4, %p195_p3 }
   0xa   : > { %p7343_p7 = scmp.ge.s32.totalorder %s9861_s27, 1  ;;  %p240_p8 = scmp.lt.s32.totalorder %s9861_s27, 3 }
   0xc   : > { %p241_p9 = pnand %p7343_p7, %p240_p8 }
   0xd   : > { %v8610_v0 = vld [vmem:[%s12745_s1 + $0x4] ss:$28 sps:$4 sm:$0xff] (!%p241_p9)   ;;  %v8612_v1 = vld [vmem:[%s12745_s1 + $0xc] ss:$28 sps:$4 sm:$0xff] (!%p241_p9)   ;;  %v8616_v4 = vld [vmem:[%s12745_s1 + $0x3c] ss:$28 sps:$4 sm:$0xff] (!%p241_p9)  }
   0xe   : > { %244 = sbr.rel (%p241_p9) target bundleno = 1705 (0x6a9), region = 48  ;;  %2808 = vmatprep.subr.bf16.mxu0 (!%p241_p9), %v8610_v0  ;;  %v8614_v2 = vld [vmem:[%s12745_s1] ss:$28 sps:$4 sm:$0xff] (!%p241_p9)   ;;  %v8615_v3 = vld [vmem:[%s12745_s1 + $0x8] ss:$28 sps:$4 sm:$0xff] (!%p241_p9)   ;;  %2972 = vmatprep.subr.bf16.mxu1 (!%p241_p9), %v8612_v1  ;;  %p272_p10 = scmp.lt.s32.totalorder (!%p241_p9), %s9928_s28, 1 }
   0xf   : > { %2809 = vmatpush1.bf16.msra.mxu0 (!%p241_p9), %v8614_v2  ;;  %2973 = vmatpush1.bf16.msra.mxu1 (!%p241_p9), %v8615_v3  ;;  %v8618_v5 = vld [vmem:[%s12745_s1 + $0x44] ss:$28 sps:$4 sm:$0xff] (!%p241_p9)   ;;  %v8620_v6 = vld [vmem:[%s12745_s1 + $0x38] ss:$28 sps:$4 sm:$0xff] (!%p241_p9)   ;;  %v8626_v10 = vld [vmem:[%s12745_s1 + $0x70] ss:$28 sps:$4 sm:$0xff] (!%p241_p9)  }
  0x10   : > { %2810 = vmatprep.subr.bf16.mxu0 (!%p241_p9), %v8616_v4  ;;  %v8621_v7 = vld [vmem:[%s12745_s1 + $0x40] ss:$28 sps:$4 sm:$0xff] (!%p241_p9)   ;;  %2974 = vmatprep.subr.bf16.mxu1 (!%p241_p9), %v8618_v5  ;;  %v8622_v8 = vld [vmem:[%s12745_s1 + $0x74] ss:$28 sps:$4 sm:$0xff] (!%p241_p9)   ;;  %v8628_v12 = vld [vmem:[%s12745_s1 + $0xac] ss:$28 sps:$4 sm:$0xff] (!%p241_p9)  }
  0x11   : > { %v8624_v9 = vld [vmem:[%s12745_s1 + $0x7c] ss:$28 sps:$4 sm:$0xff] (!%p241_p9)   ;;  %v8630_v13 = vld [vmem:[%s12745_s1 + $0xb4] ss:$28 sps:$4 sm:$0xff] (!%p241_p9)   ;;  %v8632_v14 = vld [vmem:[%s12745_s1 + $0xa8] ss:$28 sps:$4 sm:$0xff] (!%p241_p9)  }
  0x12   : > { %v8627_v11 = vld [vmem:[%s12745_s1 + $0x78] ss:$28 sps:$4 sm:$0xff] (!%p241_p9)   ;;  %v8633_v15 = vld [vmem:[%s12745_s1 + $0xb0] ss:$28 sps:$4 sm:$0xff] (!%p241_p9)   ;;  %v8634_v16 = vld [vmem:[%s12745_s1 + $0xe4] ss:$28 sps:$4 sm:$0xff] (!%p241_p9)  }
  0x13   : > { %2811 = vmatpush1.bf16.msra.mxu0 (!%p241_p9), %v8620_v6  ;;  %2975 = vmatpush1.bf16.msra.mxu1 (!%p241_p9), %v8621_v7  ;;  %v8636_v17 = vld [vmem:[%s12745_s1 + $0xec] ss:$28 sps:$4 sm:$0xff] (!%p241_p9)   ;;  %v8638_v18 = vld [vmem:[%s12745_s1 + $0xe0] ss:$28 sps:$4 sm:$0xff] (!%p241_p9)   ;;  %v8644_v22 = vld [vmem:[%s12745_s1 + $0x118] ss:$28 sps:$4 sm:$0xff] (!%p241_p9)  }
  0x14   : > { %2812 = vmatprep.subr.bf16.mxu0 (!%p241_p9), %v8622_v8  ;;  %2976 = vmatprep.subr.bf16.mxu1 (!%p241_p9), %v8624_v9  ;;  %v8639_v19 = vld [vmem:[%s12745_s1 + $0xe8] ss:$28 sps:$4 sm:$0xff] (!%p241_p9)   ;;  %v8640_v20 = vld [vmem:[%s12745_s1 + $0x11c] ss:$28 sps:$4 sm:$0xff] (!%p241_p9)   ;;  %v8646_v24 = vld [vmem:[%s12745_s1 + $0x154] ss:$28 sps:$4 sm:$0xff] (!%p241_p9)  }
  0x15   : > { %v8642_v21 = vld [vmem:[%s12745_s1 + $0x124] ss:$28 sps:$4 sm:$0xff]   ;;  %v8648_v25 = vld [vmem:[%s12745_s1 + $0x15c] ss:$28 sps:$4 sm:$0xff]   ;;  %v8650_v26 = vld [vmem:[%s12745_s1 + $0x150] ss:$28 sps:$4 sm:$0xff]  }
  0x16   : > { %v8645_v23 = vld [vmem:[%s12745_s1 + $0x120] ss:$28 sps:$4 sm:$0xff]   ;;  %v8651_v27 = vld [vmem:[%s12745_s1 + $0x158] ss:$28 sps:$4 sm:$0xff]   ;;  %v8652_v28 = vld [vmem:[%s12745_s1 + $0x18c] ss:$28 sps:$4 sm:$0xff]  }
  0x17   : > { %2813 = vmatpush1.bf16.msra.mxu0 %v8626_v10  ;;  %2977 = vmatpush1.bf16.msra.mxu1 %v8627_v11  ;;  %v8654_v29 = vld [vmem:[%s12745_s1 + $0x194] ss:$28 sps:$4 sm:$0xff]   ;;  %v8656_v30 = vld [vmem:[%s12745_s1 + $0x188] ss:$28 sps:$4 sm:$0xff]   ;;  %v8662_v34 = vld [vmem:[%s12745_s1 + $0x1c0] ss:$28 sps:$4 sm:$0xff]  }
  0x18   : > { %2814 = vmatprep.subr.bf16.mxu0 %v8628_v12  ;;  %2978 = vmatprep.subr.bf16.mxu1 %v8630_v13  ;;  %v8657_v31 = vld [vmem:[%s12745_s1 + $0x190] ss:$28 sps:$4 sm:$0xff]   ;;  %v8658_v32 = vld [vmem:[%s12745_s1 + $0x1c4] ss:$28 sps:$4 sm:$0xff]   ;;  %s273_s15 = scalar_select %p272_p10, %s9928_s28, 1  ;;  %vm9865_vm0 = vmmov 0  }
  0x19   : > { %v8660_v33 = vld [vmem:[%s12745_s1 + $0x1cc] ss:$28 sps:$4 sm:$0xff]   ;;  %v8664_v36 = vld [vmem:[%s12745_s1 + $0x1fc] ss:$28 sps:$4 sm:$0xff]   ;;  %v8666_v37 = vld [vmem:[%s12745_s1 + $0x204] ss:$28 sps:$4 sm:$0xff]  }
  0x1a   : > { %v8663_v35 = vld [vmem:[%s12745_s1 + $0x1c8] ss:$28 sps:$4 sm:$0xff]   ;;  %v8668_v38 = vld [vmem:[%s12745_s1 + $0x1f8] ss:$28 sps:$4 sm:$0xff]   ;;  %s8567_s22 = smul.u32 28, %s273_s15  ;;  %s269_s15 = sand.u32 1, %s9853_s25  }
  0x1b   : > { %2815 = vmatpush1.bf16.msra.mxu0 %v8632_v14  ;;  %2979 = vmatpush1.bf16.msra.mxu1 %v8633_v15  ;;  %v8669_v39 = vld [vmem:[%s12745_s1 + $0x200] ss:$28 sps:$4 sm:$0xff]   ;;  %v8670_v40 = vld [vmem:[%s12745_s1 + $0x234] ss:$28 sps:$4 sm:$0xff]   ;;  %v8676_v44 = vld [vmem:[%s12745_s1 + $0x26c] ss:$28 sps:$4 sm:$0xff]  }
  0x1c   : > { %2816 = vmatprep.subr.bf16.mxu0 %v8634_v16  ;;  %2980 = vmatprep.subr.bf16.mxu1 %v8636_v17  ;;  %v8672_v41 = vld [vmem:[%s12745_s1 + $0x23c] ss:$28 sps:$4 sm:$0xff]   ;;  %v8674_v42 = vld [vmem:[%s12745_s1 + $0x230] ss:$28 sps:$4 sm:$0xff]   ;;  %s10092_s21 = scalar_lea.vmem %s12744_s0, %s8567_s22  ;;  %v8680_v47 = vld [vmem:[%s12745_s1 + $0x268] ss:$28 sps:$4 sm:$0xff]  }
  0x1d   : > { %v8675_v43 = vld [vmem:[%s12745_s1 + $0x238] ss:$28 sps:$4 sm:$0xff]   ;;  %v278_v46 = vld [vmem:[%s10092_s21] sm:$0xff]  ;;  %v8681_v49 = vld [vmem:[%s12745_s1 + $0x270] ss:$28 sps:$4 sm:$0xff]   ;;  %s7344_s18 = sshll.u32 %s269_s15, 3 }
  0x1e   : > { %v8678_v45 = vld [vmem:[%s12745_s1 + $0x274] ss:$28 sps:$4 sm:$0xff]   ;;  %v10104_v48 = vcombine.high %v278_v46, %v278_v46  ;;  %v8682_v50 = vld [vmem:[%s12745_s1 + $0x2a4] ss:$28 sps:$4 sm:$0xff]   ;;  %v8684_v51 = vld [vmem:[%s12745_s1 + $0x2ac] ss:$28 sps:$4 sm:$0xff]   ;;  %v10168_v5 = vcombine.low %v278_v46, %v278_v46 }
  0x1f   : > { %2817 = vmatpush1.bf16.msra.mxu0 %v8638_v18  ;;  %2981 = vmatpush1.bf16.msra.mxu1 %v8639_v19  ;;  %v8686_v52 = vld [vmem:[%s12745_s1 + $0x2a0] ss:$28 sps:$4 sm:$0xff]   ;;  %v8687_v53 = vld [vmem:[%s12745_s1 + $0x2a8] ss:$28 sps:$4 sm:$0xff]   ;;  %v8692_v56 = vld [vmem:[%s12745_s1 + $0x2d8] ss:$28 sps:$4 sm:$0xff]  }
  0x20   : > { %2818 = vmatprep.subr.bf16.mxu0 %v8640_v20  ;;  %2982 = vmatprep.subr.bf16.mxu1 %v8642_v21  ;;  %v8688_v54 = vld [vmem:[%s12745_s1 + $0x2dc] ss:$28 sps:$4 sm:$0xff]   ;;  %v8690_v55 = vld [vmem:[%s12745_s1 + $0x2e4] ss:$28 sps:$4 sm:$0xff]   ;;  %v8694_v58 = vld [vmem:[%s12745_s1 + $0x314] ss:$28 sps:$4 sm:$0xff]  }
  0x21   : > { %2840 = vmatprep.mubr.bf16.mxu0 %v10104_v48  ;;  %3004 = vmatprep.mubr.bf16.mxu1 %v10104_v48  ;;  %v8693_v57 = vld [vmem:[%s12745_s1 + $0x2e0] ss:$28 sps:$4 sm:$0xff]   ;;  %v8698_v60 = vld [vmem:[%s12745_s1 + $0x310] ss:$28 sps:$4 sm:$0xff]   ;;  %v8699_v61 = vld [vmem:[%s12745_s1 + $0x318] ss:$28 sps:$4 sm:$0xff]  }
  0x22   : > { %v8696_v59 = vld [vmem:[%s12745_s1 + $0x31c] ss:$28 sps:$4 sm:$0xff]   ;;  %v8700_v62 = vld [vmem:[%s12745_s1 + $0x34c] ss:$28 sps:$4 sm:$0xff]   ;;  %v8702_v63 = vld [vmem:[%s12745_s1 + $0x354] ss:$28 sps:$4 sm:$0xff]  }
  0x23   : > { %2819 = vmatpush1.bf16.msra.mxu0 %v8644_v22  ;;  %2983 = vmatpush1.bf16.msra.mxu1 %v8645_v23  ;;  %v8704_v0 = vld [vmem:[%s12745_s1 + $0x348] ss:$28 sps:$4 sm:$0xff]   ;;  %v8705_v1 = vld [vmem:[%s12745_s1 + $0x350] ss:$28 sps:$4 sm:$0xff]   ;;  %v8707_v4 = vld [vmem:[%s12745_s1 + $0x380] ss:$28 sps:$4 sm:$0xff]  }
  0x24   : > { %2820 = vmatprep.subr.bf16.mxu0 %v8646_v24  ;;  %2984 = vmatprep.subr.bf16.mxu1 %v8648_v25  ;;  %v8709_v2 = vld [vmem:[%s12745_s1 + $0x384] ss:$28 sps:$4 sm:$0xff]   ;;  %v8712_v3 = vld [vmem:[%s12745_s1 + $0x38c] ss:$28 sps:$4 sm:$0xff]   ;;  %v8716_v7 = vld [vmem:[%s12745_s1 + $0x3bc] ss:$28 sps:$4 sm:$0xff]  }
  0x25   : > { %v8710_v6 = vld [vmem:[%s12745_s1 + $0x388] ss:$28 sps:$4 sm:$0xff]   ;;  %v8714_v9 = vld [vmem:[%s12745_s1 + $0x3b8] ss:$28 sps:$4 sm:$0xff]   ;;  %v8717_v10 = vld [vmem:[%s12745_s1 + $0x3c0] ss:$28 sps:$4 sm:$0xff]  }
  0x26   : > { %v8719_v8 = vld [vmem:[%s12745_s1 + $0x3c4] ss:$28 sps:$4 sm:$0xff]   ;;  %v8722_v11 = vld [vmem:[%s12745_s1 + $0x3f4] ss:$28 sps:$4 sm:$0xff]   ;;  %v8725_v12 = vld [vmem:[%s12745_s1 + $0x3fc] ss:$28 sps:$4 sm:$0xff]  }
  0x27   : > { %2821 = vmatpush1.bf16.msra.mxu0 %v8650_v26  ;;  %2985 = vmatpush1.bf16.msra.mxu1 %v8651_v27  ;;  %v8720_v13 = vld [vmem:[%s12745_s1 + $0x3f0] ss:$28 sps:$4 sm:$0xff]   ;;  %v8723_v14 = vld [vmem:[%s12745_s1 + $0x3f8] ss:$28 sps:$4 sm:$0xff]   ;;  %v8726_v17 = vld [vmem:[%s12745_s1 + $0x428] ss:$28 sps:$4 sm:$0xff]  }
  0x28   : > { %2822 = vmatprep.subr.bf16.mxu0 %v8652_v28  ;;  %2986 = vmatprep.subr.bf16.mxu1 %v8654_v29  ;;  %v8728_v15 = vld [vmem:[%s12745_s1 + $0x42c] ss:$28 sps:$4 sm:$0xff]   ;;  %v8731_v16 = vld [vmem:[%s12745_s1 + $0x434] ss:$28 sps:$4 sm:$0xff]   ;;  %v8734_v19 = vld [vmem:[%s12745_s1 + $0x464] ss:$28 sps:$4 sm:$0xff]  }
  0x29   : > { %v8729_v18 = vld [vmem:[%s12745_s1 + $0x430] ss:$28 sps:$4 sm:$0xff]   ;;  %v8732_v21 = vld [vmem:[%s12745_s1 + $0x460] ss:$28 sps:$4 sm:$0xff]   ;;  %v8735_v22 = vld [vmem:[%s12745_s1 + $0x468] ss:$28 sps:$4 sm:$0xff]  }
  0x2a   : > { %v8737_v20 = vld [vmem:[%s12745_s1 + $0x46c] ss:$28 sps:$4 sm:$0xff]   ;;  %v8740_v23 = vld [vmem:[%s12745_s1 + $0x49c] ss:$28 sps:$4 sm:$0xff]   ;;  %v8743_v24 = vld [vmem:[%s12745_s1 + $0x4a4] ss:$28 sps:$4 sm:$0xff]  }
  0x2b   : > { %2823 = vmatpush1.bf16.msra.mxu0 %v8656_v30  ;;  %2987 = vmatpush1.bf16.msra.mxu1 %v8657_v31  ;;  %v8738_v25 = vld [vmem:[%s12745_s1 + $0x498] ss:$28 sps:$4 sm:$0xff]   ;;  %v8741_v26 = vld [vmem:[%s12745_s1 + $0x4a0] ss:$28 sps:$4 sm:$0xff]   ;;  %v10242_v29 = vld [vmem:[%s10092_s21 + $0x8] sm:$0xff]  ;;  %s271_s19 = scalar_lea.vmem [#allocation2], %s7344_s18 }
  0x2c   : > { %2824 = vmatprep.subr.bf16.mxu0 %v8658_v32  ;;  %2988 = vmatprep.subr.bf16.mxu1 %v8660_v33  ;;  %v8746_v27 = vld [vmem:[%s12745_s1 + $0x4d4] ss:$28 sps:$4 sm:$0xff]   ;;  %v8749_v28 = vld [vmem:[%s12745_s1 + $0x4dc] ss:$28 sps:$4 sm:$0xff]   ;;  %v10246_v30 = vcombine.high %v10242_v29, %v10242_v29  ;;  %v8752_v33 = vld [vmem:[%s12745_s1 + $0x50c] ss:$28 sps:$4 sm:$0xff]  }
  0x2d   : > { %v8744_v31 = vld [vmem:[%s12745_s1 + $0x4d0] ss:$28 sps:$4 sm:$0xff]   ;;  %v8747_v32 = vld [vmem:[%s12745_s1 + $0x4d8] ss:$28 sps:$4 sm:$0xff]   ;;  %s7281_s20 = sshll.u32 %s271_s19, 4  ;;  %s7268_s9 = scalar_lea.sflag [#allocation3], %s269_s15  ;;  %s12704_s20 = int_to_ptr.vmem [resolvable:$true] %s7281_s20 }
  0x2e   : > { %v8773_v46 = vld [vmem:[%s12745_s1 + $0x5bc] ss:$28 sps:$4 sm:$0xff]   ;;  %s9799_s13 = scalar_lea.vmem %s12704_s20, 128 }
  0x2f   : > { %2825 = vmatpush1.bf16.msra.mxu0 %v8662_v34  ;;  %2989 = vmatpush1.bf16.msra.mxu1 %v8663_v35  ;;  %v8755_v34 = vld [vmem:[%s12745_s1 + $0x514] ss:$28 sps:$4 sm:$0xff]   ;;  %v8750_v35 = vld [vmem:[%s12745_s1 + $0x508] ss:$28 sps:$4 sm:$0xff]   ;;  %p9800_p11 = scmp.ne.s32.totalorder %s12704_s20, %s9799_s13 }
  0x30   : > { %2826 = vmatprep.subr.bf16.mxu0 %v8664_v36  ;;  %2990 = vmatprep.subr.bf16.mxu1 %v8666_v37  ;;  %v8753_v36 = vld [vmem:[%s12745_s1 + $0x510] ss:$28 sps:$4 sm:$0xff]   ;;  %v8758_v37 = vld [vmem:[%s12745_s1 + $0x544] ss:$28 sps:$4 sm:$0xff]  }
  0x31   : > { %p9801_p12 = pnand %p9800_p11, %p9945_p5 }
  0x33   : > { %2827 = vmatpush1.bf16.msra.mxu0 %v8668_v38  ;;  %2991 = vmatpush1.bf16.msra.mxu1 %v8669_v39  ;;  %v8761_v38 = vld [vmem:[%s12745_s1 + $0x54c] ss:$28 sps:$4 sm:$0xff]   ;;  %v8756_v39 = vld [vmem:[%s12745_s1 + $0x540] ss:$28 sps:$4 sm:$0xff]   ;;  %p9802_p13 = pneg %p9801_p12 }
  0x34   : > { %2828 = vmatprep.subr.bf16.mxu0 %v8670_v40  ;;  %2992 = vmatprep.subr.bf16.mxu1 %v8672_v41  ;;  %v8759_v40 = vld [vmem:[%s12745_s1 + $0x548] ss:$28 sps:$4 sm:$0xff]   ;;  %v8764_v41 = vld [vmem:[%s12745_s1 + $0x57c] ss:$28 sps:$4 sm:$0xff]  }
  0x37   : > { %2829 = vmatpush1.bf16.msra.mxu0 %v8674_v42  ;;  %2993 = vmatpush1.bf16.msra.mxu1 %v8675_v43  ;;  %v8767_v42 = vld [vmem:[%s12745_s1 + $0x584] ss:$28 sps:$4 sm:$0xff]   ;;  %v8762_v43 = vld [vmem:[%s12745_s1 + $0x578] ss:$28 sps:$4 sm:$0xff]  }
  0x38   : > { %2830 = vmatprep.subr.bf16.mxu0 %v8676_v44  ;;  %2994 = vmatprep.subr.bf16.mxu1 %v8678_v45  ;;  %v8765_v44 = vld [vmem:[%s12745_s1 + $0x580] ss:$28 sps:$4 sm:$0xff]   ;;  %v8770_v45 = vld [vmem:[%s12745_s1 + $0x5b4] ss:$28 sps:$4 sm:$0xff]  }
  0x3b   : > { %2831 = vmatpush1.bf16.msra.mxu0 %v8680_v47  ;;  %2995 = vmatpush1.bf16.msra.mxu1 %v8681_v49  ;;  %v8768_v47 = vld [vmem:[%s12745_s1 + $0x5b0] ss:$28 sps:$4 sm:$0xff]   ;;  %v8771_v49 = vld [vmem:[%s12745_s1 + $0x5b8] ss:$28 sps:$4 sm:$0xff]  }
  0x3c   : > { %2832 = vmatprep.subr.bf16.mxu0 %v8682_v50  ;;  %2996 = vmatprep.subr.bf16.mxu1 %v8684_v51  ;;  %v8776_v50 = vld [vmem:[%s12745_s1 + $0x5ec] ss:$28 sps:$4 sm:$0xff]   ;;  %v8779_v51 = vld [vmem:[%s12745_s1 + $0x5f4] ss:$28 sps:$4 sm:$0xff]  }
  0x3f   : > { %2833 = vmatpush1.bf16.msra.mxu0 %v8686_v52  ;;  %2997 = vmatpush1.bf16.msra.mxu1 %v8687_v53  ;;  %v8774_v52 = vld [vmem:[%s12745_s1 + $0x5e8] ss:$28 sps:$4 sm:$0xff]   ;;  %v8777_v53 = vld [vmem:[%s12745_s1 + $0x5f0] ss:$28 sps:$4 sm:$0xff]  }
  0x40   : > { %2834 = vmatprep.subr.bf16.mxu0 %v8688_v54  ;;  %2998 = vmatprep.subr.bf16.mxu1 %v8690_v55  ;;  %v8782_v54 = vld [vmem:[%s12745_s1 + $0x624] ss:$28 sps:$4 sm:$0xff]   ;;  %v8785_v55 = vld [vmem:[%s12745_s1 + $0x62c] ss:$28 sps:$4 sm:$0xff]  }
  0x43   : > { %2835 = vmatpush1.bf16.msra.mxu0 %v8692_v56  ;;  %2999 = vmatpush1.bf16.msra.mxu1 %v8693_v57  ;;  %v8780_v56 = vld [vmem:[%s12745_s1 + $0x620] ss:$28 sps:$4 sm:$0xff]   ;;  %v8783_v57 = vld [vmem:[%s12745_s1 + $0x628] ss:$28 sps:$4 sm:$0xff]  }
  0x44   : > { %2836 = vmatprep.subr.bf16.mxu0 %v8694_v58  ;;  %3000 = vmatprep.subr.bf16.mxu1 %v8696_v59  ;;  %v8788_v58 = vld [vmem:[%s12745_s1 + $0x65c] ss:$28 sps:$4 sm:$0xff]   ;;  %v8791_v59 = vld [vmem:[%s12745_s1 + $0x664] ss:$28 sps:$4 sm:$0xff]  }
  0x47   : > { %2837 = vmatpush1.bf16.msra.mxu0 %v8698_v60  ;;  %3001 = vmatpush1.bf16.msra.mxu1 %v8699_v61  ;;  %v8786_v60 = vld [vmem:[%s12745_s1 + $0x658] ss:$28 sps:$4 sm:$0xff]   ;;  %v8789_v61 = vld [vmem:[%s12745_s1 + $0x660] ss:$28 sps:$4 sm:$0xff]  }
  0x48   : > { %2838 = vmatprep.subr.bf16.mxu0 %v8700_v62  ;;  %3002 = vmatprep.subr.bf16.mxu1 %v8702_v63  ;;  %v8794_v62 = vld [vmem:[%s12745_s1 + $0x694] ss:$28 sps:$4 sm:$0xff]   ;;  %v8797_v63 = vld [vmem:[%s12745_s1 + $0x69c] ss:$28 sps:$4 sm:$0xff]  }
  0x4b   : > { %2839 = vmatpush1.bf16.msra.mxu0 %v8704_v0  ;;  %3003 = vmatpush1.bf16.msra.mxu1 %v8705_v1  ;;  %v8792_v0 = vld [vmem:[%s12745_s1 + $0x690] ss:$28 sps:$4 sm:$0xff]   ;;  %v8795_v1 = vld [vmem:[%s12745_s1 + $0x698] ss:$28 sps:$4 sm:$0xff]  }
  0x4c   : > { %2849 = vmatprep.subr.bf16.mxu0 %v8709_v2  ;;  %3013 = vmatprep.subr.bf16.mxu1 %v8712_v3  ;;  %v8800_v2 = vld [vmem:[%s12745_s1 + $0x6cc] ss:$28 sps:$4 sm:$0xff]   ;;  %v8803_v3 = vld [vmem:[%s12745_s1 + $0x6d4] ss:$28 sps:$4 sm:$0xff]  }
  0x4e   : > { %2841 = vmatmul.mubr.bf16.vlgmr.msra.gmra.mrb[0].mxu0 %v10168_v5  ;;  %3005 = vmatmul.mubr.bf16.vlgmr.msra.gmra.mrb[0].mxu1 %v10168_v5 }
  0x4f   : > { %2850 = vmatpush1.bf16.msra.mxu0 %v8707_v4  ;;  %3014 = vmatpush1.bf16.msra.mxu1 %v8710_v6  ;;  %v8798_v4 = vld [vmem:[%s12745_s1 + $0x6c8] ss:$28 sps:$4 sm:$0xff]   ;;  %v8801_v6 = vld [vmem:[%s12745_s1 + $0x6d0] ss:$28 sps:$4 sm:$0xff]  }
  0x50   : > { %2851 = vmatprep.subr.bf16.mxu0 %v8716_v7  ;;  %3015 = vmatprep.subr.bf16.mxu1 %v8719_v8  ;;  %v8807_v7 = vld [vmem:[%s12745_s1 + $0x704] ss:$28 sps:$4 sm:$0xff]   ;;  %v8810_v8 = vld [vmem:[%s12745_s1 + $0x70c] ss:$28 sps:$4 sm:$0xff]  }
  0x51   : > { %2881 = vmatprep.mubr.bf16.mxu0 %v10246_v30  ;;  %3045 = vmatprep.mubr.bf16.mxu1 %v10246_v30 }
  0x53   : > { %2852 = vmatpush1.bf16.msra.mxu0 %v8714_v9  ;;  %3016 = vmatpush1.bf16.msra.mxu1 %v8717_v10  ;;  %v8805_v9 = vld [vmem:[%s12745_s1 + $0x700] ss:$28 sps:$4 sm:$0xff]   ;;  %v10375_v10 = vcombine.low %v10242_v29, %v10242_v29  ;;  %v8833_v29 = vld [vmem:[%s12745_s1 + $0x7e8] ss:$28 sps:$4 sm:$0xff]  }
  0x54   : > { %2853 = vmatprep.subr.bf16.mxu0 %v8722_v11  ;;  %3017 = vmatprep.subr.bf16.mxu1 %v8725_v12  ;;  %v8808_v11 = vld [vmem:[%s12745_s1 + $0x708] ss:$28 sps:$4 sm:$0xff]   ;;  %v8814_v12 = vld [vmem:[%s12745_s1 + $0x73c] ss:$28 sps:$4 sm:$0xff]  }
  0x57   : > { %2854 = vmatpush1.bf16.msra.mxu0 %v8720_v13  ;;  %3018 = vmatpush1.bf16.msra.mxu1 %v8723_v14  ;;  %v10384_v13 = vld [vmem:[%s10092_s21 + $0x10] sm:$0xff]  ;;  %v8817_v14 = vld [vmem:[%s12745_s1 + $0x744] ss:$28 sps:$4 sm:$0xff]  }
  0x58   : > { %2855 = vmatprep.subr.bf16.mxu0 %v8728_v15  ;;  %3019 = vmatprep.subr.bf16.mxu1 %v8731_v16  ;;  %v10391_v15 = vcombine.high %v10384_v13, %v10384_v13  ;;  %v8812_v16 = vld [vmem:[%s12745_s1 + $0x738] ss:$28 sps:$4 sm:$0xff]  }
  0x5b   : > { %2856 = vmatpush1.bf16.msra.mxu0 %v8726_v17  ;;  %3020 = vmatpush1.bf16.msra.mxu1 %v8729_v18  ;;  %v8815_v17 = vld [vmem:[%s12745_s1 + $0x740] ss:$28 sps:$4 sm:$0xff]   ;;  %v8820_v18 = vld [vmem:[%s12745_s1 + $0x774] ss:$28 sps:$4 sm:$0xff]  }
  0x5c   : > { %2857 = vmatprep.subr.bf16.mxu0 %v8734_v19  ;;  %3021 = vmatprep.subr.bf16.mxu1 %v8737_v20  ;;  %v8823_v19 = vld [vmem:[%s12745_s1 + $0x77c] ss:$28 sps:$4 sm:$0xff]   ;;  %v8818_v20 = vld [vmem:[%s12745_s1 + $0x770] ss:$28 sps:$4 sm:$0xff]  }
  0x5f   : > { %2858 = vmatpush1.bf16.msra.mxu0 %v8732_v21  ;;  %3022 = vmatpush1.bf16.msra.mxu1 %v8735_v22  ;;  %v8821_v21 = vld [vmem:[%s12745_s1 + $0x778] ss:$28 sps:$4 sm:$0xff]   ;;  %v8826_v22 = vld [vmem:[%s12745_s1 + $0x7ac] ss:$28 sps:$4 sm:$0xff]  }
  0x60   : > { %2859 = vmatprep.subr.bf16.mxu0 %v8740_v23  ;;  %3023 = vmatprep.subr.bf16.mxu1 %v8743_v24  ;;  %v8829_v23 = vld [vmem:[%s12745_s1 + $0x7b4] ss:$28 sps:$4 sm:$0xff]   ;;  %v8824_v24 = vld [vmem:[%s12745_s1 + $0x7a8] ss:$28 sps:$4 sm:$0xff]  }
  0x63   : > { %2860 = vmatpush1.bf16.msra.mxu0 %v8738_v25  ;;  %3024 = vmatpush1.bf16.msra.mxu1 %v8741_v26  ;;  %v8827_v25 = vld [vmem:[%s12745_s1 + $0x7b0] ss:$28 sps:$4 sm:$0xff]   ;;  %v8832_v26 = vld [vmem:[%s12745_s1 + $0x7e4] ss:$28 sps:$4 sm:$0xff]  }
  0x64   : > { %2861 = vmatprep.subr.bf16.mxu0 %v8746_v27  ;;  %3025 = vmatprep.subr.bf16.mxu1 %v8749_v28  ;;  %v8835_v27 = vld [vmem:[%s12745_s1 + $0x7ec] ss:$28 sps:$4 sm:$0xff]   ;;  %v8830_v28 = vld [vmem:[%s12745_s1 + $0x7e0] ss:$28 sps:$4 sm:$0xff]  }
  0x67   : > { %2862 = vmatpush1.bf16.msra.mxu0 %v8744_v31  ;;  %3026 = vmatpush1.bf16.msra.mxu1 %v8747_v32  ;;  %v8838_v31 = vld [vmem:[%s12745_s1 + $0x81c] ss:$28 sps:$4 sm:$0xff]   ;;  %v8841_v32 = vld [vmem:[%s12745_s1 + $0x824] ss:$28 sps:$4 sm:$0xff]  }
  0x68   : > { %2863 = vmatprep.subr.bf16.mxu0 %v8752_v33  ;;  %3027 = vmatprep.subr.bf16.mxu1 %v8755_v34  ;;  %v8836_v33 = vld [vmem:[%s12745_s1 + $0x818] ss:$28 sps:$4 sm:$0xff]   ;;  %v8839_v34 = vld [vmem:[%s12745_s1 + $0x820] ss:$28 sps:$4 sm:$0xff]  }
  0x6b   : > { %2864 = vmatpush1.bf16.msra.mxu0 %v8750_v35  ;;  %3028 = vmatpush1.bf16.msra.mxu1 %v8753_v36  ;;  %v8844_v35 = vld [vmem:[%s12745_s1 + $0x854] ss:$28 sps:$4 sm:$0xff]   ;;  %v8847_v36 = vld [vmem:[%s12745_s1 + $0x85c] ss:$28 sps:$4 sm:$0xff]  }
  0x6c   : > { %2865 = vmatprep.subr.bf16.mxu0 %v8758_v37  ;;  %3029 = vmatprep.subr.bf16.mxu1 %v8761_v38  ;;  %v8842_v37 = vld [vmem:[%s12745_s1 + $0x850] ss:$28 sps:$4 sm:$0xff]   ;;  %v8845_v38 = vld [vmem:[%s12745_s1 + $0x858] ss:$28 sps:$4 sm:$0xff]  }
  0x6f   : > { %2866 = vmatpush1.bf16.msra.mxu0 %v8756_v39  ;;  %3030 = vmatpush1.bf16.msra.mxu1 %v8759_v40  ;;  %v8850_v39 = vld [vmem:[%s12745_s1 + $0x88c] ss:$28 sps:$4 sm:$0xff]   ;;  %v8853_v40 = vld [vmem:[%s12745_s1 + $0x894] ss:$28 sps:$4 sm:$0xff]  }
  0x70   : > { %2867 = vmatprep.subr.bf16.mxu0 %v8764_v41  ;;  %3031 = vmatprep.subr.bf16.mxu1 %v8767_v42  ;;  %v8848_v41 = vld [vmem:[%s12745_s1 + $0x888] ss:$28 sps:$4 sm:$0xff]   ;;  %v8851_v42 = vld [vmem:[%s12745_s1 + $0x890] ss:$28 sps:$4 sm:$0xff]  }
  0x73   : > { %2868 = vmatpush1.bf16.msra.mxu0 %v8762_v43  ;;  %3032 = vmatpush1.bf16.msra.mxu1 %v8765_v44  ;;  %v8856_v43 = vld [vmem:[%s12745_s1 + $0x8c4] ss:$28 sps:$4 sm:$0xff]   ;;  %v8859_v44 = vld [vmem:[%s12745_s1 + $0x8cc] ss:$28 sps:$4 sm:$0xff]  }
  0x74   : > { %2869 = vmatprep.subr.bf16.mxu0 %v8770_v45  ;;  %3033 = vmatprep.subr.bf16.mxu1 %v8773_v46  ;;  %v8854_v45 = vld [vmem:[%s12745_s1 + $0x8c0] ss:$28 sps:$4 sm:$0xff]   ;;  %v8857_v46 = vld [vmem:[%s12745_s1 + $0x8c8] ss:$28 sps:$4 sm:$0xff]  }
  0x77   : > { %2870 = vmatpush1.bf16.msra.mxu0 %v8768_v47  ;;  %3034 = vmatpush1.bf16.msra.mxu1 %v8771_v49  ;;  %v8862_v47 = vld [vmem:[%s12745_s1 + $0x8fc] ss:$28 sps:$4 sm:$0xff]   ;;  %v8865_v49 = vld [vmem:[%s12745_s1 + $0x904] ss:$28 sps:$4 sm:$0xff]  }
  0x78   : > { %2871 = vmatprep.subr.bf16.mxu0 %v8776_v50  ;;  %3035 = vmatprep.subr.bf16.mxu1 %v8779_v51  ;;  %v8860_v50 = vld [vmem:[%s12745_s1 + $0x8f8] ss:$28 sps:$4 sm:$0xff]   ;;  %v8863_v51 = vld [vmem:[%s12745_s1 + $0x900] ss:$28 sps:$4 sm:$0xff]  }
  0x7b   : > { %2872 = vmatpush1.bf16.msra.mxu0 %v8774_v52  ;;  %3036 = vmatpush1.bf16.msra.mxu1 %v8777_v53  ;;  %v8868_v52 = vld [vmem:[%s12745_s1 + $0x934] ss:$28 sps:$4 sm:$0xff]   ;;  %v8871_v53 = vld [vmem:[%s12745_s1 + $0x93c] ss:$28 sps:$4 sm:$0xff]  }
  0x7c   : > { %2873 = vmatprep.subr.bf16.mxu0 %v8782_v54  ;;  %3037 = vmatprep.subr.bf16.mxu1 %v8785_v55  ;;  %v8866_v54 = vld [vmem:[%s12745_s1 + $0x930] ss:$28 sps:$4 sm:$0xff]   ;;  %v8869_v55 = vld [vmem:[%s12745_s1 + $0x938] ss:$28 sps:$4 sm:$0xff]  }
  0x7f   : > { %2874 = vmatpush1.bf16.msra.mxu0 %v8780_v56  ;;  %3038 = vmatpush1.bf16.msra.mxu1 %v8783_v57  ;;  %v8874_v56 = vld [vmem:[%s12745_s1 + $0x96c] ss:$28 sps:$4 sm:$0xff]   ;;  %v8877_v57 = vld [vmem:[%s12745_s1 + $0x974] ss:$28 sps:$4 sm:$0xff]  }
  0x80   : > { %2875 = vmatprep.subr.bf16.mxu0 %v8788_v58  ;;  %3039 = vmatprep.subr.bf16.mxu1 %v8791_v59  ;;  %v8872_v58 = vld [vmem:[%s12745_s1 + $0x968] ss:$28 sps:$4 sm:$0xff]   ;;  %v8875_v59 = vld [vmem:[%s12745_s1 + $0x970] ss:$28 sps:$4 sm:$0xff]  }
  0x83   : > { %2876 = vmatpush1.bf16.msra.mxu0 %v8786_v60  ;;  %3040 = vmatpush1.bf16.msra.mxu1 %v8789_v61  ;;  %v8880_v60 = vld [vmem:[%s12745_s1 + $0x9a4] ss:$28 sps:$4 sm:$0xff]   ;;  %v8883_v61 = vld [vmem:[%s12745_s1 + $0x9ac] ss:$28 sps:$4 sm:$0xff]  }
  0x84   : > { %2877 = vmatprep.subr.bf16.mxu0 %v8794_v62  ;;  %3041 = vmatprep.subr.bf16.mxu1 %v8797_v63  ;;  %v8878_v62 = vld [vmem:[%s12745_s1 + $0x9a0] ss:$28 sps:$4 sm:$0xff]   ;;  %v8881_v63 = vld [vmem:[%s12745_s1 + $0x9a8] ss:$28 sps:$4 sm:$0xff]  }
  0x87   : > { %2878 = vmatpush1.bf16.msra.mxu0 %v8792_v0  ;;  %3042 = vmatpush1.bf16.msra.mxu1 %v8795_v1  ;;  %v8886_v0 = vld [vmem:[%s12745_s1 + $0x9dc] ss:$28 sps:$4 sm:$0xff]   ;;  %v8889_v1 = vld [vmem:[%s12745_s1 + $0x9e4] ss:$28 sps:$4 sm:$0xff]  }
  0x88   : > { %2879 = vmatprep.subr.bf16.mxu0 %v8800_v2  ;;  %3043 = vmatprep.subr.bf16.mxu1 %v8803_v3  ;;  %v8884_v2 = vld [vmem:[%s12745_s1 + $0x9d8] ss:$28 sps:$4 sm:$0xff]   ;;  %v8887_v3 = vld [vmem:[%s12745_s1 + $0x9e0] ss:$28 sps:$4 sm:$0xff]  }
  0x8b   : > { %2880 = vmatpush1.bf16.msra.mxu0 %v8798_v4  ;;  %3044 = vmatpush1.bf16.msra.mxu1 %v8801_v6  ;;  %v8892_v4 = vld [vmem:[%s12745_s1 + $0xa14] ss:$28 sps:$4 sm:$0xff]   ;;  %v8895_v6 = vld [vmem:[%s12745_s1 + $0xa1c] ss:$28 sps:$4 sm:$0xff]  }
  0x8c   : > { %2890 = vmatprep.subr.bf16.mxu0 %v8807_v7  ;;  %3054 = vmatprep.subr.bf16.mxu1 %v8810_v8  ;;  %v8890_v7 = vld [vmem:[%s12745_s1 + $0xa10] ss:$28 sps:$4 sm:$0xff]   ;;  %v8893_v8 = vld [vmem:[%s12745_s1 + $0xa18] ss:$28 sps:$4 sm:$0xff]  }
  0x8e   : > { %2882 = vmatmul.mubr.bf16.vlgmr.msra.gmra.mrb[0].mxu0 %v10375_v10  ;;  %3046 = vmatmul.mubr.bf16.vlgmr.msra.gmra.mrb[0].mxu1 %v10375_v10 }
  0x8f   : > { %2891 = vmatpush1.bf16.msra.mxu0 %v8805_v9  ;;  %3055 = vmatpush1.bf16.msra.mxu1 %v8808_v11  ;;  %v8898_v9 = vld [vmem:[%s12745_s1 + $0xa4c] ss:$28 sps:$4 sm:$0xff]   ;;  %v8901_v11 = vld [vmem:[%s12745_s1 + $0xa54] ss:$28 sps:$4 sm:$0xff]  }
  0x90   : > { %2892 = vmatprep.subr.bf16.mxu0 %v8814_v12  ;;  %3056 = vmatprep.subr.bf16.mxu1 %v8817_v14  ;;  %v8896_v12 = vld [vmem:[%s12745_s1 + $0xa48] ss:$28 sps:$4 sm:$0xff]   ;;  %v8899_v14 = vld [vmem:[%s12745_s1 + $0xa50] ss:$28 sps:$4 sm:$0xff]  }
  0x91   : > { %2922 = vmatprep.mubr.bf16.mxu0 %v10391_v15  ;;  %3086 = vmatprep.mubr.bf16.mxu1 %v10391_v15 }
  0x93   : > { %2893 = vmatpush1.bf16.msra.mxu0 %v8812_v16  ;;  %3057 = vmatpush1.bf16.msra.mxu1 %v8815_v17  ;;  %v8905_v16 = vld [vmem:[%s12745_s1 + $0xa84] ss:$28 sps:$4 sm:$0xff]   ;;  %v8908_v17 = vld [vmem:[%s12745_s1 + $0xa8c] ss:$28 sps:$4 sm:$0xff]  }
  0x94   : > { %2894 = vmatprep.subr.bf16.mxu0 %v8820_v18  ;;  %3058 = vmatprep.subr.bf16.mxu1 %v8823_v19  ;;  %v8903_v18 = vld [vmem:[%s12745_s1 + $0xa80] ss:$28 sps:$4 sm:$0xff]   ;;  %v10582_v19 = vcombine.low %v10384_v13, %v10384_v13  ;;  %v8910_v13 = vld [vmem:[%s12745_s1 + $0xab8] ss:$28 sps:$4 sm:$0xff]  }
  0x97   : > { %2895 = vmatpush1.bf16.msra.mxu0 %v8818_v20  ;;  %3059 = vmatpush1.bf16.msra.mxu1 %v8821_v21  ;;  %v8906_v20 = vld [vmem:[%s12745_s1 + $0xa88] ss:$28 sps:$4 sm:$0xff]   ;;  %v8912_v21 = vld [vmem:[%s12745_s1 + $0xabc] ss:$28 sps:$4 sm:$0xff]  }
  0x98   : > { %2896 = vmatprep.subr.bf16.mxu0 %v8826_v22  ;;  %3060 = vmatprep.subr.bf16.mxu1 %v8829_v23  ;;  %v8915_v22 = vld [vmem:[%s12745_s1 + $0xac4] ss:$28 sps:$4 sm:$0xff]  }
  0x99   : > { %v8913_v23 = vld [vmem:[%s12745_s1 + $0xac0] ss:$28 sps:$4 sm:$0xff]  }
  0x9b   : > { %2897 = vmatpush1.bf16.msra.mxu0 %v8824_v24  ;;  %3061 = vmatpush1.bf16.msra.mxu1 %v8827_v25  ;;  %v8918_v24 = vld [vmem:[%s12745_s1 + $0xaf4] ss:$28 sps:$4 sm:$0xff]   ;;  %v8921_v25 = vld [vmem:[%s12745_s1 + $0xafc] ss:$28 sps:$4 sm:$0xff]  }
  0x9c   : > { %2898 = vmatprep.subr.bf16.mxu0 %v8832_v26  ;;  %3062 = vmatprep.subr.bf16.mxu1 %v8835_v27  ;;  %v8916_v26 = vld [vmem:[%s12745_s1 + $0xaf0] ss:$28 sps:$4 sm:$0xff]   ;;  %v9863_v27 = vmov 0  }
  0x9f   : > { %2899 = vmatpush1.bf16.msra.mxu0 %v8830_v28  ;;  %3063 = vmatpush1.bf16.msra.mxu1 %v8833_v29  ;;  %v8919_v28 = vld [vmem:[%s12745_s1 + $0xaf8] ss:$28 sps:$4 sm:$0xff]   ;;  %v8924_v29 = vld [vmem:[%s12745_s1 + $0xb2c] ss:$28 sps:$4 sm:$0xff]  }
  0xa0   : > { %2900 = vmatprep.subr.bf16.mxu0 %v8838_v31  ;;  %3064 = vmatprep.subr.bf16.mxu1 %v8841_v32  ;;  %v8927_v31 = vld [vmem:[%s12745_s1 + $0xb34] ss:$28 sps:$4 sm:$0xff]   ;;  %v8922_v32 = vld [vmem:[%s12745_s1 + $0xb28] ss:$28 sps:$4 sm:$0xff]  }
  0xa3   : > { %2901 = vmatpush1.bf16.msra.mxu0 %v8836_v33  ;;  %3065 = vmatpush1.bf16.msra.mxu1 %v8839_v34  ;;  %v8925_v33 = vld [vmem:[%s12745_s1 + $0xb30] ss:$28 sps:$4 sm:$0xff]   ;;  %v8930_v34 = vld [vmem:[%s12745_s1 + $0xb64] ss:$28 sps:$4 sm:$0xff]  }
  0xa4   : > { %2902 = vmatprep.subr.bf16.mxu0 %v8844_v35  ;;  %3066 = vmatprep.subr.bf16.mxu1 %v8847_v36  ;;  %v8933_v35 = vld [vmem:[%s12745_s1 + $0xb6c] ss:$28 sps:$4 sm:$0xff]   ;;  %v8928_v36 = vld [vmem:[%s12745_s1 + $0xb60] ss:$28 sps:$4 sm:$0xff]  }
  0xa7   : > { %2903 = vmatpush1.bf16.msra.mxu0 %v8842_v37  ;;  %3067 = vmatpush1.bf16.msra.mxu1 %v8845_v38  ;;  %v8931_v37 = vld [vmem:[%s12745_s1 + $0xb68] ss:$28 sps:$4 sm:$0xff]   ;;  %v8936_v38 = vld [vmem:[%s12745_s1 + $0xb9c] ss:$28 sps:$4 sm:$0xff]  }
  0xa8   : > { %2904 = vmatprep.subr.bf16.mxu0 %v8850_v39  ;;  %3068 = vmatprep.subr.bf16.mxu1 %v8853_v40  ;;  %v8939_v39 = vld [vmem:[%s12745_s1 + $0xba4] ss:$28 sps:$4 sm:$0xff]   ;;  %v8934_v40 = vld [vmem:[%s12745_s1 + $0xb98] ss:$28 sps:$4 sm:$0xff]  }
  0xab   : > { %2905 = vmatpush1.bf16.msra.mxu0 %v8848_v41  ;;  %3069 = vmatpush1.bf16.msra.mxu1 %v8851_v42  ;;  %v8937_v41 = vld [vmem:[%s12745_s1 + $0xba0] ss:$28 sps:$4 sm:$0xff]   ;;  %v8942_v42 = vld [vmem:[%s12745_s1 + $0xbd4] ss:$28 sps:$4 sm:$0xff]  }
  0xac   : > { %2906 = vmatprep.subr.bf16.mxu0 %v8856_v43  ;;  %3070 = vmatprep.subr.bf16.mxu1 %v8859_v44  ;;  %v8945_v43 = vld [vmem:[%s12745_s1 + $0xbdc] ss:$28 sps:$4 sm:$0xff]   ;;  %v8940_v44 = vld [vmem:[%s12745_s1 + $0xbd0] ss:$28 sps:$4 sm:$0xff]  }
  0xaf   : > { %2907 = vmatpush1.bf16.msra.mxu0 %v8854_v45  ;;  %3071 = vmatpush1.bf16.msra.mxu1 %v8857_v46  ;;  %v8943_v45 = vld [vmem:[%s12745_s1 + $0xbd8] ss:$28 sps:$4 sm:$0xff]   ;;  %v8948_v46 = vld [vmem:[%s12745_s1 + $0xc0c] ss:$28 sps:$4 sm:$0xff]  }
  0xb0   : > { %2908 = vmatprep.subr.bf16.mxu0 %v8862_v47  ;;  %3072 = vmatprep.subr.bf16.mxu1 %v8865_v49  ;;  %v8951_v47 = vld [vmem:[%s12745_s1 + $0xc14] ss:$28 sps:$4 sm:$0xff]   ;;  %v8946_v49 = vld [vmem:[%s12745_s1 + $0xc08] ss:$28 sps:$4 sm:$0xff]  }
  0xb3   : > { %2909 = vmatpush1.bf16.msra.mxu0 %v8860_v50  ;;  %3073 = vmatpush1.bf16.msra.mxu1 %v8863_v51  ;;  %v8949_v50 = vld [vmem:[%s12745_s1 + $0xc10] ss:$28 sps:$4 sm:$0xff]  }
  0xb4   : > { %2910 = vmatprep.subr.bf16.mxu0 %v8868_v52  ;;  %3074 = vmatprep.subr.bf16.mxu1 %v8871_v53  ;;  %v8955_v51 = vld [vmem:[%s12745_s1 + $0x14] ss:$28 sps:$4 sm:$0xff]   ;;  %v8952_v53 = vld [vmem:[%s10092_s21 + $0x18] ss:$0 sps:$4 sm:$0xff]  }
  0xb5   : > { %v8974_v52 = vld [vmem:[%s12745_s1 + $0x1d8] ss:$28 sps:$4 sm:$0xff]  }
  0xb7   : > { %2911 = vmatpush1.bf16.msra.mxu0 %v8866_v54  ;;  %3075 = vmatpush1.bf16.msra.mxu1 %v8869_v55  ;;  %v8953_v54 = vld [vmem:[%s12745_s1 + $0x10] ss:$28 sps:$4 sm:$0xff]   ;;  %v8978_v55 = vld [vmem:[%s12745_s1 + $0x18] ss:$28 sps:$4 sm:$0xff]  }
  0xb8   : > { %2912 = vmatprep.subr.bf16.mxu0 %v8874_v56  ;;  %3076 = vmatprep.subr.bf16.mxu1 %v8877_v57  ;;  %v8958_v56 = vld [vmem:[%s12745_s1 + $0x4c] ss:$28 sps:$4 sm:$0xff]  }
  0xb9   : > { %v8979_v57 = vld [vmem:[%s12745_s1 + $0x210] ss:$28 sps:$4 sm:$0xff]  }
  0xbb   : > { %2913 = vmatpush1.bf16.msra.mxu0 %v8872_v58  ;;  %3077 = vmatpush1.bf16.msra.mxu1 %v8875_v59  ;;  %v8956_v58 = vld [vmem:[%s12745_s1 + $0x48] ss:$28 sps:$4 sm:$0xff]  }
  0xbc   : > { %2914 = vmatprep.subr.bf16.mxu0 %v8880_v60  ;;  %3078 = vmatprep.subr.bf16.mxu1 %v8883_v61  ;;  %v8961_v59 = vld [vmem:[%s12745_s1 + $0x84] ss:$28 sps:$4 sm:$0xff]   ;;  %v8983_v60 = vld [vmem:[%s12745_s1 + $0x50] ss:$28 sps:$4 sm:$0xff]  }
  0xbd   : > { %v8984_v61 = vld [vmem:[%s12745_s1 + $0x248] ss:$28 sps:$4 sm:$0xff]  }
  0xbf   : > { %2915 = vmatpush1.bf16.msra.mxu0 %v8878_v62  ;;  %3079 = vmatpush1.bf16.msra.mxu1 %v8881_v63  ;;  %v8959_v62 = vld [vmem:[%s12745_s1 + $0x80] ss:$28 sps:$4 sm:$0xff]  }
  0xc0   : > { %2916 = vmatprep.subr.bf16.mxu0 %v8886_v0  ;;  %3080 = vmatprep.subr.bf16.mxu1 %v8889_v1  ;;  %v8964_v63 = vld [vmem:[%s12745_s1 + $0xbc] ss:$28 sps:$4 sm:$0xff]   ;;  %v8988_v0 = vld [vmem:[%s12745_s1 + $0x88] ss:$28 sps:$4 sm:$0xff]  }
  0xc1   : > { %v8962_v1 = vld [vmem:[%s12745_s1 + $0xb8] ss:$28 sps:$4 sm:$0xff]  }
  0xc3   : > { %2917 = vmatpush1.bf16.msra.mxu0 %v8884_v2  ;;  %3081 = vmatpush1.bf16.msra.mxu1 %v8887_v3  ;;  %v8967_v2 = vld [vmem:[%s12745_s1 + $0xf4] ss:$28 sps:$4 sm:$0xff]   ;;  %v8993_v3 = vld [vmem:[%s12745_s1 + $0xc0] ss:$28 sps:$4 sm:$0xff]  }
  0xc4   : > { %2918 = vmatprep.subr.bf16.mxu0 %v8892_v4  ;;  %3082 = vmatprep.subr.bf16.mxu1 %v8895_v6  ;;  %v8994_v4 = vld [vmem:[%s12745_s1 + $0x2b8] ss:$28 sps:$4 sm:$0xff]   ;;  %v8965_v6 = vld [vmem:[%s12745_s1 + $0xf0] ss:$28 sps:$4 sm:$0xff]  }
  0xc7   : > { %2919 = vmatpush1.bf16.msra.mxu0 %v8890_v7  ;;  %3083 = vmatpush1.bf16.msra.mxu1 %v8893_v8  ;;  %v8998_v7 = vld [vmem:[%s12745_s1 + $0xf8] ss:$28 sps:$4 sm:$0xff]   ;;  %v8970_v8 = vld [vmem:[%s12745_s1 + $0x12c] ss:$28 sps:$4 sm:$0xff]  }
  0xc8   : > { %2920 = vmatprep.subr.bf16.mxu0 %v8898_v9  ;;  %3084 = vmatprep.subr.bf16.mxu1 %v8901_v11  ;;  %v8999_v9 = vld [vmem:[%s12745_s1 + $0x2f0] ss:$28 sps:$4 sm:$0xff]   ;;  %v8968_v11 = vld [vmem:[%s12745_s1 + $0x128] ss:$28 sps:$4 sm:$0xff]  }
  0xcb   : > { %2921 = vmatpush1.bf16.msra.mxu0 %v8896_v12  ;;  %3085 = vmatpush1.bf16.msra.mxu1 %v8899_v14  ;;  %v8973_v12 = vld [vmem:[%s12745_s1 + $0x164] ss:$28 sps:$4 sm:$0xff]   ;;  %v9003_v14 = vld [vmem:[%s12745_s1 + $0x130] ss:$28 sps:$4 sm:$0xff]  }
  0xcc   : > { %2931 = vmatprep.subr.bf16.mxu0 %v8905_v16  ;;  %3095 = vmatprep.subr.bf16.mxu1 %v8908_v17  ;;  %v9004_v16 = vld [vmem:[%s12745_s1 + $0x328] ss:$28 sps:$4 sm:$0xff]   ;;  %v8971_v17 = vld [vmem:[%s12745_s1 + $0x160] ss:$28 sps:$4 sm:$0xff]  }
  0xce   : > { %2923 = vmatmul.mubr.bf16.vlgmr.msra.gmra.mrb[0].mxu0 %v10582_v19  ;;  %3087 = vmatmul.mubr.bf16.vlgmr.msra.gmra.mrb[0].mxu1 %v10582_v19 }
  0xcf   : > { %2932 = vmatpush1.bf16.msra.mxu0 %v8903_v18  ;;  %3096 = vmatpush1.bf16.msra.mxu1 %v8906_v20  ;;  %v8977_v18 = vld [vmem:[%s12745_s1 + $0x19c] ss:$28 sps:$4 sm:$0xff]   ;;  %v9008_v20 = vld [vmem:[%s12745_s1 + $0x168] ss:$28 sps:$4 sm:$0xff]  }
  0xd0   : > { %2933 = vmatprep.subr.bf16.mxu0 %v8912_v21  ;;  %3097 = vmatprep.subr.bf16.mxu1 %v8915_v22  ;;  %v9009_v21 = vld [vmem:[%s12745_s1 + $0x360] ss:$28 sps:$4 sm:$0xff]   ;;  %v8975_v22 = vld [vmem:[%s12745_s1 + $0x198] ss:$28 sps:$4 sm:$0xff]  }
  0xd1   : > { %2963 = vmatprep.mubr.bf16.mxu0 %v9863_v27  ;;  %3127 = vmatprep.mubr.bf16.mxu1 %v9863_v27 }
  0xd3   : > { %2934 = vmatpush1.bf16.msra.mxu0 %v8910_v13  ;;  %3098 = vmatpush1.bf16.msra.mxu1 %v8913_v23  ;;  %v8982_v13 = vld [vmem:[%s12745_s1 + $0x1d4] ss:$28 sps:$4 sm:$0xff]   ;;  %v9013_v23 = vld [vmem:[%s12745_s1 + $0x1a0] ss:$28 sps:$4 sm:$0xff]  }
  0xd4   : > { %2935 = vmatprep.subr.bf16.mxu0 %v8918_v24  ;;  %3099 = vmatprep.subr.bf16.mxu1 %v8921_v25  ;;  %v9014_v24 = vld [vmem:[%s12745_s1 + $0x558] ss:$28 sps:$4 sm:$0xff]   ;;  %v8980_v25 = vld [vmem:[%s12745_s1 + $0x1d0] ss:$28 sps:$4 sm:$0xff]  }
  0xd7   : > { %2936 = vmatpush1.bf16.msra.mxu0 %v8916_v26  ;;  %3100 = vmatpush1.bf16.msra.mxu1 %v8919_v28  ;;  %v9018_v26 = vld [vmem:[%s12745_s1 + $0x398] ss:$28 sps:$4 sm:$0xff]   ;;  %v8987_v28 = vld [vmem:[%s12745_s1 + $0x20c] ss:$28 sps:$4 sm:$0xff]  }
  0xd8   : > { %2937 = vmatprep.subr.bf16.mxu0 %v8924_v29  ;;  %3101 = vmatprep.subr.bf16.mxu1 %v8927_v31  ;;  %v9019_v29 = vld [vmem:[%s12745_s1 + $0x590] ss:$28 sps:$4 sm:$0xff]   ;;  %v8985_v31 = vld [vmem:[%s12745_s1 + $0x208] ss:$28 sps:$4 sm:$0xff]  }
  0xdb   : > { %2938 = vmatpush1.bf16.msra.mxu0 %v8922_v32  ;;  %3102 = vmatpush1.bf16.msra.mxu1 %v8925_v33  ;;  %v9023_v32 = vld [vmem:[%s12745_s1 + $0x3d0] ss:$28 sps:$4 sm:$0xff]   ;;  %v8992_v33 = vld [vmem:[%s12745_s1 + $0x244] ss:$28 sps:$4 sm:$0xff]  }
  0xdc   : > { %2939 = vmatprep.subr.bf16.mxu0 %v8930_v34  ;;  %3103 = vmatprep.subr.bf16.mxu1 %v8933_v35  ;;  %v9024_v34 = vld [vmem:[%s12745_s1 + $0x5c8] ss:$28 sps:$4 sm:$0xff]   ;;  %v8990_v35 = vld [vmem:[%s12745_s1 + $0x240] ss:$28 sps:$4 sm:$0xff]  }
  0xdf   : > { %2940 = vmatpush1.bf16.msra.mxu0 %v8928_v36  ;;  %3104 = vmatpush1.bf16.msra.mxu1 %v8931_v37  ;;  %v9028_v36 = vld [vmem:[%s12745_s1 + $0x408] ss:$28 sps:$4 sm:$0xff]   ;;  %v8997_v37 = vld [vmem:[%s12745_s1 + $0x27c] ss:$28 sps:$4 sm:$0xff]  }
  0xe0   : > { %2941 = vmatprep.subr.bf16.mxu0 %v8936_v38  ;;  %3105 = vmatprep.subr.bf16.mxu1 %v8939_v39  ;;  %v9029_v38 = vld [vmem:[%s12745_s1 + $0x600] ss:$28 sps:$4 sm:$0xff]   ;;  %v8995_v39 = vld [vmem:[%s12745_s1 + $0x278] ss:$28 sps:$4 sm:$0xff]  }
  0xe3   : > { %2942 = vmatpush1.bf16.msra.mxu0 %v8934_v40  ;;  %3106 = vmatpush1.bf16.msra.mxu1 %v8937_v41  ;;  %v9033_v40 = vld [vmem:[%s12745_s1 + $0x440] ss:$28 sps:$4 sm:$0xff]   ;;  %v9002_v41 = vld [vmem:[%s12745_s1 + $0x2b4] ss:$28 sps:$4 sm:$0xff]  }
  0xe4   : > { %2943 = vmatprep.subr.bf16.mxu0 %v8942_v42  ;;  %3107 = vmatprep.subr.bf16.mxu1 %v8945_v43  ;;  %v9034_v42 = vld [vmem:[%s12745_s1 + $0x638] ss:$28 sps:$4 sm:$0xff]   ;;  %v9000_v43 = vld [vmem:[%s12745_s1 + $0x2b0] ss:$28 sps:$4 sm:$0xff]  }
  0xe7   : > { %2944 = vmatpush1.bf16.msra.mxu0 %v8940_v44  ;;  %3108 = vmatpush1.bf16.msra.mxu1 %v8943_v45  ;;  %v9038_v44 = vld [vmem:[%s12745_s1 + $0x478] ss:$28 sps:$4 sm:$0xff]   ;;  %v9007_v45 = vld [vmem:[%s12745_s1 + $0x2ec] ss:$28 sps:$4 sm:$0xff]  }
  0xe8   : > { %2945 = vmatprep.subr.bf16.mxu0 %v8948_v46  ;;  %3109 = vmatprep.subr.bf16.mxu1 %v8951_v47  ;;  %v9039_v46 = vld [vmem:[%s12745_s1 + $0x670] ss:$28 sps:$4 sm:$0xff]   ;;  %v9005_v47 = vld [vmem:[%s12745_s1 + $0x2e8] ss:$28 sps:$4 sm:$0xff]  }
  0xeb   : > { %2946 = vmatpush1.bf16.msra.mxu0 %v8946_v49  ;;  %3110 = vmatpush1.bf16.msra.mxu1 %v8949_v50  ;;  %v9043_v49 = vld [vmem:[%s12745_s1 + $0x4b0] ss:$28 sps:$4 sm:$0xff]   ;;  %v9012_v50 = vld [vmem:[%s12745_s1 + $0x324] ss:$28 sps:$4 sm:$0xff]  }
  0xec   : > { %3136 = vmatprep.subr.bf16.mxu0 %v8955_v51  ;;  %8198 = vmatprep.subr.bf16.mxu1 %v8974_v52  ;;  %v9044_v51 = vld [vmem:[%s12745_s1 + $0x6a8] ss:$28 sps:$4 sm:$0xff]   ;;  %v9010_v52 = vld [vmem:[%s12745_s1 + $0x320] ss:$28 sps:$4 sm:$0xff]  }
  0xee   : > { %2964 = vmatmul.mubr.bf16.vlgmr.msra.gmra.mrb[0].mxu0 %v8952_v53  ;;  %3128 = vmatmul.mubr.bf16.vlgmr.msra.gmra.mrb[0].mxu1 %v8952_v53  ;;  %v9017_v53 = vld [vmem:[%s12745_s1 + $0x35c] ss:$28 sps:$4 sm:$0xff]  }
  0xef   : > { %3137 = vmatpush1.bf16.msra.mxu0 %v8953_v54  ;;  %8199 = vmatpush3.bf16.msra.mxu1 %v8978_v55  ;;  %v9048_v54 = vld [vmem:[%s12745_s1 + $0x4e8] ss:$28 sps:$4 sm:$0xff]   ;;  %v9049_v55 = vld [vmem:[%s12745_s1 + $0x6e0] ss:$28 sps:$4 sm:$0xff]  }
  0xf0   : > { %3138 = vmatprep.subr.bf16.mxu0 %v8958_v56  ;;  %8200 = vmatprep.subr.bf16.mxu1 %v8979_v57  ;;  %v9015_v56 = vld [vmem:[%s12745_s1 + $0x358] ss:$28 sps:$4 sm:$0xff]  }
  0xf1   : > { %3332 = vmatprep.mubr.bf16.mxu1 %v10104_v48  ;;  %3168 = vmatprep.mubr.bf16.mxu0 %v10104_v48  ;;  %v8989_v48 = vld [vmem:[%s12745_s1 + $0x280] ss:$28 sps:$4 sm:$0xff]   ;;  %v9022_v57 = vld [vmem:[%s12745_s1 + $0x394] ss:$28 sps:$4 sm:$0xff]  }
  0xf3   : > { %3139 = vmatpush1.bf16.msra.mxu0 %v8956_v58  ;;  %8201 = vmatpush3.bf16.msra.mxu1 %v8983_v60  ;;  %v9053_v58 = vld [vmem:[%s12745_s1 + $0x520] ss:$28 sps:$4 sm:$0xff]   ;;  %v9020_v60 = vld [vmem:[%s12745_s1 + $0x390] ss:$28 sps:$4 sm:$0xff]  }
  0xf4   : > { %3140 = vmatprep.subr.bf16.mxu0 %v8961_v59  ;;  %8202 = vmatprep.subr.bf16.mxu1 %v8984_v61  ;;  %v9054_v59 = vld [vmem:[%s12745_s1 + $0x8d8] ss:$28 sps:$4 sm:$0xff]   ;;  %v9027_v61 = vld [vmem:[%s12745_s1 + $0x3cc] ss:$28 sps:$4 sm:$0xff]  }
  0xf7   : > { %3141 = vmatpush1.bf16.msra.mxu0 %v8959_v62  ;;  %8203 = vmatpush3.bf16.msra.mxu1 %v8988_v0  ;;  %v9058_v62 = vld [vmem:[%s12745_s1 + $0x718] ss:$28 sps:$4 sm:$0xff]   ;;  %v9025_v0 = vld [vmem:[%s12745_s1 + $0x3c8] ss:$28 sps:$4 sm:$0xff]  }
  0xf8   : > { %3142 = vmatprep.subr.bf16.mxu0 %v8964_v63  ;;  %8204 = vmatprep.subr.bf16.mxu1 %v8989_v48  ;;  %v9059_v63 = vld [vmem:[%s12745_s1 + $0x910] ss:$28 sps:$4 sm:$0xff]   ;;  %v9032_v48 = vld [vmem:[%s12745_s1 + $0x404] ss:$28 sps:$4 sm:$0xff]  }
  0xfb   : > { %3143 = vmatpush1.bf16.msra.mxu0 %v8962_v1  ;;  %8205 = vmatpush3.bf16.msra.mxu1 %v8993_v3  ;;  %v9063_v1 = vld [vmem:[%s12745_s1 + $0x750] ss:$28 sps:$4 sm:$0xff]   ;;  %v9037_v3 = vld [vmem:[%s12745_s1 + $0x43c] ss:$28 sps:$4 sm:$0xff]  }
  0xfc   : > { %3144 = vmatprep.subr.bf16.mxu0 %v8967_v2  ;;  %8206 = vmatprep.subr.bf16.mxu1 %v8994_v4  ;;  %v9030_v2 = vld [vmem:[%s12745_s1 + $0x400] ss:$28 sps:$4 sm:$0xff]   ;;  %v9068_v4 = vld [vmem:[%s12745_s1 + $0x788] ss:$28 sps:$4 sm:$0xff]  }
  0xff   : > { %3145 = vmatpush1.bf16.msra.mxu0 %v8965_v6  ;;  %8207 = vmatpush3.bf16.msra.mxu1 %v8998_v7  ;;  %v9035_v6 = vld [vmem:[%s12745_s1 + $0x438] ss:$28 sps:$4 sm:$0xff]  }
 0x100   : > { %3146 = vmatprep.subr.bf16.mxu0 %v8970_v8  ;;  %8208 = vmatprep.subr.bf16.mxu1 %v8999_v9  ;;  %v9042_v7 = vld [vmem:[%s12745_s1 + $0x474] ss:$28 sps:$4 sm:$0xff]   ;;  %v9073_v8 = vld [vmem:[%s12745_s1 + $0x7c0] ss:$28 sps:$4 sm:$0xff]  }
 0x101   : > { %v9074_v9 = vld [vmem:[%s12745_s1 + $0x9b8] ss:$28 sps:$4 sm:$0xff]  }
 0x103   : > { %3147 = vmatpush1.bf16.msra.mxu0 %v8968_v11  ;;  %8209 = vmatpush3.bf16.msra.mxu1 %v9003_v14  ;;  %v9040_v11 = vld [vmem:[%s12745_s1 + $0x470] ss:$28 sps:$4 sm:$0xff]   ;;  %v9078_v14 = vld [vmem:[%s12745_s1 + $0x7f8] ss:$28 sps:$4 sm:$0xff]  }
 0x104   : > { %3148 = vmatprep.subr.bf16.mxu0 %v8973_v12  ;;  %8210 = vmatprep.subr.bf16.mxu1 %v9004_v16  ;;  %v9047_v12 = vld [vmem:[%s12745_s1 + $0x4ac] ss:$28 sps:$4 sm:$0xff]  }
 0x105   : > { %v9079_v16 = vld [vmem:[%s12745_s1 + $0x9f0] ss:$28 sps:$4 sm:$0xff]  }
 0x107   : > { %3149 = vmatpush1.bf16.msra.mxu0 %v8971_v17  ;;  %8211 = vmatpush3.bf16.msra.mxu1 %v9008_v20  ;;  %v9045_v17 = vld [vmem:[%s12745_s1 + $0x4a8] ss:$28 sps:$4 sm:$0xff]  }
 0x108   : > { %3150 = vmatprep.subr.bf16.mxu0 %v8977_v18  ;;  %8212 = vmatprep.subr.bf16.mxu1 %v9009_v21  ;;  %v9083_v18 = vld [vmem:[%s12745_s1 + $0x830] ss:$28 sps:$4 sm:$0xff]   ;;  %v9052_v20 = vld [vmem:[%s12745_s1 + $0x4e4] ss:$28 sps:$4 sm:$0xff]  }
 0x109   : > { %v9084_v21 = vld [vmem:[%s12745_s1 + $0xa28] ss:$28 sps:$4 sm:$0xff]  }
 0x10b   : > { %3151 = vmatpush1.bf16.msra.mxu0 %v8975_v22  ;;  %8213 = vmatpush3.bf16.msra.mxu1 %v9013_v23  ;;  %v9050_v22 = vld [vmem:[%s12745_s1 + $0x4e0] ss:$28 sps:$4 sm:$0xff]  }
 0x10c   : > { %3152 = vmatprep.subr.bf16.mxu0 %v8982_v13  ;;  %8220 = vmatprep.subr.bf16.mxu1 %v9014_v24  ;;  %v9088_v13 = vld [vmem:[%s12745_s1 + $0x868] ss:$28 sps:$4 sm:$0xff]   ;;  %v9057_v23 = vld [vmem:[%s12745_s1 + $0x51c] ss:$28 sps:$4 sm:$0xff]  }
 0x10d   : > { %v9089_v24 = vld [vmem:[%s12745_s1 + $0xa60] ss:$28 sps:$4 sm:$0xff]  }
 0x10e   : > { %3333 = vmatmul.mubr.bf16.vlgmr.msra.gmra.mrb[4].mxu1 %v10168_v5 }
 0x10f   : > { %3153 = vmatpush1.bf16.msra.mxu0 %v8980_v25  ;;  %8221 = vmatpush3.bf16.msra.mxu1 %v9018_v26  ;;  %v9055_v25 = vld [vmem:[%s12745_s1 + $0x518] ss:$28 sps:$4 sm:$0xff]   ;;  %v9093_v26 = vld [vmem:[%s12745_s1 + $0x8a0] ss:$28 sps:$4 sm:$0xff]  }
 0x110   : > { %3154 = vmatprep.subr.bf16.mxu0 %v8987_v28  ;;  %8222 = vmatprep.subr.bf16.mxu1 %v9019_v29  ;;  %v9062_v28 = vld [vmem:[%s12745_s1 + $0x554] ss:$28 sps:$4 sm:$0xff]  }
 0x111   : > { %3372 = vmatprep.mubr.bf16.mxu1 %v10246_v30  ;;  %v9060_v29 = vld [vmem:[%s12745_s1 + $0x550] ss:$28 sps:$4 sm:$0xff]  }
 0x113   : > { %3155 = vmatpush1.bf16.msra.mxu0 %v8985_v31  ;;  %8223 = vmatpush3.bf16.msra.mxu1 %v9023_v32  ;;  %v9097_v31 = vld [vmem:[%s12745_s1 + $0xa98] ss:$28 sps:$4 sm:$0xff]   ;;  %v9067_v32 = vld [vmem:[%s12745_s1 + $0x58c] ss:$28 sps:$4 sm:$0xff]  }
 0x114   : > { %3156 = vmatprep.subr.bf16.mxu0 %v8992_v33  ;;  %8224 = vmatprep.subr.bf16.mxu1 %v9024_v34  ;;  %v9864_v33 = vmov 0.0   ;;  %v9065_v34 = vld [vmem:[%s12745_s1 + $0x588] ss:$28 sps:$4 sm:$0xff]  }
 0x117   : > { %3157 = vmatpush1.bf16.msra.mxu0 %v8990_v35  ;;  %8225 = vmatpush3.bf16.msra.mxu1 %v9028_v36  ;;  %v9101_v35 = vld [vmem:[%s12745_s1 + $0xad0] ss:$28 sps:$4 sm:$0xff]   ;;  %v9072_v36 = vld [vmem:[%s12745_s1 + $0x5c4] ss:$28 sps:$4 sm:$0xff]  }
 0x118   : > { %3158 = vmatprep.subr.bf16.mxu0 %v8997_v37  ;;  %8226 = vmatprep.subr.bf16.mxu1 %v9029_v38  ;;  %v9070_v37 = vld [vmem:[%s12745_s1 + $0x5c0] ss:$28 sps:$4 sm:$0xff]  }
 0x119   : > { %v9077_v38 = vld [vmem:[%s12745_s1 + $0x5fc] ss:$28 sps:$4 sm:$0xff]  }
 0x11b   : > { %3159 = vmatpush1.bf16.msra.mxu0 %v8995_v39  ;;  %8227 = vmatpush3.bf16.msra.mxu1 %v9033_v40  ;;  %v9105_v39 = vld [vmem:[%s12745_s1 + $0xb08] ss:$28 sps:$4 sm:$0xff]   ;;  %v9075_v40 = vld [vmem:[%s12745_s1 + $0x5f8] ss:$28 sps:$4 sm:$0xff]  }
 0x11c   : > { %3160 = vmatprep.subr.bf16.mxu0 %v9002_v41  ;;  %8228 = vmatprep.subr.bf16.mxu1 %v9034_v42  ;;  %v9082_v41 = vld [vmem:[%s12745_s1 + $0x634] ss:$28 sps:$4 sm:$0xff]   ;;  %v9109_v42 = vld [vmem:[%s12745_s1 + $0xb40] ss:$28 sps:$4 sm:$0xff]  }
 0x11f   : > { %3161 = vmatpush1.bf16.msra.mxu0 %v9000_v43  ;;  %8229 = vmatpush3.bf16.msra.mxu1 %v9038_v44  ;;  %v9080_v43 = vld [vmem:[%s12745_s1 + $0x630] ss:$28 sps:$4 sm:$0xff]  }
 0x120   : > { %3162 = vmatprep.subr.bf16.mxu0 %v9007_v45  ;;  %8230 = vmatprep.subr.bf16.mxu1 %v9039_v46  ;;  %v9087_v44 = vld [vmem:[%s12745_s1 + $0x66c] ss:$28 sps:$4 sm:$0xff]   ;;  %v9113_v45 = vld [vmem:[%s12745_s1 + $0xb78] ss:$28 sps:$4 sm:$0xff]  }
 0x121   : > { %v9085_v46 = vld [vmem:[%s12745_s1 + $0x668] ss:$28 sps:$4 sm:$0xff]  }
 0x123   : > { %3163 = vmatpush1.bf16.msra.mxu0 %v9005_v47  ;;  %8231 = vmatpush3.bf16.msra.mxu1 %v9043_v49  ;;  %v9092_v47 = vld [vmem:[%s12745_s1 + $0x6a4] ss:$28 sps:$4 sm:$0xff]   ;;  %v9117_v49 = vld [vmem:[%s12745_s1 + $0xbb0] ss:$28 sps:$4 sm:$0xff]  }
 0x124   : > { %3164 = vmatprep.subr.bf16.mxu0 %v9012_v50  ;;  %8232 = vmatprep.subr.bf16.mxu1 %v9044_v51  ;;  %v9090_v50 = vld [vmem:[%s12745_s1 + $0x6a0] ss:$28 sps:$4 sm:$0xff]  }
 0x125   : > { %v9096_v51 = vld [vmem:[%s12745_s1 + $0x6dc] ss:$28 sps:$4 sm:$0xff]  }
 0x127   : > { %3165 = vmatpush1.bf16.msra.mxu0 %v9010_v52  ;;  %8233 = vmatpush3.bf16.msra.mxu1 %v9048_v54  ;;  %v9121_v52 = vld [vmem:[%s12745_s1 + $0xbe8] ss:$28 sps:$4 sm:$0xff]   ;;  %v9100_v54 = vld [vmem:[%s12745_s1 + $0x714] ss:$28 sps:$4 sm:$0xff]  }
 0x128   : > { %3166 = vmatprep.subr.bf16.mxu0 %v9017_v53  ;;  %8234 = vmatprep.subr.bf16.mxu1 %v9049_v55  ;;  %v9094_v53 = vld [vmem:[%s12745_s1 + $0x6d8] ss:$28 sps:$4 sm:$0xff]   ;;  %v9125_v55 = vld [vmem:[%s12745_s1 + $0xc20] ss:$28 sps:$4 sm:$0xff]  }
 0x12b   : > { %3167 = vmatpush1.bf16.msra.mxu0 %v9015_v56  ;;  %8235 = vmatpush3.bf16.msra.mxu1 %v9053_v58  ;;  %v9128_v56 = vld [vmem:[%s12747_s3 + $0x4] ss:$28 sps:$4 sm:$0xff]   ;;  %v9104_v58 = vld [vmem:[%s12745_s1 + $0x74c] ss:$28 sps:$4 sm:$0xff]  }
 0x12c   : > { %3177 = vmatprep.subr.bf16.mxu0 %v9022_v57  ;;  %8242 = vmatprep.subr.bf16.mxu1 %v9054_v59  ;;  %v9098_v57 = vld [vmem:[%s12745_s1 + $0x710] ss:$28 sps:$4 sm:$0xff]   ;;  %v9126_v59 = vld [vmem:[%s12747_s3] ss:$28 sps:$4 sm:$0xff]  }
 0x12e   : > { %3169 = vmatmul.mubr.bf16.vlgmr.msra.gmra.mrb[4].mxu0 %v10168_v5  ;;  %3373 = vmatmul.mubr.bf16.vlgmr.msra.gmra.mrb[8].mxu1 %v10375_v10  ;;  %v9064_v5 = vld [vmem:[%s12745_s1 + $0x948] ss:$28 sps:$4 sm:$0xff]  }
 0x12f   : > { %3178 = vmatpush1.bf16.msra.mxu0 %v9020_v60  ;;  %8243 = vmatpush3.bf16.msra.mxu1 %v9058_v62  ;;  %v9134_v60 = vld [vmem:[%s12747_s3 + $0x3c] ss:$28 sps:$4 sm:$0xff]   ;;  %v9108_v62 = vld [vmem:[%s12745_s1 + $0x784] ss:$28 sps:$4 sm:$0xff]  }
 0x130   : > { %3179 = vmatprep.subr.bf16.mxu0 %v9027_v61  ;;  %8244 = vmatprep.subr.bf16.mxu1 %v9059_v63  ;;  %v9102_v61 = vld [vmem:[%s12745_s1 + $0x748] ss:$28 sps:$4 sm:$0xff]   ;;  %v11081_v63 = vld [vmem:[%s10092_s21 + $0x18] ss:$0 sps:$4 sm:$0xff]   ;;  %s8195_s21 = sshll.u32 %s9928_s28, 7  ;;  %s9866_s28 = smov [#allocation2]  }
 0x131   : > { %3412 = vmatprep.mubr.bf16.mxu1 %v10391_v15  ;;  %3209 = vmatprep.mubr.bf16.mxu0 %v10246_v30  ;;  %v9069_v30 = vld [vmem:[%s12745_s1 + $0x980] ss:$28 sps:$4 sm:$0xff]   ;;  %s12702_s8 = scalar_lea.hbm %s12751_s7, %s8195_s21  ;;  %s9803_s14 = sshll.u32 %s9866_s28, 4  ;;  %s9804_s14 = int_to_ptr.vmem [resolvable:$false] %s9803_s14 }
 0x132   : > { %s9805_s22 = scalar_lea.vmem %s9804_s14, 256  ;;  %p9806_p0 = scmp.lt.s32.totalorder %s12704_s20, %s9804_s14 }
 0x133   : > { %3180 = vmatpush1.bf16.msra.mxu0 %v9025_v0  ;;  %8245 = vmatpush3.bf16.msra.mxu1 %v9063_v1  ;;  %v9132_v0 = vld [vmem:[%s12747_s3 + $0x38] ss:$28 sps:$4 sm:$0xff]   ;;  %p9807_p1 = scmp.lt.s32.totalorder %s9805_s22, %s9799_s13 }
 0x134   : > { %3181 = vmatprep.subr.bf16.mxu0 %v9032_v48  ;;  %8246 = vmatprep.subr.bf16.mxu1 %v9064_v5  ;;  %v9140_v48 = vld [vmem:[%s12747_s3 + $0x74] ss:$28 sps:$4 sm:$0xff]   ;;  %v9112_v1 = vld [vmem:[%s12745_s1 + $0x7bc] ss:$28 sps:$4 sm:$0xff]  }
 0x135   : > { %v9138_v5 = vld [vmem:[%s12747_s3 + $0x70] ss:$28 sps:$4 sm:$0xff]   ;;  %p9808_p2 = por %p9807_p1, %p9806_p0 }
 0x137   : > { %3182 = vmatpush1.bf16.msra.mxu0 %v9030_v2  ;;  %8247 = vmatpush3.bf16.msra.mxu1 %v9068_v4  ;;  %v9146_v2 = vld [vmem:[%s12747_s3 + $0xac] ss:$28 sps:$4 sm:$0xff]   ;;  %p9809_p3 = pnand %p9808_p2, %p9802_p13 }
 0x138   : > { %3183 = vmatprep.subr.bf16.mxu0 %v9037_v3  ;;  %8248 = vmatprep.subr.bf16.mxu1 %v9069_v30  ;;  %v9116_v3 = vld [vmem:[%s12745_s1 + $0x7f4] ss:$28 sps:$4 sm:$0xff]   ;;  %v9144_v4 = vld [vmem:[%s12747_s3 + $0xa8] ss:$28 sps:$4 sm:$0xff]  }
 0x139   : > { %v9152_v30 = vld [vmem:[%s12747_s3 + $0xe4] ss:$28 sps:$4 sm:$0xff]  }
 0x13b   : > { %3184 = vmatpush1.bf16.msra.mxu0 %v9035_v6  ;;  %8249 = vmatpush3.bf16.msra.mxu1 %v9073_v8  ;;  %v9114_v6 = vld [vmem:[%s12745_s1 + $0x7f0] ss:$28 sps:$4 sm:$0xff]   ;;  %v9150_v8 = vld [vmem:[%s12747_s3 + $0xe0] ss:$28 sps:$4 sm:$0xff]  }
 0x13c   : > { %3185 = vmatprep.subr.bf16.mxu0 %v9042_v7  ;;  %8250 = vmatprep.subr.bf16.mxu1 %v9074_v9  ;;  %v9120_v7 = vld [vmem:[%s12745_s1 + $0x82c] ss:$28 sps:$4 sm:$0xff]   ;;  %v9158_v9 = vld [vmem:[%s12747_s3 + $0x11c] ss:$28 sps:$4 sm:$0xff]  }
 0x13f   : > { %3186 = vmatpush1.bf16.msra.mxu0 %v9040_v11  ;;  %8251 = vmatpush3.bf16.msra.mxu1 %v9078_v14  ;;  %v9118_v11 = vld [vmem:[%s12745_s1 + $0x828] ss:$28 sps:$4 sm:$0xff]   ;;  %v9156_v14 = vld [vmem:[%s12747_s3 + $0x118] ss:$28 sps:$4 sm:$0xff]  }
 0x140   : > { %3187 = vmatprep.subr.bf16.mxu0 %v9047_v12  ;;  %8252 = vmatprep.subr.bf16.mxu1 %v9079_v16  ;;  %v9124_v12 = vld [vmem:[%s12745_s1 + $0x864] ss:$28 sps:$4 sm:$0xff]   ;;  %v9164_v16 = vld [vmem:[%s12747_s3 + $0x154] ss:$28 sps:$4 sm:$0xff]  }
 0x143   : > { %3188 = vmatpush1.bf16.msra.mxu0 %v9045_v17  ;;  %8253 = vmatpush3.bf16.msra.mxu1 %v9083_v18  ;;  %v9122_v17 = vld [vmem:[%s12745_s1 + $0x860] ss:$28 sps:$4 sm:$0xff]  }
 0x144   : > { %3189 = vmatprep.subr.bf16.mxu0 %v9052_v20  ;;  %8254 = vmatprep.subr.bf16.mxu1 %v9084_v21  ;;  %v9131_v18 = vld [vmem:[%s12745_s1 + $0x89c] ss:$28 sps:$4 sm:$0xff]   ;;  %v9162_v20 = vld [vmem:[%s12747_s3 + $0x150] ss:$28 sps:$4 sm:$0xff]  }
 0x145   : > { %v9170_v21 = vld [vmem:[%s12747_s3 + $0x18c] ss:$28 sps:$4 sm:$0xff]  }
 0x147   : > { %3190 = vmatpush1.bf16.msra.mxu0 %v9050_v22  ;;  %8255 = vmatpush3.bf16.msra.mxu1 %v9088_v13  ;;  %v9129_v22 = vld [vmem:[%s12745_s1 + $0x898] ss:$28 sps:$4 sm:$0xff]   ;;  %v9168_v13 = vld [vmem:[%s12747_s3 + $0x188] ss:$28 sps:$4 sm:$0xff]  }
 0x148   : > { %3191 = vmatprep.subr.bf16.mxu0 %v9057_v23  ;;  %8256 = vmatprep.subr.bf16.mxu1 %v9089_v24  ;;  %v9137_v23 = vld [vmem:[%s12745_s1 + $0x8d4] ss:$28 sps:$4 sm:$0xff]   ;;  %v9176_v24 = vld [vmem:[%s12747_s3 + $0x1c4] ss:$28 sps:$4 sm:$0xff]  }
 0x14b   : > { %3192 = vmatpush1.bf16.msra.mxu0 %v9055_v25  ;;  %8257 = vmatpush3.bf16.msra.mxu1 %v9093_v26  ;;  %v9135_v25 = vld [vmem:[%s12745_s1 + $0x8d0] ss:$28 sps:$4 sm:$0xff]   ;;  %v9174_v26 = vld [vmem:[%s12747_s3 + $0x1c0] ss:$28 sps:$4 sm:$0xff]  }
 0x14c   : > { %3193 = vmatprep.subr.bf16.mxu0 %v9062_v28  ;;  %8423 = vmatprep.subr.bf16.mxu1 %v9864_v33  ;;  %v9143_v28 = vld [vmem:[%s12745_s1 + $0x90c] ss:$28 sps:$4 sm:$0xff]  }
 0x14e   : > { %3413 = vmatmul.mubr.bf16.vlgmr.msra.gmra.mrb[12].mxu1 %v10582_v19 }
 0x14f   : > { %3194 = vmatpush1.bf16.msra.mxu0 %v9060_v29  ;;  %8424 = vmatpush3.bf16.msra.mxu1 %v9097_v31  ;;  %v9182_v29 = vld [vmem:[%s12747_s3 + $0x1fc] ss:$28 sps:$4 sm:$0xff]   ;;  %v9141_v31 = vld [vmem:[%s12745_s1 + $0x908] ss:$28 sps:$4 sm:$0xff]  }
 0x150   : > { %3195 = vmatprep.subr.bf16.mxu0 %v9067_v32  ;;  %8425 = vmatprep.subr.bf16.mxu1 %v9864_v33  ;;  %v9149_v32 = vld [vmem:[%s12745_s1 + $0x944] ss:$28 sps:$4 sm:$0xff]  }
 0x151   : > { %8439 = vmatprep.mubr.msk.bf16.mxu1 %vm9865_vm0, %v9864_v33 }
 0x153   : > { %3196 = vmatpush1.bf16.msra.mxu0 %v9065_v34  ;;  %8426 = vmatpush3.bf16.msra.mxu1 %v9101_v35  ;;  %v9180_v34 = vld [vmem:[%s12747_s3 + $0x1f8] ss:$28 sps:$4 sm:$0xff]  }
 0x154   : > { %3197 = vmatprep.subr.bf16.mxu0 %v9072_v36  ;;  %8427 = vmatprep.subr.bf16.mxu1 %v9864_v33  ;;  %v9188_v35 = vld [vmem:[%s12747_s3 + $0x234] ss:$28 sps:$4 sm:$0xff]   ;;  %v9147_v36 = vld [vmem:[%s12745_s1 + $0x940] ss:$28 sps:$4 sm:$0xff]  }
 0x157   : > { %3198 = vmatpush1.bf16.msra.mxu0 %v9070_v37  ;;  %8428 = vmatpush3.bf16.msra.mxu1 %v9105_v39  ;;  %v9155_v37 = vld [vmem:[%s12745_s1 + $0x97c] ss:$28 sps:$4 sm:$0xff]   ;;  %v9194_v39 = vld [vmem:[%s12747_s3 + $0x26c] ss:$28 sps:$4 sm:$0xff]  }
 0x158   : > { %3199 = vmatprep.subr.bf16.mxu0 %v9077_v38  ;;  %8429 = vmatprep.subr.bf16.mxu1 %v9864_v33  ;;  %v9186_v38 = vld [vmem:[%s12747_s3 + $0x230] ss:$28 sps:$4 sm:$0xff]  }
 0x15b   : > { %3200 = vmatpush1.bf16.msra.mxu0 %v9075_v40  ;;  %8430 = vmatpush3.bf16.msra.mxu1 %v9109_v42  ;;  %v9153_v40 = vld [vmem:[%s12745_s1 + $0x978] ss:$28 sps:$4 sm:$0xff]   ;;  %v9192_v42 = vld [vmem:[%s12747_s3 + $0x268] ss:$28 sps:$4 sm:$0xff]  }
 0x15c   : > { %3201 = vmatprep.subr.bf16.mxu0 %v9082_v41  ;;  %8431 = vmatprep.subr.bf16.mxu1 %v9864_v33  ;;  %v9161_v41 = vld [vmem:[%s12745_s1 + $0x9b4] ss:$28 sps:$4 sm:$0xff]  }
 0x15f   : > { %3202 = vmatpush1.bf16.msra.mxu0 %v9080_v43  ;;  %8432 = vmatpush3.bf16.msra.mxu1 %v9113_v45  ;;  %v9200_v43 = vld [vmem:[%s12747_s3 + $0x2a4] ss:$28 sps:$4 sm:$0xff]   ;;  %v9167_v45 = vld [vmem:[%s12745_s1 + $0x9ec] ss:$28 sps:$4 sm:$0xff]  }
 0x160   : > { %3203 = vmatprep.subr.bf16.mxu0 %v9087_v44  ;;  %8433 = vmatprep.subr.bf16.mxu1 %v9864_v33  ;;  %v9159_v44 = vld [vmem:[%s12745_s1 + $0x9b0] ss:$28 sps:$4 sm:$0xff]  }
 0x163   : > { %3204 = vmatpush1.bf16.msra.mxu0 %v9085_v46  ;;  %8434 = vmatpush3.bf16.msra.mxu1 %v9117_v49  ;;  %v9198_v46 = vld [vmem:[%s12747_s3 + $0x2a0] ss:$28 sps:$4 sm:$0xff]   ;;  %v9165_v49 = vld [vmem:[%s12745_s1 + $0x9e8] ss:$28 sps:$4 sm:$0xff]  }
 0x164   : > { %3205 = vmatprep.subr.bf16.mxu0 %v9092_v47  ;;  %8435 = vmatprep.subr.bf16.mxu1 %v9864_v33  ;;  %v9206_v47 = vld [vmem:[%s12747_s3 + $0x2dc] ss:$28 sps:$4 sm:$0xff]  }
 0x167   : > { %3206 = vmatpush1.bf16.msra.mxu0 %v9090_v50  ;;  %8436 = vmatpush3.bf16.msra.mxu1 %v9121_v52  ;;  %v9173_v50 = vld [vmem:[%s12745_s1 + $0xa24] ss:$28 sps:$4 sm:$0xff]   ;;  %v9212_v52 = vld [vmem:[%s12747_s3 + $0x314] ss:$28 sps:$4 sm:$0xff]  }
 0x168   : > { %3207 = vmatprep.subr.bf16.mxu0 %v9096_v51  ;;  %8437 = vmatprep.subr.bf16.mxu1 %v9864_v33  ;;  %v9204_v51 = vld [vmem:[%s12747_s3 + $0x2d8] ss:$28 sps:$4 sm:$0xff]  }
 0x16b   : > { %3208 = vmatpush1.bf16.msra.mxu0 %v9094_v53  ;;  %8438 = vmatpush3.bf16.msra.mxu1 %v9125_v55  ;;  %v9171_v53 = vld [vmem:[%s12745_s1 + $0xa20] ss:$28 sps:$4 sm:$0xff]   ;;  %v9210_v55 = vld [vmem:[%s12747_s3 + $0x310] ss:$28 sps:$4 sm:$0xff]  }
 0x16c   : > { %3218 = vmatprep.subr.bf16.mxu0 %v9100_v54  ;;  %5975 = vmatprep.subr.bf16.mxu1 %v9128_v56  ;;  %v9179_v54 = vld [vmem:[%s12745_s1 + $0xa5c] ss:$28 sps:$4 sm:$0xff]   ;;  %v9218_v56 = vld [vmem:[%s12747_s3 + $0x34c] ss:$28 sps:$4 sm:$0xff]  }
 0x16e   : > { %3210 = vmatmul.mubr.bf16.vlgmr.msra.gmra.mrb[4].mxu0 %v10375_v10  ;;  %8440 = vmatmul.mubr.bf16.vlgmr.msra.gmra.mrb[16].mxu1 %v11081_v63  ;;  %v9106_v10 = vld [vmem:[%s12745_s1 + $0x780] ss:$28 sps:$4 sm:$0xff]  }
 0x16f   : > { %3219 = vmatpush1.bf16.msra.mxu0 %v9098_v57  ;;  %5976 = vmatpush1.bf16.msra.mxu1 %v9126_v59  ;;  %v9177_v57 = vld [vmem:[%s12745_s1 + $0xa58] ss:$28 sps:$4 sm:$0xff]   ;;  %v9216_v59 = vld [vmem:[%s12747_s3 + $0x348] ss:$28 sps:$4 sm:$0xff]  }
 0x170   : > { %3220 = vmatprep.subr.bf16.mxu0 %v9104_v58  ;;  %5977 = vmatprep.subr.bf16.mxu1 %v9134_v60  ;;  %v9185_v58 = vld [vmem:[%s12745_s1 + $0xa94] ss:$28 sps:$4 sm:$0xff]   ;;  %v9224_v60 = vld [vmem:[%s12747_s3 + $0x384] ss:$28 sps:$4 sm:$0xff]  }
 0x171   : > { %3250 = vmatprep.mubr.bf16.mxu0 %v10391_v15  ;;  %v9110_v15 = vld [vmem:[%s12745_s1 + $0x7b8] ss:$28 sps:$4 sm:$0xff]  }
 0x173   : > { %3221 = vmatpush1.bf16.msra.mxu0 %v9102_v61  ;;  %5978 = vmatpush1.bf16.msra.mxu1 %v9132_v0  ;;  %v9183_v61 = vld [vmem:[%s12745_s1 + $0xa90] ss:$28 sps:$4 sm:$0xff]   ;;  %v9189_v0 = vld [vmem:[%s12745_s1 + $0xac8] ss:$28 sps:$4 sm:$0xff]  }
 0x174   : > { %3222 = vmatprep.subr.bf16.mxu0 %v9108_v62  ;;  %5979 = vmatprep.subr.bf16.mxu1 %v9140_v48  ;;  %v9191_v62 = vld [vmem:[%s12745_s1 + $0xacc] ss:$28 sps:$4 sm:$0xff]   ;;  %v9197_v48 = vld [vmem:[%s12745_s1 + $0xb04] ss:$28 sps:$4 sm:$0xff]  }
 0x177   : > { %3223 = vmatpush1.bf16.msra.mxu0 %v9106_v10  ;;  %5980 = vmatpush1.bf16.msra.mxu1 %v9138_v5  ;;  %v732_v10 = vlaneseq }
 0x178   : > { %3224 = vmatprep.subr.bf16.mxu0 %v9112_v1  ;;  %5981 = vmatprep.subr.bf16.mxu1 %v9146_v2  ;;  %v9195_v1 = vld [vmem:[%s12745_s1 + $0xb00] ss:$28 sps:$4 sm:$0xff]   ;;  %v9201_v2 = vld [vmem:[%s12745_s1 + $0xb38] ss:$28 sps:$4 sm:$0xff]  }
 0x179   : > { %v11279_v5 = vshrl.u32 %v732_v10, 7  ;;  %v9266_v10 = vld [vmem:[%s12747_s3 + $0x50c] ss:$28 sps:$4 sm:$0xff]  }
 0x17b   : > { %3225 = vmatpush1.bf16.msra.mxu0 %v9110_v15  ;;  %5982 = vmatpush1.bf16.msra.mxu1 %v9144_v4  ;;  %v9209_v15 = vld [vmem:[%s12745_s1 + $0xb74] ss:$28 sps:$4 sm:$0xff]   ;;  %v11293_v4 = vld [vmem:[%s12746_s2] sm:$0xff] }
 0x17c   : > { %3226 = vmatprep.subr.bf16.mxu0 %v9116_v3  ;;  %5983 = vmatprep.subr.bf16.mxu1 %v9152_v30  ;;  %v9207_v3 = vld [vmem:[%s12745_s1 + $0xb70] ss:$28 sps:$4 sm:$0xff]   ;;  %v734_v30 = vsub.s32 0, %v11279_v5 }
 0x17f   : > { %3227 = vmatpush1.bf16.msra.mxu0 %v9114_v6  ;;  %5984 = vmatpush1.bf16.msra.mxu1 %v9150_v8  ;;  %v738_v6 = vsub.s32 1, %v11279_v5  ;;  %v9215_v8 = vld [vmem:[%s12745_s1 + $0xbac] ss:$28 sps:$4 sm:$0xff]  }
 0x180   : > { %3228 = vmatprep.subr.bf16.mxu0 %v9120_v7  ;;  %5985 = vmatprep.subr.bf16.mxu1 %v9158_v9  ;;  %v746_v7 = vsub.s32 3, %v11279_v5  ;;  %v735_v9 = vrot.slane %v11293_v4, %v734_v30 }
 0x183   : > { %3229 = vmatpush1.bf16.msra.mxu0 %v9118_v11  ;;  %5986 = vmatpush1.bf16.msra.mxu1 %v9156_v14  ;;  %v739_v11 = vrot.slane %v11293_v4, %v738_v6  ;;  %v9213_v14 = vld [vmem:[%s12745_s1 + $0xba8] ss:$28 sps:$4 sm:$0xff]  }
 0x184   : > { %3230 = vmatprep.subr.bf16.mxu0 %v9124_v12  ;;  %5987 = vmatprep.subr.bf16.mxu1 %v9164_v16  ;;  %v747_v12 = vrot.slane %v11293_v4, %v746_v7  ;;  %v9221_v16 = vld [vmem:[%s12745_s1 + $0xbe4] ss:$28 sps:$4 sm:$0xff]  }
 0x187   : > { %3231 = vmatpush1.bf16.msra.mxu0 %v9122_v17  ;;  %5988 = vmatpush1.bf16.msra.mxu1 %v9162_v20 }
 0x188   : > { %3232 = vmatprep.subr.bf16.mxu0 %v9131_v18  ;;  %5989 = vmatprep.subr.bf16.mxu1 %v9170_v21 }
 0x18b   : > { %3233 = vmatpush1.bf16.msra.mxu0 %v9129_v22  ;;  %5990 = vmatpush1.bf16.msra.mxu1 %v9168_v13 }
 0x18c   : > { %3234 = vmatprep.subr.bf16.mxu0 %v9137_v23  ;;  %5991 = vmatprep.subr.bf16.mxu1 %v9176_v24 }
 0x18f   : > { %3235 = vmatpush1.bf16.msra.mxu0 %v9135_v25  ;;  %5992 = vmatpush1.bf16.msra.mxu1 %v9174_v26  ;;  %v9219_v26 = vld [vmem:[%s12745_s1 + $0xbe0] ss:$28 sps:$4 sm:$0xff]  }
 0x190   : > { %3236 = vmatprep.subr.bf16.mxu0 %v9143_v28  ;;  %5993 = vmatprep.subr.bf16.mxu1 %v9182_v29  ;;  %v9227_v28 = vld [vmem:[%s12745_s1 + $0xc1c] ss:$28 sps:$4 sm:$0xff]  }
 0x193   : > { %3237 = vmatpush1.bf16.msra.mxu0 %v9141_v31  ;;  %5994 = vmatpush1.bf16.msra.mxu1 %v9180_v34 }
 0x194   : > { %3238 = vmatprep.subr.bf16.mxu0 %v9149_v32  ;;  %5995 = vmatprep.subr.bf16.mxu1 %v9188_v35 }
 0x197   : > { %3239 = vmatpush1.bf16.msra.mxu0 %v9147_v36  ;;  %5996 = vmatpush1.bf16.msra.mxu1 %v9186_v38  ;;  %v9222_v36 = vld [vmem:[%s12747_s3 + $0x380] ss:$28 sps:$4 sm:$0xff]  }
 0x198   : > { %3240 = vmatprep.subr.bf16.mxu0 %v9155_v37  ;;  %5997 = vmatprep.subr.bf16.mxu1 %v9194_v39  ;;  %v9225_v37 = vld [vmem:[%s12745_s1 + $0xc18] ss:$28 sps:$4 sm:$0xff]  }
 0x199   : > { %v9230_v39 = vld [vmem:[%s12747_s3 + $0x3bc] ss:$28 sps:$4 sm:$0xff]  }
 0x19b   : > { %3241 = vmatpush1.bf16.msra.mxu0 %v9153_v40  ;;  %5998 = vmatpush1.bf16.msra.mxu1 %v9192_v42  ;;  %v9233_v40 = vld [vmem:[%s12747_s3 + $0xc] ss:$28 sps:$4 sm:$0xff]   ;;  %v9228_v42 = vld [vmem:[%s12747_s3 + $0x3b8] ss:$28 sps:$4 sm:$0xff]  }
 0x19c   : > { %3242 = vmatprep.subr.bf16.mxu0 %v9161_v41  ;;  %5999 = vmatprep.subr.bf16.mxu1 %v9200_v43  ;;  %v9231_v43 = vld [vmem:[%s12747_s3 + $0x8] ss:$28 sps:$4 sm:$0xff]  }
 0x19f   : > { %3243 = vmatpush1.bf16.msra.mxu0 %v9159_v44  ;;  %6000 = vmatpush1.bf16.msra.mxu1 %v9198_v46  ;;  %v9239_v46 = vld [vmem:[%s12747_s3 + $0x44] ss:$28 sps:$4 sm:$0xff]  }
 0x1a0   : > { %3244 = vmatprep.subr.bf16.mxu0 %v9167_v45  ;;  %6001 = vmatprep.subr.bf16.mxu1 %v9206_v47  ;;  %v9236_v45 = vld [vmem:[%s12747_s3 + $0x3f4] ss:$28 sps:$4 sm:$0xff]  }
 0x1a1   : > { %v9234_v47 = vld [vmem:[%s12747_s3 + $0x3f0] ss:$28 sps:$4 sm:$0xff]  }
 0x1a3   : > { %3245 = vmatpush1.bf16.msra.mxu0 %v9165_v49  ;;  %6002 = vmatpush1.bf16.msra.mxu1 %v9204_v51  ;;  %v9237_v49 = vld [vmem:[%s12747_s3 + $0x40] ss:$28 sps:$4 sm:$0xff]   ;;  %v9240_v51 = vld [vmem:[%s12747_s3 + $0x428] ss:$28 sps:$4 sm:$0xff]  }
 0x1a4   : > { %3246 = vmatprep.subr.bf16.mxu0 %v9173_v50  ;;  %6003 = vmatprep.subr.bf16.mxu1 %v9212_v52  ;;  %v9242_v50 = vld [vmem:[%s12747_s3 + $0x42c] ss:$28 sps:$4 sm:$0xff]   ;;  %v9243_v52 = vld [vmem:[%s12747_s3 + $0x78] ss:$28 sps:$4 sm:$0xff]  }
 0x1a7   : > { %3247 = vmatpush1.bf16.msra.mxu0 %v9171_v53  ;;  %6004 = vmatpush1.bf16.msra.mxu1 %v9210_v55  ;;  %v9248_v53 = vld [vmem:[%s12747_s3 + $0x464] ss:$28 sps:$4 sm:$0xff]  }
 0x1a8   : > { %3248 = vmatprep.subr.bf16.mxu0 %v9179_v54  ;;  %6005 = vmatprep.subr.bf16.mxu1 %v9218_v56  ;;  %v9251_v54 = vld [vmem:[%s12747_s3 + $0xb4] ss:$28 sps:$4 sm:$0xff]   ;;  %v9246_v55 = vld [vmem:[%s12747_s3 + $0x460] ss:$28 sps:$4 sm:$0xff]  }
 0x1a9   : > { %v9249_v56 = vld [vmem:[%s12747_s3 + $0xb0] ss:$28 sps:$4 sm:$0xff]  }
 0x1ab   : > { %3249 = vmatpush1.bf16.msra.mxu0 %v9177_v57  ;;  %6006 = vmatpush1.bf16.msra.mxu1 %v9216_v59  ;;  %v9254_v57 = vld [vmem:[%s12747_s3 + $0x49c] ss:$28 sps:$4 sm:$0xff]  }
 0x1ac   : > { %3259 = vmatprep.subr.bf16.mxu0 %v9185_v58  ;;  %6016 = vmatprep.subr.bf16.mxu1 %v9224_v60  ;;  %v9257_v58 = vld [vmem:[%s12747_s3 + $0xec] ss:$28 sps:$4 sm:$0xff]   ;;  %v9252_v59 = vld [vmem:[%s12747_s3 + $0x498] ss:$28 sps:$4 sm:$0xff]  }
 0x1ad   : > { %v9255_v60 = vld [vmem:[%s12747_s3 + $0xe8] ss:$28 sps:$4 sm:$0xff]  }
 0x1ae   : > { %3251 = vmatmul.mubr.bf16.vlgmr.msra.gmra.mrb[4].mxu0 %v10582_v19  ;;  %v9203_v19 = vld [vmem:[%s12745_s1 + $0xb3c] ss:$28 sps:$4 sm:$0xff]  }
 0x1af   : > { %3260 = vmatpush1.bf16.msra.mxu0 %v9183_v61  ;;  %3291 = vmatprep.mubr.bf16.mxu0 %v9863_v27  ;;  %v9260_v61 = vld [vmem:[%s12747_s3 + $0x4d4] ss:$28 sps:$4 sm:$0xff]  }
 0x1b0   : > { %3261 = vmatprep.subr.bf16.mxu0 %v9191_v62  ;;  %v9263_v62 = vld [vmem:[%s12747_s3 + $0x124] ss:$28 sps:$4 sm:$0xff]  }
 0x1b3   : > { %3262 = vmatpush1.bf16.msra.mxu0 %v9189_v0  ;;  %v9258_v0 = vld [vmem:[%s12747_s3 + $0x4d0] ss:$28 sps:$4 sm:$0xff]  }
 0x1b4   : > { %3263 = vmatprep.subr.bf16.mxu0 %v9197_v48  ;;  %v9261_v48 = vld [vmem:[%s12747_s3 + $0x120] ss:$28 sps:$4 sm:$0xff]  }
 0x1b7   : > { %3264 = vmatpush1.bf16.msra.mxu0 %v9195_v1  ;;  %v9269_v1 = vld [vmem:[%s12747_s3 + $0x15c] ss:$28 sps:$4 sm:$0xff]  }
 0x1b8   : > { %3265 = vmatprep.subr.bf16.mxu0 %v9203_v19 }
 0x1bb   : > { %3266 = vmatpush1.bf16.msra.mxu0 %v9201_v2 }
 0x1bc   : > { %3267 = vmatprep.subr.bf16.mxu0 %v9209_v15  ;;  %v9264_v15 = vld [vmem:[%s12747_s3 + $0x508] ss:$28 sps:$4 sm:$0xff]  }
 0x1bf   : > { %3268 = vmatpush1.bf16.msra.mxu0 %v9207_v3  ;;  %v9267_v3 = vld [vmem:[%s12747_s3 + $0x158] ss:$28 sps:$4 sm:$0xff]  }
 0x1c0   : > { %3269 = vmatprep.subr.bf16.mxu0 %v9215_v8 }
 0x1c1   : > { %v2965_v17 = vpop.f32.mrb[0].mxu0  ;;  %v11316_v18 = vpop.f32.mrb[0].mxu1 }
 0x1c2   : > { %v8483_v20 = vadd.f32 %v2965_v17, %v735_v9  ;;  %v2967_v21 = vpop.f32.mrb[1].mxu0  ;;  %v3131_v22 = vpop.f32.mrb[1].mxu1  ;;  %v9273_v17 = vld [vmem:[%s12747_s3 + $0x190] ss:$28 sps:$4 sm:$0xff]  }
 0x1c3   : > { %v8484_v13 = vadd.f32 %v2967_v21, %v739_v11  ;;  %v8486_v23 = vadd.f32 %v3131_v22, %v747_v12  ;;  %v2969_v24 = vpop.f32.mrb[2].mxu0  ;;  %v3133_v25 = vpop.f32.mrb[2].mxu1  ;;  %3270 = vmatpush1.bf16.msra.mxu0 %v9213_v14  ;;  %v9272_v11 = vld [vmem:[%s12747_s3 + $0x544] ss:$28 sps:$4 sm:$0xff]   ;;  %v9275_v12 = vld [vmem:[%s12747_s3 + $0x194] ss:$28 sps:$4 sm:$0xff]  }
 0x1c4   : > { %v3460_v29 = vmax.f32 %v8483_v20, 0.0  ;;  %v2970_v31 = vpop.f32.mrb[3].mxu0  ;;  %v3134_v32 = vpop.f32.mrb[3].mxu1  ;;  %3271 = vmatprep.subr.bf16.mxu0 %v9221_v16  ;;  %v9270_v16 = vld [vmem:[%s12747_s3 + $0x540] ss:$28 sps:$4 sm:$0xff]  }
 0x1c5   : > { %v3461_v34 = vmax.f32 %v8484_v13, 0.0  ;;  %v3463_v35 = vmax.f32 %v8486_v23, 0.0  ;;  %v9278_v20 = vld [vmem:[%s12747_s3 + $0x57c] ss:$28 sps:$4 sm:$0xff]   ;;  %v9281_v21 = vld [vmem:[%s12747_s3 + $0x1cc] ss:$28 sps:$4 sm:$0xff]  }
 0x1c6   : > { %v11338_v41 = vpack.c.bf16 %v3460_v29, %v3460_v29  ;;  %v9276_v22 = vld [vmem:[%s12747_s3 + $0x578] ss:$28 sps:$4 sm:$0xff]   ;;  %v9279_v13 = vld [vmem:[%s12747_s3 + $0x1c8] ss:$28 sps:$4 sm:$0xff]   ;;  %v9282_v25 = vld [vmem:[%s12747_s3 + $0x5b0] ss:$28 sps:$4 sm:$0xff]  }
 0x1c7   : > { %v11330_v38 = vpack.c.bf16 %v3461_v34, %v3461_v34  ;;  %3272 = vmatpush1.bf16.msra.mxu0 %v9219_v26  ;;  %v11347_v44 = vpack.c.bf16 %v3463_v35, %v3463_v35  ;;  %v9284_v23 = vld [vmem:[%s12747_s3 + $0x5b4] ss:$28 sps:$4 sm:$0xff]   ;;  %v9287_v24 = vld [vmem:[%s12747_s3 + $0x204] ss:$28 sps:$4 sm:$0xff]   ;;  %v9293_v29 = vld [vmem:[%s12747_s3 + $0x23c] ss:$28 sps:$4 sm:$0xff]  }
 0x1c8   : > { %3273 = vmatprep.subr.bf16.mxu0 %v9227_v28  ;;  %v9285_v26 = vld [vmem:[%s12747_s3 + $0x200] ss:$28 sps:$4 sm:$0xff]   ;;  %v9290_v28 = vld [vmem:[%s12747_s3 + $0x5ec] ss:$28 sps:$4 sm:$0xff]   ;;  %v9291_v32 = vld [vmem:[%s12747_s3 + $0x238] ss:$28 sps:$4 sm:$0xff]  }
 0x1c9   : > { %6007 = vmatprep.mubr.bf16.mxu1 %v11330_v38  ;;  %v9288_v31 = vld [vmem:[%s12747_s3 + $0x5e8] ss:$28 sps:$4 sm:$0xff]   ;;  %v9299_v35 = vld [vmem:[%s12747_s3 + $0x274] ss:$28 sps:$4 sm:$0xff]  }
 0x1ca   : > { %6008 = vmatmul.mubr.bf16.vlgmr.msra.gmra.mrb[20].mxu1 %v11338_v41  ;;  %v9296_v34 = vld [vmem:[%s12747_s3 + $0x624] ss:$28 sps:$4 sm:$0xff]  }
 0x1cb   : > { %6017 = vmatpush1.bf16.msra.mxu1 %v9222_v36  ;;  %3274 = vmatpush1.bf16.msra.mxu0 %v9225_v37  ;;  %v9294_v36 = vld [vmem:[%s12747_s3 + $0x620] ss:$28 sps:$4 sm:$0xff]   ;;  %v9297_v37 = vld [vmem:[%s12747_s3 + $0x270] ss:$28 sps:$4 sm:$0xff]  }
 0x1cc   : > { %6048 = vmatprep.mubr.bf16.mxu1 %v11347_v44  ;;  %6018 = vmatprep.subr.bf16.mxu1 %v9230_v39  ;;  %v9302_v39 = vld [vmem:[%s12747_s3 + $0x65c] ss:$28 sps:$4 sm:$0xff]  }
 0x1cd   : > { %6139 = vmatprep.subr.bf16.mxu0 %v9233_v40  ;;  %v742_v40 = vsub.s32 2, %v11279_v5 }
 0x1ce   : > { %3292 = vmatmul.mubr.bf16.vlgmr.msra.gmra.mrb[4].mxu0 %v11081_v63  ;;  %v9245_v63 = vld [vmem:[%s12747_s3 + $0x7c] ss:$28 sps:$4 sm:$0xff]  }
 0x1cf   : > { %6019 = vmatpush1.bf16.msra.mxu1 %v9228_v42  ;;  %6140 = vmatpush1.bf16.msra.mxu0 %v9231_v43  ;;  %v9305_v42 = vld [vmem:[%s12747_s3 + $0x2ac] ss:$28 sps:$4 sm:$0xff]   ;;  %v758_v43 = vsub.s32 6, %v11279_v5 }
 0x1d0   : > { %6171 = vmatprep.mubr.bf16.mxu0 %v11330_v38  ;;  %6020 = vmatprep.subr.bf16.mxu1 %v9236_v45  ;;  %v9300_v45 = vld [vmem:[%s12747_s3 + $0x658] ss:$28 sps:$4 sm:$0xff]  }
 0x1d1   : > { %6141 = vmatprep.subr.bf16.mxu0 %v9239_v46  ;;  %v9303_v46 = vld [vmem:[%s12747_s3 + $0x2a8] ss:$28 sps:$4 sm:$0xff]  }
 0x1d3   : > { %6021 = vmatpush1.bf16.msra.mxu1 %v9234_v47  ;;  %6142 = vmatpush1.bf16.msra.mxu0 %v9237_v49  ;;  %v9308_v47 = vld [vmem:[%s12747_s3 + $0x694] ss:$28 sps:$4 sm:$0xff]   ;;  %v743_v49 = vrot.slane %v11293_v4, %v742_v40 }
 0x1d4   : > { %6022 = vmatprep.subr.bf16.mxu1 %v9242_v50  ;;  %6143 = vmatprep.subr.bf16.mxu0 %v9245_v63  ;;  %v9311_v50 = vld [vmem:[%s12747_s3 + $0x2e4] ss:$28 sps:$4 sm:$0xff]   ;;  %v759_v63 = vrot.slane %v11293_v4, %v758_v43  ;;  %v9317_v4 = vld [vmem:[%s12747_s3 + $0x31c] ss:$28 sps:$4 sm:$0xff]  }
 0x1d7   : > { %6023 = vmatpush1.bf16.msra.mxu1 %v9240_v51  ;;  %6144 = vmatpush1.bf16.msra.mxu0 %v9243_v52  ;;  %v9306_v51 = vld [vmem:[%s12747_s3 + $0x690] ss:$28 sps:$4 sm:$0xff]   ;;  %v9309_v52 = vld [vmem:[%s12747_s3 + $0x2e0] ss:$28 sps:$4 sm:$0xff]  }
 0x1d8   : > { %6024 = vmatprep.subr.bf16.mxu1 %v9248_v53  ;;  %6145 = vmatprep.subr.bf16.mxu0 %v9251_v54  ;;  %v9314_v53 = vld [vmem:[%s12747_s3 + $0x6cc] ss:$28 sps:$4 sm:$0xff]   ;;  %v8485_v54 = vadd.f32 %v11316_v18, %v743_v49  ;;  %v9320_v18 = vld [vmem:[%s12747_s3 + $0x354] ss:$28 sps:$4 sm:$0xff]  }
 0x1db   : > { %6025 = vmatpush1.bf16.msra.mxu1 %v9246_v55  ;;  %6146 = vmatpush1.bf16.msra.mxu0 %v9249_v56  ;;  %v9312_v55 = vld [vmem:[%s12747_s3 + $0x6c8] ss:$28 sps:$4 sm:$0xff]   ;;  %v9315_v56 = vld [vmem:[%s12747_s3 + $0x318] ss:$28 sps:$4 sm:$0xff]  }
 0x1dc   : > { %6026 = vmatprep.subr.bf16.mxu1 %v9254_v57  ;;  %6147 = vmatprep.subr.bf16.mxu0 %v9257_v58 }
 0x1df   : > { %6027 = vmatpush1.bf16.msra.mxu1 %v9252_v59  ;;  %6148 = vmatpush1.bf16.msra.mxu0 %v9255_v60 }
 0x1e0   : > { %6028 = vmatprep.subr.bf16.mxu1 %v9260_v61  ;;  %6149 = vmatprep.subr.bf16.mxu0 %v9263_v62  ;;  %v9371_v62 = vld [vmem:[%s12747_s3 + $0x704] ss:$28 sps:$4 sm:$0xff]  }
 0x1e1   : > { %v8214_v19 = vpop.f32.mrb[4].mxu1 }
 0x1e2   : > { %v8215_v2 = vpop.f32.mrb[5].mxu1 }
 0x1e3   : > { %6029 = vmatpush1.bf16.msra.mxu1 %v9258_v0  ;;  %6150 = vmatpush1.bf16.msra.mxu0 %v9261_v48  ;;  %v11425_v8 = vadd.f32 %v8215_v2, %v8214_v19  ;;  %v8217_v9 = vpop.f32.mrb[6].mxu1  ;;  %v3462_v0 = vmax.f32 %v8485_v54, 0.0  ;;  %v9369_v19 = vld [vmem:[%s12747_s3 + $0x700] ss:$28 sps:$4 sm:$0xff]   ;;  %v9323_v2 = vld [vmem:[%s12747_s3 + $0x38c] ss:$28 sps:$4 sm:$0xff]  }
 0x1e4   : > { %6030 = vmatprep.subr.bf16.mxu1 %v9266_v10  ;;  %6151 = vmatprep.subr.bf16.mxu0 %v9269_v1  ;;  %v8218_v14 = vpop.f32.mrb[7].mxu1  ;;  %v9318_v10 = vld [vmem:[%s12747_s3 + $0x350] ss:$28 sps:$4 sm:$0xff]   ;;  %v9326_v9 = vld [vmem:[%s12747_s3 + $0x3c4] ss:$28 sps:$4 sm:$0xff]  }
 0x1e5   : > { %v3335_v57 = vadd.f32 %v11425_v8, %v759_v63  ;;  %v9321_v8 = vld [vmem:[%s12747_s3 + $0x388] ss:$28 sps:$4 sm:$0xff]   ;;  %v9324_v14 = vld [vmem:[%s12747_s3 + $0x3c0] ss:$28 sps:$4 sm:$0xff]   ;;  %v9342_v54 = vld [vmem:[%s12747_s3 + $0x510] ss:$28 sps:$4 sm:$0xff]  }
 0x1e7   : > { %6031 = vmatpush1.bf16.msra.mxu1 %v9264_v15  ;;  %6152 = vmatpush1.bf16.msra.mxu0 %v9267_v3  ;;  %v9377_v15 = vld [vmem:[%s12747_s3 + $0x73c] ss:$28 sps:$4 sm:$0xff]   ;;  %v11553_v3 = vpack.c.bf16 %v3462_v0, %v3462_v0  ;;  %v9437_v0 = vld [vmem:[%s12747_s3 + $0x96c] ss:$28 sps:$4 sm:$0xff]  }
 0x1e8   : > { %6032 = vmatprep.subr.bf16.mxu1 %v9272_v11  ;;  %6153 = vmatprep.subr.bf16.mxu0 %v9275_v12  ;;  %v9375_v11 = vld [vmem:[%s12747_s3 + $0x738] ss:$28 sps:$4 sm:$0xff]  }
 0x1e9   : > { %v9383_v12 = vld [vmem:[%s12747_s3 + $0x774] ss:$28 sps:$4 sm:$0xff]  }
 0x1eb   : > { %6033 = vmatpush1.bf16.msra.mxu1 %v9270_v16  ;;  %6154 = vmatpush1.bf16.msra.mxu0 %v9273_v17  ;;  %v9329_v16 = vld [vmem:[%s12747_s3 + $0x3fc] ss:$28 sps:$4 sm:$0xff]   ;;  %v9381_v17 = vld [vmem:[%s12747_s3 + $0x770] ss:$28 sps:$4 sm:$0xff]  }
 0x1ec   : > { %6034 = vmatprep.subr.bf16.mxu1 %v9278_v20  ;;  %6155 = vmatprep.subr.bf16.mxu0 %v9281_v21  ;;  %v9389_v20 = vld [vmem:[%s12747_s3 + $0x7ac] ss:$28 sps:$4 sm:$0xff]   ;;  %v9327_v21 = vld [vmem:[%s12747_s3 + $0x3f8] ss:$28 sps:$4 sm:$0xff]  }
 0x1ef   : > { %6035 = vmatpush1.bf16.msra.mxu1 %v9276_v22  ;;  %6156 = vmatpush1.bf16.msra.mxu0 %v9279_v13  ;;  %v9332_v22 = vld [vmem:[%s12747_s3 + $0x434] ss:$28 sps:$4 sm:$0xff]   ;;  %v9387_v13 = vld [vmem:[%s12747_s3 + $0x7a8] ss:$28 sps:$4 sm:$0xff]  }
 0x1f0   : > { %6036 = vmatprep.subr.bf16.mxu1 %v9284_v23  ;;  %6157 = vmatprep.subr.bf16.mxu0 %v9287_v24  ;;  %v9395_v23 = vld [vmem:[%s12747_s3 + $0x7e4] ss:$28 sps:$4 sm:$0xff]   ;;  %v9330_v24 = vld [vmem:[%s12747_s3 + $0x430] ss:$28 sps:$4 sm:$0xff]  }
 0x1f3   : > { %6037 = vmatpush1.bf16.msra.mxu1 %v9282_v25  ;;  %6158 = vmatpush1.bf16.msra.mxu0 %v9285_v26  ;;  %v9335_v25 = vld [vmem:[%s12747_s3 + $0x46c] ss:$28 sps:$4 sm:$0xff]   ;;  %v9393_v26 = vld [vmem:[%s12747_s3 + $0x7e0] ss:$28 sps:$4 sm:$0xff]  }
 0x1f4   : > { %6038 = vmatprep.subr.bf16.mxu1 %v9290_v28  ;;  %6159 = vmatprep.subr.bf16.mxu0 %v9293_v29  ;;  %v9401_v28 = vld [vmem:[%s12747_s3 + $0x81c] ss:$28 sps:$4 sm:$0xff]   ;;  %v9333_v29 = vld [vmem:[%s12747_s3 + $0x468] ss:$28 sps:$4 sm:$0xff]  }
 0x1f7   : > { %6039 = vmatpush1.bf16.msra.mxu1 %v9288_v31  ;;  %6160 = vmatpush1.bf16.msra.mxu0 %v9291_v32  ;;  %v9338_v31 = vld [vmem:[%s12747_s3 + $0x4a4] ss:$28 sps:$4 sm:$0xff]   ;;  %v9399_v32 = vld [vmem:[%s12747_s3 + $0x818] ss:$28 sps:$4 sm:$0xff]  }
 0x1f8   : > { %6040 = vmatprep.subr.bf16.mxu1 %v9296_v34  ;;  %6161 = vmatprep.subr.bf16.mxu0 %v9299_v35  ;;  %v9407_v34 = vld [vmem:[%s12747_s3 + $0x854] ss:$28 sps:$4 sm:$0xff]   ;;  %v9336_v35 = vld [vmem:[%s12747_s3 + $0x4a0] ss:$28 sps:$4 sm:$0xff]  }
 0x1fb   : > { %6041 = vmatpush1.bf16.msra.mxu1 %v9294_v36  ;;  %6162 = vmatpush1.bf16.msra.mxu0 %v9297_v37  ;;  %v9341_v36 = vld [vmem:[%s12747_s3 + $0x4dc] ss:$28 sps:$4 sm:$0xff]   ;;  %v9405_v37 = vld [vmem:[%s12747_s3 + $0x850] ss:$28 sps:$4 sm:$0xff]  }
 0x1fc   : > { %6042 = vmatprep.subr.bf16.mxu1 %v9302_v39  ;;  %6163 = vmatprep.subr.bf16.mxu0 %v9305_v42  ;;  %v9413_v42 = vld [vmem:[%s12747_s3 + $0x88c] ss:$28 sps:$4 sm:$0xff]  }
 0x1ff   : > { %6043 = vmatpush1.bf16.msra.mxu1 %v9300_v45  ;;  %6164 = vmatpush1.bf16.msra.mxu0 %v9303_v46  ;;  %v9339_v46 = vld [vmem:[%s12747_s3 + $0x4d8] ss:$28 sps:$4 sm:$0xff]  }
 0x200   : > { %6044 = vmatprep.subr.bf16.mxu1 %v9308_v47  ;;  %6165 = vmatprep.subr.bf16.mxu0 %v9311_v50  ;;  %v9344_v50 = vld [vmem:[%s12747_s3 + $0x514] ss:$28 sps:$4 sm:$0xff]  }
 0x201   : > { %v8236_v58 = vpop.f32.mrb[8].mxu1 }
 0x202   : > { %v8237_v59 = vpop.f32.mrb[9].mxu1 }
 0x203   : > { %6045 = vmatpush1.bf16.msra.mxu1 %v9306_v51  ;;  %6166 = vmatpush1.bf16.msra.mxu0 %v9309_v52  ;;  %v8238_v60 = vadd.f32 %v8237_v59, %v8236_v58  ;;  %v8239_v61 = vpop.f32.mrb[10].mxu1  ;;  %v9411_v51 = vld [vmem:[%s12747_s3 + $0x888] ss:$28 sps:$4 sm:$0xff]   ;;  %v9431_v59 = vld [vmem:[%s12747_s3 + $0x934] ss:$28 sps:$4 sm:$0xff]  }
 0x204   : > { %6046 = vmatprep.subr.bf16.mxu1 %v9314_v53  ;;  %6167 = vmatprep.subr.bf16.mxu0 %v9317_v4  ;;  %v8240_v48 = vpop.f32.mrb[11].mxu1  ;;  %v9419_v53 = vld [vmem:[%s12747_s3 + $0x8c4] ss:$28 sps:$4 sm:$0xff]   ;;  %v9347_v4 = vld [vmem:[%s12747_s3 + $0x54c] ss:$28 sps:$4 sm:$0xff]  }
 0x205   : > { %v11542_v1 = vadd.f32 %v8238_v60, %v3335_v57  ;;  %v9345_v57 = vld [vmem:[%s12747_s3 + $0x548] ss:$28 sps:$4 sm:$0xff]   ;;  %v9348_v60 = vld [vmem:[%s12747_s3 + $0x580] ss:$28 sps:$4 sm:$0xff]   ;;  %v9351_v48 = vld [vmem:[%s12747_s3 + $0x5b8] ss:$28 sps:$4 sm:$0xff]  }
 0x206   : > { %v9350_v58 = vld [vmem:[%s12747_s3 + $0x584] ss:$28 sps:$4 sm:$0xff]   ;;  %v9353_v61 = vld [vmem:[%s12747_s3 + $0x5bc] ss:$28 sps:$4 sm:$0xff]  }
 0x207   : > { %6047 = vmatpush1.bf16.msra.mxu1 %v9312_v55  ;;  %6168 = vmatpush1.bf16.msra.mxu0 %v9315_v56  ;;  %v9417_v55 = vld [vmem:[%s12747_s3 + $0x8c0] ss:$28 sps:$4 sm:$0xff]  }
 0x208   : > { %6169 = vmatprep.subr.bf16.mxu0 %v9320_v18  ;;  %6057 = vmatprep.subr.bf16.mxu1 %v9371_v62  ;;  %v9425_v56 = vld [vmem:[%s12747_s3 + $0x8fc] ss:$28 sps:$4 sm:$0xff]   ;;  %v9429_v62 = vld [vmem:[%s12747_s3 + $0x930] ss:$28 sps:$4 sm:$0xff]  }
 0x209   : > { %v9423_v18 = vld [vmem:[%s12747_s3 + $0x8f8] ss:$28 sps:$4 sm:$0xff]  }
 0x20a   : > { %6049 = vmatmul.mubr.bf16.vlgmr.msra.gmra.mrb[20].mxu1 %v11553_v3 }
 0x20b   : > { %6170 = vmatpush1.bf16.msra.mxu0 %v9318_v10  ;;  %6058 = vmatpush1.bf16.msra.mxu1 %v9369_v19  ;;  %v9356_v10 = vld [vmem:[%s12747_s3 + $0x5f4] ss:$28 sps:$4 sm:$0xff]   ;;  %v9443_v19 = vld [vmem:[%s12747_s3 + $0x9a4] ss:$28 sps:$4 sm:$0xff]  }
 0x20c   : > { %6180 = vmatprep.subr.bf16.mxu0 %v9323_v2  ;;  %6059 = vmatprep.subr.bf16.mxu1 %v9377_v15  ;;  %v9354_v2 = vld [vmem:[%s12747_s3 + $0x5f0] ss:$28 sps:$4 sm:$0xff]  }
 0x20d   : > { %v9359_v15 = vld [vmem:[%s12747_s3 + $0x62c] ss:$28 sps:$4 sm:$0xff]  }
 0x20e   : > { %6172 = vmatmul.mubr.bf16.vlgmr.msra.gmra.mrb[8].mxu0 %v11338_v41 }
 0x20f   : > { %6181 = vmatpush1.bf16.msra.mxu0 %v9321_v8  ;;  %6212 = vmatprep.mubr.bf16.mxu0 %v11347_v44  ;;  %v9441_v8 = vld [vmem:[%s12747_s3 + $0x9a0] ss:$28 sps:$4 sm:$0xff]  }
 0x210   : > { %6182 = vmatprep.subr.bf16.mxu0 %v9326_v9  ;;  %6060 = vmatpush1.bf16.msra.mxu1 %v9375_v11  ;;  %v9449_v9 = vld [vmem:[%s12747_s3 + $0x9dc] ss:$28 sps:$4 sm:$0xff]   ;;  %v9357_v11 = vld [vmem:[%s12747_s3 + $0x628] ss:$28 sps:$4 sm:$0xff]  }
 0x211   : > { %6061 = vmatprep.subr.bf16.mxu1 %v9383_v12  ;;  %v9362_v12 = vld [vmem:[%s12747_s3 + $0x664] ss:$28 sps:$4 sm:$0xff]  }
 0x213   : > { %6183 = vmatpush1.bf16.msra.mxu0 %v9324_v14  ;;  %v9447_v14 = vld [vmem:[%s12747_s3 + $0x9d8] ss:$28 sps:$4 sm:$0xff]  }
 0x214   : > { %6184 = vmatprep.subr.bf16.mxu0 %v9329_v16  ;;  %6062 = vmatpush1.bf16.msra.mxu1 %v9381_v17  ;;  %v9455_v16 = vld [vmem:[%s12747_s3 + $0xa14] ss:$28 sps:$4 sm:$0xff]   ;;  %v9360_v17 = vld [vmem:[%s12747_s3 + $0x660] ss:$28 sps:$4 sm:$0xff]  }
 0x215   : > { %6063 = vmatprep.subr.bf16.mxu1 %v9389_v20  ;;  %v9365_v20 = vld [vmem:[%s12747_s3 + $0x69c] ss:$28 sps:$4 sm:$0xff]  }
 0x217   : > { %6185 = vmatpush1.bf16.msra.mxu0 %v9327_v21  ;;  %v9453_v21 = vld [vmem:[%s12747_s3 + $0xa10] ss:$28 sps:$4 sm:$0xff]  }
 0x218   : > { %6186 = vmatprep.subr.bf16.mxu0 %v9332_v22  ;;  %6064 = vmatpush1.bf16.msra.mxu1 %v9387_v13  ;;  %v9461_v13 = vld [vmem:[%s12747_s3 + $0xa4c] ss:$28 sps:$4 sm:$0xff]  }
 0x219   : > { %6065 = vmatprep.subr.bf16.mxu1 %v9395_v23 }
 0x21b   : > { %6187 = vmatpush1.bf16.msra.mxu0 %v9330_v24 }
 0x21c   : > { %6188 = vmatprep.subr.bf16.mxu0 %v9335_v25  ;;  %6066 = vmatpush1.bf16.msra.mxu1 %v9393_v26  ;;  %v9363_v25 = vld [vmem:[%s12747_s3 + $0x698] ss:$28 sps:$4 sm:$0xff]  }
 0x21d   : > { %6067 = vmatprep.subr.bf16.mxu1 %v9401_v28  ;;  %v9368_v28 = vld [vmem:[%s12747_s3 + $0x6d4] ss:$28 sps:$4 sm:$0xff]  }
 0x21f   : > { %6189 = vmatpush1.bf16.msra.mxu0 %v9333_v29  ;;  %v9459_v29 = vld [vmem:[%s12747_s3 + $0xa48] ss:$28 sps:$4 sm:$0xff]  }
 0x220   : > { %6190 = vmatprep.subr.bf16.mxu0 %v9338_v31  ;;  %6068 = vmatpush1.bf16.msra.mxu1 %v9399_v32  ;;  %v9467_v32 = vld [vmem:[%s12747_s3 + $0xa84] ss:$28 sps:$4 sm:$0xff]  }
 0x221   : > { %v8258_v39 = vpop.f32.mrb[12].mxu1  ;;  %6069 = vmatprep.subr.bf16.mxu1 %v9407_v34  ;;  %v9366_v34 = vld [vmem:[%s12747_s3 + $0x6d0] ss:$28 sps:$4 sm:$0xff]  }
 0x222   : > { %v8259_v45 = vpop.f32.mrb[13].mxu1 }
 0x223   : > { %6191 = vmatpush1.bf16.msra.mxu0 %v9336_v35  ;;  %v8260_v47 = vadd.f32 %v8259_v45, %v8258_v39  ;;  %v8261_v49 = vpop.f32.mrb[14].mxu1  ;;  %v9374_v35 = vld [vmem:[%s12747_s3 + $0x70c] ss:$28 sps:$4 sm:$0xff]   ;;  %v9378_v39 = vld [vmem:[%s12747_s3 + $0x740] ss:$28 sps:$4 sm:$0xff]  }
 0x224   : > { %6192 = vmatprep.subr.bf16.mxu0 %v9341_v36  ;;  %v8262_v63 = vpop.f32.mrb[15].mxu1  ;;  %6070 = vmatpush1.bf16.msra.mxu1 %v9405_v37  ;;  %v9372_v36 = vld [vmem:[%s12747_s3 + $0x708] ss:$28 sps:$4 sm:$0xff]   ;;  %v9384_v45 = vld [vmem:[%s12747_s3 + $0x778] ss:$28 sps:$4 sm:$0xff]  }
 0x225   : > { %v3415_v52 = vadd.f32 %v8260_v47, %v11542_v1  ;;  %6071 = vmatprep.subr.bf16.mxu1 %v9413_v42  ;;  %v9435_v1 = vld [vmem:[%s12747_s3 + $0x968] ss:$28 sps:$4 sm:$0xff]   ;;  %v9386_v42 = vld [vmem:[%s12747_s3 + $0x77c] ss:$28 sps:$4 sm:$0xff]   ;;  %v9390_v47 = vld [vmem:[%s12747_s3 + $0x7b0] ss:$28 sps:$4 sm:$0xff]  }
 0x226   : > { %v9380_v37 = vld [vmem:[%s12747_s3 + $0x744] ss:$28 sps:$4 sm:$0xff]   ;;  %v9398_v49 = vld [vmem:[%s12747_s3 + $0x7ec] ss:$28 sps:$4 sm:$0xff]  }
 0x227   : > { %6193 = vmatpush1.bf16.msra.mxu0 %v9339_v46  ;;  %v9392_v46 = vld [vmem:[%s12747_s3 + $0x7b4] ss:$28 sps:$4 sm:$0xff]   ;;  %v9404_v63 = vld [vmem:[%s12747_s3 + $0x824] ss:$28 sps:$4 sm:$0xff]  }
 0x228   : > { %6194 = vmatprep.subr.bf16.mxu0 %v9344_v50  ;;  %6072 = vmatpush1.bf16.msra.mxu1 %v9411_v51  ;;  %v9396_v50 = vld [vmem:[%s12747_s3 + $0x7e8] ss:$28 sps:$4 sm:$0xff]   ;;  %v9402_v51 = vld [vmem:[%s12747_s3 + $0x820] ss:$28 sps:$4 sm:$0xff]  }
 0x229   : > { %6073 = vmatprep.subr.bf16.mxu1 %v9419_v53  ;;  %v9408_v53 = vld [vmem:[%s12747_s3 + $0x858] ss:$28 sps:$4 sm:$0xff]  }
 0x22b   : > { %6195 = vmatpush1.bf16.msra.mxu0 %v9342_v54  ;;  %v9416_v54 = vld [vmem:[%s12747_s3 + $0x894] ss:$28 sps:$4 sm:$0xff]  }
 0x22c   : > { %6196 = vmatprep.subr.bf16.mxu0 %v9347_v4  ;;  %6074 = vmatpush1.bf16.msra.mxu1 %v9417_v55  ;;  %v9414_v4 = vld [vmem:[%s12747_s3 + $0x890] ss:$28 sps:$4 sm:$0xff]  }
 0x22d   : > { %6075 = vmatprep.subr.bf16.mxu1 %v9425_v56  ;;  %v9422_v55 = vld [vmem:[%s12747_s3 + $0x8cc] ss:$28 sps:$4 sm:$0xff]  }
 0x22e   : > { %v9420_v56 = vld [vmem:[%s12747_s3 + $0x8c8] ss:$28 sps:$4 sm:$0xff]  }
 0x22f   : > { %6197 = vmatpush1.bf16.msra.mxu0 %v9345_v57  ;;  %v9428_v57 = vld [vmem:[%s12747_s3 + $0x904] ss:$28 sps:$4 sm:$0xff]  }
 0x230   : > { %6198 = vmatprep.subr.bf16.mxu0 %v9350_v58  ;;  %6076 = vmatpush1.bf16.msra.mxu1 %v9423_v18  ;;  %v9426_v58 = vld [vmem:[%s12747_s3 + $0x900] ss:$28 sps:$4 sm:$0xff]  }
 0x231   : > { %6077 = vmatprep.subr.bf16.mxu1 %v9431_v59  ;;  %v9434_v18 = vld [vmem:[%s12747_s3 + $0x93c] ss:$28 sps:$4 sm:$0xff]  }
 0x232   : > { %v9432_v59 = vld [vmem:[%s12747_s3 + $0x938] ss:$28 sps:$4 sm:$0xff]  }
 0x233   : > { %6199 = vmatpush1.bf16.msra.mxu0 %v9348_v60  ;;  %v9440_v60 = vld [vmem:[%s12747_s3 + $0x974] ss:$28 sps:$4 sm:$0xff]  }
 0x234   : > { %6200 = vmatprep.subr.bf16.mxu0 %v9353_v61  ;;  %6078 = vmatpush1.bf16.msra.mxu1 %v9429_v62  ;;  %v9438_v61 = vld [vmem:[%s12747_s3 + $0x970] ss:$28 sps:$4 sm:$0xff]  }
 0x235   : > { %6079 = vmatprep.subr.bf16.mxu1 %v9437_v0  ;;  %v9446_v62 = vld [vmem:[%s12747_s3 + $0x9ac] ss:$28 sps:$4 sm:$0xff]  }
 0x236   : > { %v9444_v0 = vld [vmem:[%s12747_s3 + $0x9a8] ss:$28 sps:$4 sm:$0xff]  }
 0x237   : > { %6201 = vmatpush1.bf16.msra.mxu0 %v9351_v48  ;;  %v9452_v48 = vld [vmem:[%s12747_s3 + $0x9e4] ss:$28 sps:$4 sm:$0xff]  }
 0x238   : > { %6202 = vmatprep.subr.bf16.mxu0 %v9356_v10  ;;  %6080 = vmatpush1.bf16.msra.mxu1 %v9435_v1  ;;  %v9450_v10 = vld [vmem:[%s12747_s3 + $0x9e0] ss:$28 sps:$4 sm:$0xff]  }
 0x239   : > { %6081 = vmatprep.subr.bf16.mxu1 %v9443_v19  ;;  %v9458_v1 = vld [vmem:[%s12747_s3 + $0xa1c] ss:$28 sps:$4 sm:$0xff]  }
 0x23a   : > { %v9456_v19 = vld [vmem:[%s12747_s3 + $0xa18] ss:$28 sps:$4 sm:$0xff]  }
 0x23b   : > { %6203 = vmatpush1.bf16.msra.mxu0 %v9354_v2  ;;  %v9464_v2 = vld [vmem:[%s12747_s3 + $0xa54] ss:$28 sps:$4 sm:$0xff]  }
 0x23c   : > { %6204 = vmatprep.subr.bf16.mxu0 %v9359_v15  ;;  %6082 = vmatpush1.bf16.msra.mxu1 %v9441_v8  ;;  %v9462_v15 = vld [vmem:[%s12747_s3 + $0xa50] ss:$28 sps:$4 sm:$0xff]  }
 0x23d   : > { %6083 = vmatprep.subr.bf16.mxu1 %v9449_v9  ;;  %v9470_v8 = vld [vmem:[%s12747_s3 + $0xa8c] ss:$28 sps:$4 sm:$0xff]   ;;  %v750_v9 = vsub.s32 4, %v11279_v5 }
 0x23f   : > { %6205 = vmatpush1.bf16.msra.mxu0 %v9357_v11  ;;  %v754_v11 = vsub.s32 5, %v11279_v5 }
 0x240   : > { %6206 = vmatprep.subr.bf16.mxu0 %v9362_v12  ;;  %6084 = vmatpush1.bf16.msra.mxu1 %v9447_v14  ;;  %v9798_v12 = vld [vmem:[%s12746_s2] sm:$0xff] }
 0x241   : > { %v3454_v22 = vpop.f32.mrb[16].mxu1  ;;  %6085 = vmatprep.subr.bf16.mxu1 %v9455_v16  ;;  %v751_v14 = vrot.slane %v9798_v12, %v750_v9  ;;  %v755_v16 = vrot.slane %v9798_v12, %v754_v11  ;;  %v9521_v12 = vld [vmem:[%s12747_s3 + $0x210] ss:$28 sps:$4 sm:$0xff]  }
 0x242   : > { %v11727_v23 = vadd.f32 %v3454_v22, %v3415_v52  ;;  %v8441_v24 = vpop.f32.mrb[17].mxu1  ;;  %v9410_v52 = vld [vmem:[%s12747_s3 + $0x85c] ss:$28 sps:$4 sm:$0xff]  }
 0x243   : > { %6207 = vmatpush1.bf16.msra.mxu0 %v9360_v17  ;;  %v3457_v26 = vpop.f32.mrb[18].mxu1 }
 0x244   : > { %6208 = vmatprep.subr.bf16.mxu0 %v9365_v20  ;;  %6086 = vmatpush1.bf16.msra.mxu1 %v9453_v21  ;;  %v8442_v31 = vpop.f32.mrb[19].mxu1 }
 0x245   : > { %6087 = vmatprep.subr.bf16.mxu1 %v9461_v13  ;;  %v9468_v31 = vld [vmem:[%s12747_s3 + $0xa88] ss:$28 sps:$4 sm:$0xff]  }
 0x247   : > { %6209 = vmatpush1.bf16.msra.mxu0 %v9363_v25 }
 0x248   : > { %6210 = vmatprep.subr.bf16.mxu0 %v9368_v28  ;;  %6088 = vmatpush1.bf16.msra.mxu1 %v9459_v29  ;;  %v9465_v29 = vld [vmem:[%s12747_s3 + $0xa80] ss:$28 sps:$4 sm:$0xff]  }
 0x249   : > { %6098 = vmatprep.subr.bf16.mxu1 %v9467_v32 }
 0x24b   : > { %6211 = vmatpush1.bf16.msra.mxu0 %v9366_v34  ;;  %v9473_v34 = vld [vmem:[%s12747_s3 + $0xabc] ss:$28 sps:$4 sm:$0xff]  }
 0x24c   : > { %6221 = vmatprep.subr.bf16.mxu0 %v9374_v35  ;;  %v9476_v35 = vld [vmem:[%s12747_s3 + $0xac4] ss:$28 sps:$4 sm:$0xff]  }
 0x24e   : > { %6213 = vmatmul.mubr.bf16.vlgmr.msra.gmra.mrb[8].mxu0 %v11553_v3 }
 0x24f   : > { %6222 = vmatpush1.bf16.msra.mxu0 %v9372_v36  ;;  %v9471_v36 = vld [vmem:[%s12747_s3 + $0xab8] ss:$28 sps:$4 sm:$0xff]  }
 0x250   : > { %6223 = vmatprep.subr.bf16.mxu0 %v9380_v37  ;;  %v9474_v37 = vld [vmem:[%s12747_s3 + $0xac0] ss:$28 sps:$4 sm:$0xff]  }
 0x253   : > { %6224 = vmatpush1.bf16.msra.mxu0 %v9378_v39  ;;  %v9479_v39 = vld [vmem:[%s12747_s3 + $0xaf4] ss:$28 sps:$4 sm:$0xff]  }
 0x254   : > { %6225 = vmatprep.subr.bf16.mxu0 %v9386_v42  ;;  %v9482_v42 = vld [vmem:[%s12747_s3 + $0xafc] ss:$28 sps:$4 sm:$0xff]  }
 0x257   : > { %6226 = vmatpush1.bf16.msra.mxu0 %v9384_v45  ;;  %v9477_v45 = vld [vmem:[%s12747_s3 + $0xaf0] ss:$28 sps:$4 sm:$0xff]  }
 0x258   : > { %6227 = vmatprep.subr.bf16.mxu0 %v9392_v46  ;;  %v9480_v46 = vld [vmem:[%s12747_s3 + $0xaf8] ss:$28 sps:$4 sm:$0xff]  }
 0x25b   : > { %6228 = vmatpush1.bf16.msra.mxu0 %v9390_v47  ;;  %v9485_v47 = vld [vmem:[%s12747_s3 + $0xb2c] ss:$28 sps:$4 sm:$0xff]  }
 0x25c   : > { %6229 = vmatprep.subr.bf16.mxu0 %v9398_v49  ;;  %v9488_v49 = vld [vmem:[%s12747_s3 + $0xb34] ss:$28 sps:$4 sm:$0xff]  }
 0x25f   : > { %6230 = vmatpush1.bf16.msra.mxu0 %v9396_v50  ;;  %v9483_v50 = vld [vmem:[%s12747_s3 + $0xb28] ss:$28 sps:$4 sm:$0xff]  }
 0x260   : > { %6231 = vmatprep.subr.bf16.mxu0 %v9404_v63  ;;  %v9486_v63 = vld [vmem:[%s12747_s3 + $0xb30] ss:$28 sps:$4 sm:$0xff]  }
 0x263   : > { %6232 = vmatpush1.bf16.msra.mxu0 %v9402_v51  ;;  %v9491_v51 = vld [vmem:[%s12747_s3 + $0xb64] ss:$28 sps:$4 sm:$0xff]  }
 0x264   : > { %6233 = vmatprep.subr.bf16.mxu0 %v9410_v52  ;;  %v9494_v52 = vld [vmem:[%s12747_s3 + $0xb6c] ss:$28 sps:$4 sm:$0xff]  }
 0x267   : > { %6234 = vmatpush1.bf16.msra.mxu0 %v9408_v53  ;;  %v9489_v53 = vld [vmem:[%s12747_s3 + $0xb60] ss:$28 sps:$4 sm:$0xff]  }
 0x268   : > { %6235 = vmatprep.subr.bf16.mxu0 %v9416_v54  ;;  %v9492_v54 = vld [vmem:[%s12747_s3 + $0xb68] ss:$28 sps:$4 sm:$0xff]  }
 0x26b   : > { %6236 = vmatpush1.bf16.msra.mxu0 %v9414_v4  ;;  %v9497_v4 = vld [vmem:[%s12747_s3 + $0xb9c] ss:$28 sps:$4 sm:$0xff]  }
 0x26c   : > { %6237 = vmatprep.subr.bf16.mxu0 %v9422_v55  ;;  %v9500_v55 = vld [vmem:[%s12747_s3 + $0xba4] ss:$28 sps:$4 sm:$0xff]  }
 0x26f   : > { %6238 = vmatpush1.bf16.msra.mxu0 %v9420_v56  ;;  %v9495_v56 = vld [vmem:[%s12747_s3 + $0xb98] ss:$28 sps:$4 sm:$0xff]  }
 0x270   : > { %6239 = vmatprep.subr.bf16.mxu0 %v9428_v57  ;;  %v9498_v57 = vld [vmem:[%s12747_s3 + $0xba0] ss:$28 sps:$4 sm:$0xff]  }
 0x273   : > { %6240 = vmatpush1.bf16.msra.mxu0 %v9426_v58  ;;  %v9503_v58 = vld [vmem:[%s12747_s3 + $0xbd4] ss:$28 sps:$4 sm:$0xff]  }
 0x274   : > { %6241 = vmatprep.subr.bf16.mxu0 %v9434_v18  ;;  %v9506_v18 = vld [vmem:[%s12747_s3 + $0xbdc] ss:$28 sps:$4 sm:$0xff]  }
 0x277   : > { %6242 = vmatpush1.bf16.msra.mxu0 %v9432_v59  ;;  %v9501_v59 = vld [vmem:[%s12747_s3 + $0xbd0] ss:$28 sps:$4 sm:$0xff]  }
 0x278   : > { %6243 = vmatprep.subr.bf16.mxu0 %v9440_v60  ;;  %v9504_v60 = vld [vmem:[%s12747_s3 + $0xbd8] ss:$28 sps:$4 sm:$0xff]  }
 0x27b   : > { %6244 = vmatpush1.bf16.msra.mxu0 %v9438_v61  ;;  %v9509_v61 = vld [vmem:[%s12747_s3 + $0xc0c] ss:$28 sps:$4 sm:$0xff]  }
 0x27c   : > { %6245 = vmatprep.subr.bf16.mxu0 %v9446_v62  ;;  %v9512_v62 = vld [vmem:[%s12747_s3 + $0xc14] ss:$28 sps:$4 sm:$0xff]  }
 0x27f   : > { %6246 = vmatpush1.bf16.msra.mxu0 %v9444_v0  ;;  %v9507_v0 = vld [vmem:[%s12747_s3 + $0xc08] ss:$28 sps:$4 sm:$0xff]  }
 0x280   : > { %6247 = vmatprep.subr.bf16.mxu0 %v9452_v48  ;;  %v9510_v48 = vld [vmem:[%s12747_s3 + $0xc10] ss:$28 sps:$4 sm:$0xff]  }
 0x283   : > { %6248 = vmatpush1.bf16.msra.mxu0 %v9450_v10  ;;  %v3466_v10 = vmax.f32 %v11727_v23, 0.0  ;;  %v9517_v23 = vld [vmem:[%s12747_s3 + $0x18] ss:$28 sps:$4 sm:$0xff]  }
 0x284   : > { %6249 = vmatprep.subr.bf16.mxu0 %v9458_v1  ;;  %v9515_v1 = vld [vmem:[%s12747_s3 + $0x14] ss:$28 sps:$4 sm:$0xff]  }
 0x287   : > { %6250 = vmatpush1.bf16.msra.mxu0 %v9456_v19  ;;  %v9516_v19 = vld [vmem:[%s12747_s3 + $0x1d8] ss:$28 sps:$4 sm:$0xff]  }
 0x288   : > { %6251 = vmatprep.subr.bf16.mxu0 %v9464_v2  ;;  %v9513_v2 = vld [vmem:[%s12747_s3 + $0x10] ss:$28 sps:$4 sm:$0xff]  }
 0x28b   : > { %6252 = vmatpush1.bf16.msra.mxu0 %v9462_v15  ;;  %v11963_v15 = vpack.c.bf16 %v3466_v10, %v3466_v10  ;;  %v9572_v10 = vld [vmem:[%s12747_s3 + $0x440] ss:$28 sps:$4 sm:$0xff]  }
 0x28c   : > { %6262 = vmatprep.subr.bf16.mxu0 %v9470_v8  ;;  %v9520_v8 = vld [vmem:[%s12747_s3 + $0x4c] ss:$28 sps:$4 sm:$0xff]  }
 0x2a1   : > { %v3293_v17 = vpop.f32.mrb[4].mxu0 }
 0x2a2   : > { %v8487_v20 = vadd.f32 %v3293_v17, %v751_v14  ;;  %v3295_v21 = vpop.f32.mrb[5].mxu0  ;;  %v9518_v14 = vld [vmem:[%s12747_s3 + $0x48] ss:$28 sps:$4 sm:$0xff]  }
 0x2a3   : > { %v8488_v22 = vadd.f32 %v3295_v21, %v755_v16  ;;  %v3297_v13 = vpop.f32.mrb[6].mxu0  ;;  %v9522_v16 = vld [vmem:[%s12747_s3 + $0x50] ss:$28 sps:$4 sm:$0xff]   ;;  %v9525_v17 = vld [vmem:[%s12747_s3 + $0x84] ss:$28 sps:$4 sm:$0xff]  }
 0x2a4   : > { %v3464_v24 = vmax.f32 %v8487_v20, 0.0  ;;  %v3298_v25 = vpop.f32.mrb[7].mxu0  ;;  %v9526_v20 = vld [vmem:[%s12747_s3 + $0x248] ss:$28 sps:$4 sm:$0xff]   ;;  %v9523_v21 = vld [vmem:[%s12747_s3 + $0x80] ss:$28 sps:$4 sm:$0xff]  }
 0x2a5   : > { %v3465_v26 = vmax.f32 %v8488_v22, 0.0  ;;  %v9530_v22 = vld [vmem:[%s12747_s3 + $0xbc] ss:$28 sps:$4 sm:$0xff]  }
 0x2a6   : > { %v11861_v32 = vpack.c.bf16 %v3464_v24, %v3464_v24  ;;  %v9531_v13 = vld [vmem:[%s12747_s3 + $0x280] ss:$28 sps:$4 sm:$0xff]   ;;  %v9528_v24 = vld [vmem:[%s12747_s3 + $0xb8] ss:$28 sps:$4 sm:$0xff]  }
 0x2a7   : > { %v11853_v28 = vpack.c.bf16 %v3465_v26, %v3465_v26  ;;  %v9532_v25 = vld [vmem:[%s12747_s3 + $0xc0] ss:$28 sps:$4 sm:$0xff]   ;;  %v9535_v26 = vld [vmem:[%s12747_s3 + $0xf4] ss:$28 sps:$4 sm:$0xff]  }
 0x2a9   : > { %6089 = vmatprep.mubr.bf16.mxu1 %v11853_v28  ;;  %6253 = vmatprep.mubr.bf16.mxu0 %v11853_v28 }
 0x2aa   : > { %6090 = vmatmul.mubr.bf16.vlgmr.msra.gmra.mrb[20].mxu1 %v11861_v32  ;;  %6254 = vmatmul.mubr.bf16.vlgmr.msra.gmra.mrb[8].mxu0 %v11861_v32 }
 0x2ab   : > { %6099 = vmatpush1.bf16.msra.mxu1 %v9465_v29  ;;  %6263 = vmatpush1.bf16.msra.mxu0 %v9468_v31  ;;  %v9536_v29 = vld [vmem:[%s12747_s3 + $0x2b8] ss:$28 sps:$4 sm:$0xff]   ;;  %v9533_v31 = vld [vmem:[%s12747_s3 + $0xf0] ss:$28 sps:$4 sm:$0xff]  }
 0x2ac   : > { %6100 = vmatprep.subr.bf16.mxu1 %v9473_v34  ;;  %6264 = vmatprep.subr.bf16.mxu0 %v9476_v35  ;;  %v9537_v34 = vld [vmem:[%s12747_s3 + $0xf8] ss:$28 sps:$4 sm:$0xff]   ;;  %v9540_v35 = vld [vmem:[%s12747_s3 + $0x12c] ss:$28 sps:$4 sm:$0xff]  }
 0x2ad   : > { %6130 = vmatprep.mubr.bf16.mxu1 %v9863_v27  ;;  %6294 = vmatprep.mubr.bf16.mxu0 %v9863_v27 }
 0x2af   : > { %6101 = vmatpush1.bf16.msra.mxu1 %v9471_v36  ;;  %6265 = vmatpush1.bf16.msra.mxu0 %v9474_v37  ;;  %v9541_v36 = vld [vmem:[%s12747_s3 + $0x2f0] ss:$28 sps:$4 sm:$0xff]   ;;  %v9538_v37 = vld [vmem:[%s12747_s3 + $0x128] ss:$28 sps:$4 sm:$0xff]  }
 0x2b0   : > { %6102 = vmatprep.subr.bf16.mxu1 %v9479_v39  ;;  %6266 = vmatprep.subr.bf16.mxu0 %v9482_v42  ;;  %v9542_v39 = vld [vmem:[%s12747_s3 + $0x130] ss:$28 sps:$4 sm:$0xff]   ;;  %v9545_v42 = vld [vmem:[%s12747_s3 + $0x164] ss:$28 sps:$4 sm:$0xff]  }
 0x2b3   : > { %6103 = vmatpush1.bf16.msra.mxu1 %v9477_v45  ;;  %6267 = vmatpush1.bf16.msra.mxu0 %v9480_v46  ;;  %v9546_v45 = vld [vmem:[%s12747_s3 + $0x328] ss:$28 sps:$4 sm:$0xff]   ;;  %v9543_v46 = vld [vmem:[%s12747_s3 + $0x160] ss:$28 sps:$4 sm:$0xff]  }
 0x2b4   : > { %6104 = vmatprep.subr.bf16.mxu1 %v9485_v47  ;;  %6268 = vmatprep.subr.bf16.mxu0 %v9488_v49  ;;  %v9547_v47 = vld [vmem:[%s12747_s3 + $0x168] ss:$28 sps:$4 sm:$0xff]   ;;  %v9550_v49 = vld [vmem:[%s12747_s3 + $0x19c] ss:$28 sps:$4 sm:$0xff]  }
 0x2b7   : > { %6105 = vmatpush1.bf16.msra.mxu1 %v9483_v50  ;;  %6269 = vmatpush1.bf16.msra.mxu0 %v9486_v63  ;;  %v9551_v50 = vld [vmem:[%s12747_s3 + $0x360] ss:$28 sps:$4 sm:$0xff]   ;;  %v9548_v63 = vld [vmem:[%s12747_s3 + $0x198] ss:$28 sps:$4 sm:$0xff]  }
 0x2b8   : > { %6106 = vmatprep.subr.bf16.mxu1 %v9491_v51  ;;  %6270 = vmatprep.subr.bf16.mxu0 %v9494_v52  ;;  %v9552_v51 = vld [vmem:[%s12747_s3 + $0x1a0] ss:$28 sps:$4 sm:$0xff]   ;;  %v9555_v52 = vld [vmem:[%s12747_s3 + $0x1d4] ss:$28 sps:$4 sm:$0xff]  }
 0x2bb   : > { %6107 = vmatpush1.bf16.msra.mxu1 %v9489_v53  ;;  %6271 = vmatpush1.bf16.msra.mxu0 %v9492_v54  ;;  %v9556_v53 = vld [vmem:[%s12747_s3 + $0x558] ss:$28 sps:$4 sm:$0xff]   ;;  %v9553_v54 = vld [vmem:[%s12747_s3 + $0x1d0] ss:$28 sps:$4 sm:$0xff]  }
 0x2bc   : > { %6108 = vmatprep.subr.bf16.mxu1 %v9497_v4  ;;  %6272 = vmatprep.subr.bf16.mxu0 %v9500_v55  ;;  %v9557_v4 = vld [vmem:[%s12747_s3 + $0x398] ss:$28 sps:$4 sm:$0xff]   ;;  %v9560_v55 = vld [vmem:[%s12747_s3 + $0x20c] ss:$28 sps:$4 sm:$0xff]  }
 0x2bf   : > { %6109 = vmatpush1.bf16.msra.mxu1 %v9495_v56  ;;  %6273 = vmatpush1.bf16.msra.mxu0 %v9498_v57  ;;  %v9561_v56 = vld [vmem:[%s12747_s3 + $0x590] ss:$28 sps:$4 sm:$0xff]   ;;  %v9558_v57 = vld [vmem:[%s12747_s3 + $0x208] ss:$28 sps:$4 sm:$0xff]  }
 0x2c0   : > { %6110 = vmatprep.subr.bf16.mxu1 %v9503_v58  ;;  %6274 = vmatprep.subr.bf16.mxu0 %v9506_v18  ;;  %v9562_v58 = vld [vmem:[%s12747_s3 + $0x3d0] ss:$28 sps:$4 sm:$0xff]   ;;  %v9565_v18 = vld [vmem:[%s12747_s3 + $0x244] ss:$28 sps:$4 sm:$0xff]  }
 0x2c3   : > { %6111 = vmatpush1.bf16.msra.mxu1 %v9501_v59  ;;  %6275 = vmatpush1.bf16.msra.mxu0 %v9504_v60  ;;  %v9566_v59 = vld [vmem:[%s12747_s3 + $0x5c8] ss:$28 sps:$4 sm:$0xff]   ;;  %v9563_v60 = vld [vmem:[%s12747_s3 + $0x240] ss:$28 sps:$4 sm:$0xff]  }
 0x2c4   : > { %6112 = vmatprep.subr.bf16.mxu1 %v9509_v61  ;;  %6276 = vmatprep.subr.bf16.mxu0 %v9512_v62  ;;  %v9567_v61 = vld [vmem:[%s12747_s3 + $0x408] ss:$28 sps:$4 sm:$0xff]   ;;  %v9570_v62 = vld [vmem:[%s12747_s3 + $0x27c] ss:$28 sps:$4 sm:$0xff]  }
 0x2c7   : > { %6113 = vmatpush1.bf16.msra.mxu1 %v9507_v0  ;;  %6277 = vmatpush1.bf16.msra.mxu0 %v9510_v48  ;;  %v9571_v0 = vld [vmem:[%s12747_s3 + $0x600] ss:$28 sps:$4 sm:$0xff]   ;;  %v9568_v48 = vld [vmem:[%s12747_s3 + $0x278] ss:$28 sps:$4 sm:$0xff]  }
 0x2c8   : > { %6303 = vmatprep.subr.bf16.mxu1 %v9515_v1  ;;  %8273 = vmatprep.subr.bf16.mxu0 %v9516_v19  ;;  %v9575_v1 = vld [vmem:[%s12747_s3 + $0x2b4] ss:$28 sps:$4 sm:$0xff]  }
 0x2c9   : > { %v9576_v19 = vld [vmem:[%s12747_s3 + $0x638] ss:$28 sps:$4 sm:$0xff]  }
 0x2ca   : > { %6131 = vmatmul.mubr.bf16.vlgmr.msra.gmra.mrb[20].mxu1 %v11963_v15  ;;  %6295 = vmatmul.mubr.bf16.vlgmr.msra.gmra.mrb[8].mxu0 %v11963_v15 }
 0x2cb   : > { %6304 = vmatpush1.bf16.msra.mxu1 %v9513_v2  ;;  %6335 = vmatprep.mubr.bf16.mxu1 %v11330_v38  ;;  %v9573_v2 = vld [vmem:[%s12747_s3 + $0x2b0] ss:$28 sps:$4 sm:$0xff]  }
 0x2cc   : > { %8274 = vmatpush3.bf16.msra.mxu0 %v9517_v23  ;;  %6499 = vmatprep.mubr.bf16.mxu0 %v11330_v38  ;;  %v9527_v38 = vld [vmem:[%s12747_s3 + $0x88] ss:$28 sps:$4 sm:$0xff]   ;;  %v9577_v23 = vld [vmem:[%s12747_s3 + $0x478] ss:$28 sps:$4 sm:$0xff]  }
 0x2cd   : > { %6305 = vmatprep.subr.bf16.mxu1 %v9520_v8  ;;  %8275 = vmatprep.subr.bf16.mxu0 %v9521_v12  ;;  %v9580_v8 = vld [vmem:[%s12747_s3 + $0x2ec] ss:$28 sps:$4 sm:$0xff]  }
 0x2ce   : > { %v9581_v12 = vld [vmem:[%s12747_s3 + $0x670] ss:$28 sps:$4 sm:$0xff]  }
 0x2cf   : > { %6306 = vmatpush1.bf16.msra.mxu1 %v9518_v14  ;;  %v9578_v14 = vld [vmem:[%s12747_s3 + $0x2e8] ss:$28 sps:$4 sm:$0xff]  }
 0x2d0   : > { %8276 = vmatpush3.bf16.msra.mxu0 %v9522_v16  ;;  %6307 = vmatprep.subr.bf16.mxu1 %v9525_v17  ;;  %v9582_v16 = vld [vmem:[%s12747_s3 + $0x4b0] ss:$28 sps:$4 sm:$0xff]   ;;  %v9585_v17 = vld [vmem:[%s12747_s3 + $0x324] ss:$28 sps:$4 sm:$0xff]  }
 0x2d1   : > { %8277 = vmatprep.subr.bf16.mxu0 %v9526_v20  ;;  %v9586_v20 = vld [vmem:[%s12747_s3 + $0x6a8] ss:$28 sps:$4 sm:$0xff]  }
 0x2d3   : > { %6308 = vmatpush1.bf16.msra.mxu1 %v9523_v21  ;;  %v9583_v21 = vld [vmem:[%s12747_s3 + $0x320] ss:$28 sps:$4 sm:$0xff]  }
 0x2d4   : > { %8278 = vmatpush3.bf16.msra.mxu0 %v9527_v38  ;;  %6309 = vmatprep.subr.bf16.mxu1 %v9530_v22  ;;  %v9587_v38 = vld [vmem:[%s12747_s3 + $0x4e8] ss:$28 sps:$4 sm:$0xff]   ;;  %v9590_v22 = vld [vmem:[%s12747_s3 + $0x35c] ss:$28 sps:$4 sm:$0xff]  }
 0x2d5   : > { %8279 = vmatprep.subr.bf16.mxu0 %v9531_v13  ;;  %v9591_v13 = vld [vmem:[%s12747_s3 + $0x6e0] ss:$28 sps:$4 sm:$0xff]  }
 0x2d7   : > { %6310 = vmatpush1.bf16.msra.mxu1 %v9528_v24  ;;  %v9588_v24 = vld [vmem:[%s12747_s3 + $0x358] ss:$28 sps:$4 sm:$0xff]  }
 0x2d8   : > { %8280 = vmatpush3.bf16.msra.mxu0 %v9532_v25  ;;  %6311 = vmatprep.subr.bf16.mxu1 %v9535_v26  ;;  %v9592_v25 = vld [vmem:[%s12747_s3 + $0x520] ss:$28 sps:$4 sm:$0xff]   ;;  %v9595_v26 = vld [vmem:[%s12747_s3 + $0x394] ss:$28 sps:$4 sm:$0xff]  }
 0x2d9   : > { %8281 = vmatprep.subr.bf16.mxu0 %v9536_v29  ;;  %v9596_v29 = vld [vmem:[%s12747_s3 + $0x8d8] ss:$28 sps:$4 sm:$0xff]  }
 0x2db   : > { %6312 = vmatpush1.bf16.msra.mxu1 %v9533_v31  ;;  %v9593_v31 = vld [vmem:[%s12747_s3 + $0x390] ss:$28 sps:$4 sm:$0xff]  }
 0x2dc   : > { %8282 = vmatpush3.bf16.msra.mxu0 %v9537_v34  ;;  %6313 = vmatprep.subr.bf16.mxu1 %v9540_v35  ;;  %v9597_v34 = vld [vmem:[%s12747_s3 + $0x718] ss:$28 sps:$4 sm:$0xff]   ;;  %v9600_v35 = vld [vmem:[%s12747_s3 + $0x3cc] ss:$28 sps:$4 sm:$0xff]  }
 0x2dd   : > { %8283 = vmatprep.subr.bf16.mxu0 %v9541_v36  ;;  %v9601_v36 = vld [vmem:[%s12747_s3 + $0x910] ss:$28 sps:$4 sm:$0xff]  }
 0x2df   : > { %6314 = vmatpush1.bf16.msra.mxu1 %v9538_v37  ;;  %v9598_v37 = vld [vmem:[%s12747_s3 + $0x3c8] ss:$28 sps:$4 sm:$0xff]  }
 0x2e0   : > { %8284 = vmatpush3.bf16.msra.mxu0 %v9542_v39  ;;  %6315 = vmatprep.subr.bf16.mxu1 %v9545_v42  ;;  %v9602_v39 = vld [vmem:[%s12747_s3 + $0x750] ss:$28 sps:$4 sm:$0xff]   ;;  %v9606_v42 = vld [vmem:[%s12747_s3 + $0x948] ss:$28 sps:$4 sm:$0xff]  }
 0x2e1   : > { %8285 = vmatprep.subr.bf16.mxu0 %v9546_v45  ;;  %v9607_v45 = vld [vmem:[%s12747_s3 + $0x788] ss:$28 sps:$4 sm:$0xff]  }
 0x2e3   : > { %6316 = vmatpush1.bf16.msra.mxu1 %v9543_v46  ;;  %v9610_v46 = vld [vmem:[%s12747_s3 + $0x43c] ss:$28 sps:$4 sm:$0xff]  }
 0x2e4   : > { %8286 = vmatpush3.bf16.msra.mxu0 %v9547_v47  ;;  %6317 = vmatprep.subr.bf16.mxu1 %v9550_v49  ;;  %v9611_v47 = vld [vmem:[%s12747_s3 + $0x980] ss:$28 sps:$4 sm:$0xff]   ;;  %v9608_v49 = vld [vmem:[%s12747_s3 + $0x438] ss:$28 sps:$4 sm:$0xff]  }
 0x2e5   : > { %8287 = vmatprep.subr.bf16.mxu0 %v9551_v50  ;;  %v9612_v50 = vld [vmem:[%s12747_s3 + $0x7c0] ss:$28 sps:$4 sm:$0xff]  }
 0x2e7   : > { %6318 = vmatpush1.bf16.msra.mxu1 %v9548_v63  ;;  %v9615_v63 = vld [vmem:[%s12747_s3 + $0x474] ss:$28 sps:$4 sm:$0xff]  }
 0x2e8   : > { %8288 = vmatpush3.bf16.msra.mxu0 %v9552_v51  ;;  %6319 = vmatprep.subr.bf16.mxu1 %v9555_v52  ;;  %v9616_v51 = vld [vmem:[%s12747_s3 + $0x9b8] ss:$28 sps:$4 sm:$0xff]   ;;  %v9613_v52 = vld [vmem:[%s12747_s3 + $0x470] ss:$28 sps:$4 sm:$0xff]  }
 0x2e9   : > { %8295 = vmatprep.subr.bf16.mxu0 %v9556_v53  ;;  %v9617_v53 = vld [vmem:[%s12747_s3 + $0x7f8] ss:$28 sps:$4 sm:$0xff]  }
 0x2eb   : > { %6500 = vmatmul.mubr.bf16.vlgmr.msra.gmra.mrb[12].mxu0 %v11338_v41  ;;  %6320 = vmatpush1.bf16.msra.mxu1 %v9553_v54  ;;  %v9620_v54 = vld [vmem:[%s12747_s3 + $0x4ac] ss:$28 sps:$4 sm:$0xff]  }
 0x2ec   : > { %8296 = vmatpush3.bf16.msra.mxu0 %v9557_v4  ;;  %6539 = vmatprep.mubr.bf16.mxu0 %v11347_v44  ;;  %v9621_v4 = vld [vmem:[%s12747_s3 + $0x9f0] ss:$28 sps:$4 sm:$0xff]  }
 0x2ed   : > { %6321 = vmatprep.subr.bf16.mxu1 %v9560_v55  ;;  %8297 = vmatprep.subr.bf16.mxu0 %v9561_v56  ;;  %v9618_v55 = vld [vmem:[%s12747_s3 + $0x4a8] ss:$28 sps:$4 sm:$0xff]   ;;  %v9622_v56 = vld [vmem:[%s12747_s3 + $0x830] ss:$28 sps:$4 sm:$0xff]  }
 0x2ef   : > { %6322 = vmatpush1.bf16.msra.mxu1 %v9558_v57  ;;  %v9625_v57 = vld [vmem:[%s12747_s3 + $0x4e4] ss:$28 sps:$4 sm:$0xff]  }
 0x2f0   : > { %8298 = vmatpush3.bf16.msra.mxu0 %v9562_v58  ;;  %6323 = vmatprep.subr.bf16.mxu1 %v9565_v18  ;;  %v9626_v58 = vld [vmem:[%s12747_s3 + $0xa28] ss:$28 sps:$4 sm:$0xff]   ;;  %v9623_v18 = vld [vmem:[%s12747_s3 + $0x4e0] ss:$28 sps:$4 sm:$0xff]  }
 0x2f1   : > { %8299 = vmatprep.subr.bf16.mxu0 %v9566_v59  ;;  %v9627_v59 = vld [vmem:[%s12747_s3 + $0x868] ss:$28 sps:$4 sm:$0xff]  }
 0x2f3   : > { %6324 = vmatpush1.bf16.msra.mxu1 %v9563_v60  ;;  %v9630_v60 = vld [vmem:[%s12747_s3 + $0x51c] ss:$28 sps:$4 sm:$0xff]  }
 0x2f4   : > { %8300 = vmatpush3.bf16.msra.mxu0 %v9567_v61  ;;  %6325 = vmatprep.subr.bf16.mxu1 %v9570_v62  ;;  %v9631_v61 = vld [vmem:[%s12747_s3 + $0xa60] ss:$28 sps:$4 sm:$0xff]   ;;  %v9628_v62 = vld [vmem:[%s12747_s3 + $0x518] ss:$28 sps:$4 sm:$0xff]  }
 0x2f5   : > { %8301 = vmatprep.subr.bf16.mxu0 %v9571_v0  ;;  %v9632_v0 = vld [vmem:[%s12747_s3 + $0x8a0] ss:$28 sps:$4 sm:$0xff]  }
 0x2f7   : > { %6326 = vmatpush1.bf16.msra.mxu1 %v9568_v48  ;;  %v9635_v48 = vld [vmem:[%s12747_s3 + $0x554] ss:$28 sps:$4 sm:$0xff]  }
 0x2f8   : > { %8302 = vmatpush3.bf16.msra.mxu0 %v9572_v10  ;;  %6327 = vmatprep.subr.bf16.mxu1 %v9575_v1  ;;  %v9633_v10 = vld [vmem:[%s12747_s3 + $0x550] ss:$28 sps:$4 sm:$0xff]   ;;  %v9636_v1 = vld [vmem:[%s12747_s3 + $0xa98] ss:$28 sps:$4 sm:$0xff]  }
 0x2f9   : > { %8303 = vmatprep.subr.bf16.mxu0 %v9576_v19  ;;  %v9639_v19 = vld [vmem:[%s12747_s3 + $0x58c] ss:$28 sps:$4 sm:$0xff]  }
 0x2fb   : > { %6328 = vmatpush1.bf16.msra.mxu1 %v9573_v2  ;;  %v9637_v2 = vld [vmem:[%s12747_s3 + $0x588] ss:$28 sps:$4 sm:$0xff]  }
 0x2fc   : > { %8304 = vmatpush3.bf16.msra.mxu0 %v9577_v23  ;;  %6329 = vmatprep.subr.bf16.mxu1 %v9580_v8  ;;  %v9640_v23 = vld [vmem:[%s12747_s3 + $0xad0] ss:$28 sps:$4 sm:$0xff]   ;;  %v9643_v8 = vld [vmem:[%s12747_s3 + $0x5c4] ss:$28 sps:$4 sm:$0xff]  }
 0x2fd   : > { %8305 = vmatprep.subr.bf16.mxu0 %v9581_v12  ;;  %v9641_v12 = vld [vmem:[%s12747_s3 + $0x5c0] ss:$28 sps:$4 sm:$0xff]  }
 0x2ff   : > { %6330 = vmatpush1.bf16.msra.mxu1 %v9578_v14  ;;  %v9644_v14 = vld [vmem:[%s12747_s3 + $0xb08] ss:$28 sps:$4 sm:$0xff]  }
 0x300   : > { %8306 = vmatpush3.bf16.msra.mxu0 %v9582_v16  ;;  %6331 = vmatprep.subr.bf16.mxu1 %v9585_v17  ;;  %v9647_v16 = vld [vmem:[%s12747_s3 + $0x5fc] ss:$28 sps:$4 sm:$0xff]  }
 0x301   : > { %8307 = vmatprep.subr.bf16.mxu0 %v9586_v20  ;;  %v9645_v17 = vld [vmem:[%s12747_s3 + $0x5f8] ss:$28 sps:$4 sm:$0xff]   ;;  %v9648_v20 = vld [vmem:[%s12747_s3 + $0xb40] ss:$28 sps:$4 sm:$0xff]  }
 0x303   : > { %6332 = vmatpush1.bf16.msra.mxu1 %v9583_v21  ;;  %v9651_v21 = vld [vmem:[%s12747_s3 + $0x634] ss:$28 sps:$4 sm:$0xff]  }
 0x304   : > { %8308 = vmatpush3.bf16.msra.mxu0 %v9587_v38  ;;  %6333 = vmatprep.subr.bf16.mxu1 %v9590_v22  ;;  %v9649_v38 = vld [vmem:[%s12747_s3 + $0x630] ss:$28 sps:$4 sm:$0xff]   ;;  %v9652_v22 = vld [vmem:[%s12747_s3 + $0xb78] ss:$28 sps:$4 sm:$0xff]  }
 0x305   : > { %8309 = vmatprep.subr.bf16.mxu0 %v9591_v13  ;;  %v9655_v13 = vld [vmem:[%s12747_s3 + $0x66c] ss:$28 sps:$4 sm:$0xff]  }
 0x307   : > { %6334 = vmatpush1.bf16.msra.mxu1 %v9588_v24  ;;  %v9653_v24 = vld [vmem:[%s12747_s3 + $0x668] ss:$28 sps:$4 sm:$0xff]  }
 0x308   : > { %8310 = vmatpush3.bf16.msra.mxu0 %v9592_v25  ;;  %6344 = vmatprep.subr.bf16.mxu1 %v9595_v26  ;;  %v9656_v25 = vld [vmem:[%s12747_s3 + $0xbb0] ss:$28 sps:$4 sm:$0xff]   ;;  %v9659_v26 = vld [vmem:[%s12747_s3 + $0x6a4] ss:$28 sps:$4 sm:$0xff]  }
 0x309   : > { %8317 = vmatprep.subr.bf16.mxu0 %v9596_v29  ;;  %v9657_v29 = vld [vmem:[%s12747_s3 + $0x6a0] ss:$28 sps:$4 sm:$0xff]  }
 0x30a   : > { %6336 = vmatmul.mubr.bf16.vlgmr.msra.gmra.mrb[24].mxu1 %v11338_v41  ;;  %v9605_v41 = vld [vmem:[%s12747_s3 + $0x404] ss:$28 sps:$4 sm:$0xff]  }
 0x30b   : > { %6540 = vmatmul.mubr.bf16.vlgmr.msra.gmra.mrb[16].mxu0 %v11553_v3  ;;  %6345 = vmatpush1.bf16.msra.mxu1 %v9593_v31  ;;  %v9660_v31 = vld [vmem:[%s12747_s3 + $0xbe8] ss:$28 sps:$4 sm:$0xff]  }
 0x30c   : > { %6376 = vmatprep.mubr.bf16.mxu1 %v11347_v44  ;;  %8318 = vmatpush3.bf16.msra.mxu0 %v9597_v34  ;;  %v9603_v44 = vld [vmem:[%s12747_s3 + $0x400] ss:$28 sps:$4 sm:$0xff]  }
 0x30d   : > { %6579 = vmatprep.mubr.bf16.mxu0 %v11853_v28  ;;  %6346 = vmatprep.subr.bf16.mxu1 %v9600_v35  ;;  %v9663_v34 = vld [vmem:[%s12747_s3 + $0x6dc] ss:$28 sps:$4 sm:$0xff]  }
 0x30e   : > { %8319 = vmatprep.subr.bf16.mxu0 %v9601_v36  ;;  %v9661_v35 = vld [vmem:[%s12747_s3 + $0x6d8] ss:$28 sps:$4 sm:$0xff]   ;;  %v9664_v36 = vld [vmem:[%s12747_s3 + $0xc20] ss:$28 sps:$4 sm:$0xff]  }
 0x30f   : > { %6347 = vmatpush1.bf16.msra.mxu1 %v9598_v37  ;;  %v9667_v37 = vld [vmem:[%s12747_s3 + $0x714] ss:$28 sps:$4 sm:$0xff]  }
 0x310   : > { %8320 = vmatpush3.bf16.msra.mxu0 %v9602_v39  ;;  %6348 = vmatprep.subr.bf16.mxu1 %v9605_v41  ;;  %v9713_v39 = vld [vmem:[%s12749_s5 + $0x40] sm:$0xff]   ;;  %v9665_v41 = vld [vmem:[%s12747_s3 + $0x710] ss:$28 sps:$4 sm:$0xff]  }
 0x311   : > { %8321 = vmatprep.subr.bf16.mxu0 %v9606_v42  ;;  %v9670_v42 = vld [vmem:[%s12747_s3 + $0x74c] ss:$28 sps:$4 sm:$0xff]  }
 0x313   : > { %6349 = vmatpush1.bf16.msra.mxu1 %v9603_v44  ;;  %v9714_v44 = vld [vmem:[%s12749_s5] sm:$0xff]  }
 0x314   : > { %8322 = vmatpush3.bf16.msra.mxu0 %v9607_v45  ;;  %6350 = vmatprep.subr.bf16.mxu1 %v9610_v46  ;;  %v9718_v45 = vld [vmem:[%s12749_s5 + $0x48] sm:$0xff]  }
 0x315   : > { %8323 = vmatprep.subr.bf16.mxu0 %v9611_v47  ;;  %v9668_v46 = vld [vmem:[%s12747_s3 + $0x748] ss:$28 sps:$4 sm:$0xff]  }
 0x316   : > { %v9673_v47 = vld [vmem:[%s12747_s3 + $0x784] ss:$28 sps:$4 sm:$0xff]  }
 0x317   : > { %6351 = vmatpush1.bf16.msra.mxu1 %v9608_v49  ;;  %v9723_v49 = vld [vmem:[%s12749_s5 + $0x50] sm:$0xff]  }
 0x318   : > { %8324 = vmatpush3.bf16.msra.mxu0 %v9612_v50  ;;  %6352 = vmatprep.subr.bf16.mxu1 %v9615_v63  ;;  %v9676_v50 = vld [vmem:[%s12747_s3 + $0x7bc] ss:$28 sps:$4 sm:$0xff]   ;;  %v9724_v63 = vld [vmem:[%s12749_s5 + $0x10] sm:$0xff]  }
 0x319   : > { %8325 = vmatprep.subr.bf16.mxu0 %v9616_v51  ;;  %v9728_v51 = vld [vmem:[%s12749_s5 + $0x58] sm:$0xff]  }
 0x31b   : > { %6353 = vmatpush1.bf16.msra.mxu1 %v9613_v52  ;;  %v9674_v52 = vld [vmem:[%s12747_s3 + $0x7b8] ss:$28 sps:$4 sm:$0xff]  }
 0x31c   : > { %8326 = vmatpush3.bf16.msra.mxu0 %v9617_v53  ;;  %6354 = vmatprep.subr.bf16.mxu1 %v9620_v54  ;;  %v9679_v53 = vld [vmem:[%s12747_s3 + $0x7f4] ss:$28 sps:$4 sm:$0xff]   ;;  %v9729_v54 = vld [vmem:[%s12749_s5 + $0x18] sm:$0xff]  }
 0x31d   : > { %8327 = vmatprep.subr.bf16.mxu0 %v9621_v4  ;;  %v9733_v4 = vld [vmem:[%s12749_s5 + $0x60] sm:$0xff]  }
 0x31f   : > { %6355 = vmatpush1.bf16.msra.mxu1 %v9618_v55  ;;  %v9677_v55 = vld [vmem:[%s12747_s3 + $0x7f0] ss:$28 sps:$4 sm:$0xff]  }
 0x320   : > { %8328 = vmatpush3.bf16.msra.mxu0 %v9622_v56  ;;  %6356 = vmatprep.subr.bf16.mxu1 %v9625_v57  ;;  %v9682_v56 = vld [vmem:[%s12747_s3 + $0x82c] ss:$28 sps:$4 sm:$0xff]   ;;  %v9734_v57 = vld [vmem:[%s12749_s5 + $0x20] sm:$0xff]  }
 0x321   : > { %8329 = vmatprep.subr.bf16.mxu0 %v9626_v58  ;;  %v9738_v58 = vld [vmem:[%s12749_s5 + $0x68] sm:$0xff]  }
 0x323   : > { %6357 = vmatpush1.bf16.msra.mxu1 %v9623_v18  ;;  %v9680_v18 = vld [vmem:[%s12747_s3 + $0x828] ss:$28 sps:$4 sm:$0xff]  }
 0x324   : > { %8330 = vmatpush3.bf16.msra.mxu0 %v9627_v59  ;;  %6358 = vmatprep.subr.bf16.mxu1 %v9630_v60  ;;  %v9685_v59 = vld [vmem:[%s12747_s3 + $0x864] ss:$28 sps:$4 sm:$0xff]   ;;  %v9739_v60 = vld [vmem:[%s12749_s5 + $0x28] sm:$0xff]  }
 0x325   : > { %8331 = vmatprep.subr.bf16.mxu0 %v9631_v61  ;;  %v9743_v61 = vld [vmem:[%s12749_s5 + $0x70] sm:$0xff]  }
 0x327   : > { %6359 = vmatpush1.bf16.msra.mxu1 %v9628_v62  ;;  %v9683_v62 = vld [vmem:[%s12747_s3 + $0x860] ss:$28 sps:$4 sm:$0xff]  }
 0x328   : > { %8332 = vmatpush3.bf16.msra.mxu0 %v9632_v0  ;;  %6360 = vmatprep.subr.bf16.mxu1 %v9635_v48  ;;  %v9688_v0 = vld [vmem:[%s12747_s3 + $0x89c] ss:$28 sps:$4 sm:$0xff]   ;;  %v9744_v48 = vld [vmem:[%s12749_s5 + $0x30] sm:$0xff]  }
 0x329   : > { %8443 = vmatprep.subr.bf16.mxu0 %v9864_v33 }
 0x32b   : > { %6580 = vmatmul.mubr.bf16.vlgmr.msra.gmra.mrb[20].mxu0 %v11861_v32  ;;  %6361 = vmatpush1.bf16.msra.mxu1 %v9633_v10  ;;  %v9748_v10 = vld [vmem:[%s12749_s5 + $0x78] sm:$0xff]  }
 0x32c   : > { %8444 = vmatpush3.bf16.msra.mxu0 %v9636_v1  ;;  %6362 = vmatprep.subr.bf16.mxu1 %v9639_v19  ;;  %v9686_v1 = vld [vmem:[%s12747_s3 + $0x898] ss:$28 sps:$4 sm:$0xff]  }
 0x32d   : > { %8445 = vmatprep.subr.bf16.mxu0 %v9864_v33  ;;  %8459 = vmatprep.mubr.msk.bf16.mxu0 %vm9865_vm0, %v9864_v33  ;;  %v9691_v19 = vld [vmem:[%s12747_s3 + $0x8d4] ss:$28 sps:$4 sm:$0xff]  }
 0x32f   : > { %6363 = vmatpush1.bf16.msra.mxu1 %v9637_v2  ;;  %v9749_v2 = vld [vmem:[%s12749_s5 + $0x38] sm:$0xff]  }
 0x330   : > { %8446 = vmatpush3.bf16.msra.mxu0 %v9640_v23  ;;  %6364 = vmatprep.subr.bf16.mxu1 %v9643_v8  ;;  %v9689_v23 = vld [vmem:[%s12747_s3 + $0x8d0] ss:$28 sps:$4 sm:$0xff]  }
 0x331   : > { %8447 = vmatprep.subr.bf16.mxu0 %v9864_v33  ;;  %v9694_v8 = vld [vmem:[%s12747_s3 + $0x90c] ss:$28 sps:$4 sm:$0xff]  }
 0x333   : > { %6365 = vmatpush1.bf16.msra.mxu1 %v9641_v12  ;;  %v9692_v12 = vld [vmem:[%s12747_s3 + $0x908] ss:$28 sps:$4 sm:$0xff]  }
 0x334   : > { %8448 = vmatpush3.bf16.msra.mxu0 %v9644_v14  ;;  %6366 = vmatprep.subr.bf16.mxu1 %v9647_v16  ;;  %v9697_v14 = vld [vmem:[%s12747_s3 + $0x944] ss:$28 sps:$4 sm:$0xff]  }
 0x335   : > { %8449 = vmatprep.subr.bf16.mxu0 %v9864_v33  ;;  %v9695_v16 = vld [vmem:[%s12747_s3 + $0x940] ss:$28 sps:$4 sm:$0xff]  }
 0x337   : > { %6367 = vmatpush1.bf16.msra.mxu1 %v9645_v17  ;;  %v9700_v17 = vld [vmem:[%s12747_s3 + $0x97c] ss:$28 sps:$4 sm:$0xff]  }
 0x338   : > { %8450 = vmatpush3.bf16.msra.mxu0 %v9648_v20  ;;  %6368 = vmatprep.subr.bf16.mxu1 %v9651_v21  ;;  %v9698_v20 = vld [vmem:[%s12747_s3 + $0x978] ss:$28 sps:$4 sm:$0xff]  }
 0x339   : > { %8451 = vmatprep.subr.bf16.mxu0 %v9864_v33  ;;  %v9703_v21 = vld [vmem:[%s12747_s3 + $0x9b4] ss:$28 sps:$4 sm:$0xff]  }
 0x33b   : > { %6369 = vmatpush1.bf16.msra.mxu1 %v9649_v38  ;;  %v9701_v38 = vld [vmem:[%s12747_s3 + $0x9b0] ss:$28 sps:$4 sm:$0xff]  }
 0x33c   : > { %8452 = vmatpush3.bf16.msra.mxu0 %v9652_v22  ;;  %6370 = vmatprep.subr.bf16.mxu1 %v9655_v13  ;;  %v9706_v22 = vld [vmem:[%s12747_s3 + $0x9ec] ss:$28 sps:$4 sm:$0xff]  }
 0x33d   : > { %8453 = vmatprep.subr.bf16.mxu0 %v9864_v33  ;;  %v9704_v13 = vld [vmem:[%s12747_s3 + $0x9e8] ss:$28 sps:$4 sm:$0xff]  }
 0x33f   : > { %6371 = vmatpush1.bf16.msra.mxu1 %v9653_v24  ;;  %v9709_v24 = vld [vmem:[%s12747_s3 + $0xa24] ss:$28 sps:$4 sm:$0xff]  }
 0x340   : > { %8454 = vmatpush3.bf16.msra.mxu0 %v9656_v25  ;;  %6372 = vmatprep.subr.bf16.mxu1 %v9659_v26  ;;  %v9707_v25 = vld [vmem:[%s12747_s3 + $0xa20] ss:$28 sps:$4 sm:$0xff]  }
 0x341   : > { %8455 = vmatprep.subr.bf16.mxu0 %v9864_v33  ;;  %v9712_v26 = vld [vmem:[%s12747_s3 + $0xa5c] ss:$28 sps:$4 sm:$0xff]  }
 0x343   : > { %6373 = vmatpush1.bf16.msra.mxu1 %v9657_v29  ;;  %v9710_v29 = vld [vmem:[%s12747_s3 + $0xa58] ss:$28 sps:$4 sm:$0xff]  }
 0x344   : > { %8456 = vmatpush3.bf16.msra.mxu0 %v9660_v31  ;;  %6374 = vmatprep.subr.bf16.mxu1 %v9663_v34  ;;  %v9717_v31 = vld [vmem:[%s12747_s3 + $0xa94] ss:$28 sps:$4 sm:$0xff]  }
 0x345   : > { %8457 = vmatprep.subr.bf16.mxu0 %v9864_v33  ;;  %v9715_v34 = vld [vmem:[%s12747_s3 + $0xa90] ss:$28 sps:$4 sm:$0xff]  }
 0x347   : > { %6375 = vmatpush1.bf16.msra.mxu1 %v9661_v35  ;;  %v9722_v35 = vld [vmem:[%s12747_s3 + $0xacc] ss:$28 sps:$4 sm:$0xff]  }
 0x348   : > { %8458 = vmatpush3.bf16.msra.mxu0 %v9664_v36  ;;  %6385 = vmatprep.subr.bf16.mxu1 %v9667_v37  ;;  %v9720_v36 = vld [vmem:[%s12747_s3 + $0xac8] ss:$28 sps:$4 sm:$0xff]  }
 0x349   : > { %8348 = vmatprep.subr.bf16.mxu0 %v9713_v39  ;;  %v9727_v37 = vld [vmem:[%s12747_s3 + $0xb04] ss:$28 sps:$4 sm:$0xff]  }
 0x34a   : > { %6377 = vmatmul.mubr.bf16.vlgmr.msra.gmra.mrb[24].mxu1 %v11553_v3  ;;  %v9719_v3 = vld [vmem:[%s12749_s5 + $0x8] sm:$0xff]   ;;  %v9725_v39 = vld [vmem:[%s12747_s3 + $0xb00] ss:$28 sps:$4 sm:$0xff]  }
 0x34b   : > { %8460 = vmatmul.mubr.bf16.vlgmr.msra.gmra.mrb[24].mxu0 %v11963_v15  ;;  %6386 = vmatpush1.bf16.msra.mxu1 %v9665_v41  ;;  %v9737_v41 = vld [vmem:[%s12747_s3 + $0xb74] ss:$28 sps:$4 sm:$0xff]  }
 0x34c   : > { %6417 = vmatprep.mubr.bf16.mxu1 %v11853_v28  ;;  %6387 = vmatprep.subr.bf16.mxu1 %v9670_v42  ;;  %v9671_v28 = vld [vmem:[%s12747_s3 + $0x780] ss:$28 sps:$4 sm:$0xff]   ;;  %v9735_v42 = vld [vmem:[%s12747_s3 + $0xb70] ss:$28 sps:$4 sm:$0xff]  }
 0x34d   : > { %8349 = vmatpush3.bf16.msra.mxu0 %v9714_v44  ;;  %v12519_v44 = vld [vmem:[%s12748_s4] sm:$0xff] }
 0x34e   : > { %8350 = vmatprep.subr.bf16.mxu0 %v9718_v45  ;;  %v9742_v45 = vld [vmem:[%s12747_s3 + $0xbac] ss:$28 sps:$4 sm:$0xff]  }
 0x34f   : > { %6388 = vmatpush1.bf16.msra.mxu1 %v9668_v46  ;;  %v3927_v46 = vrot.slane %v12519_v44, %v734_v30  ;;  %v3939_v30 = vrot.slane %v12519_v44, %v746_v7 }
 0x350   : > { %6389 = vmatprep.subr.bf16.mxu1 %v9673_v47  ;;  %v3931_v47 = vrot.slane %v12519_v44, %v738_v6 }
 0x351   : > { %8351 = vmatpush3.bf16.msra.mxu0 %v9719_v3  ;;  %v9740_v3 = vld [vmem:[%s12747_s3 + $0xba8] ss:$28 sps:$4 sm:$0xff]  }
 0x352   : > { %8352 = vmatprep.subr.bf16.mxu0 %v9723_v49  ;;  %v9747_v49 = vld [vmem:[%s12747_s3 + $0xbe4] ss:$28 sps:$4 sm:$0xff]  }
 0x353   : > { %6390 = vmatpush1.bf16.msra.mxu1 %v9671_v28 }
 0x354   : > { %6391 = vmatprep.subr.bf16.mxu1 %v9676_v50 }
 0x355   : > { %8353 = vmatpush3.bf16.msra.mxu0 %v9724_v63 }
 0x356   : > { %8354 = vmatprep.subr.bf16.mxu0 %v9728_v51 }
 0x357   : > { %6392 = vmatpush1.bf16.msra.mxu1 %v9674_v52 }
 0x358   : > { %6393 = vmatprep.subr.bf16.mxu1 %v9679_v53 }
 0x359   : > { %8355 = vmatpush3.bf16.msra.mxu0 %v9729_v54 }
 0x35a   : > { %8356 = vmatprep.subr.bf16.mxu0 %v9733_v4  ;;  %v9745_v4 = vld [vmem:[%s12747_s3 + $0xbe0] ss:$28 sps:$4 sm:$0xff]  }
 0x35b   : > { %6394 = vmatpush1.bf16.msra.mxu1 %v9677_v55 }
 0x35c   : > { %6395 = vmatprep.subr.bf16.mxu1 %v9682_v56 }
 0x35d   : > { %8357 = vmatpush3.bf16.msra.mxu0 %v9734_v57 }
 0x35e   : > { %8358 = vmatprep.subr.bf16.mxu0 %v9738_v58  ;;  %v9752_v58 = vld [vmem:[%s12747_s3 + $0xc1c] ss:$28 sps:$4 sm:$0xff]  }
 0x35f   : > { %6396 = vmatpush1.bf16.msra.mxu1 %v9680_v18 }
 0x360   : > { %6397 = vmatprep.subr.bf16.mxu1 %v9685_v59 }
 0x361   : > { %8359 = vmatpush3.bf16.msra.mxu0 %v9739_v60  ;;  %v9750_v60 = vld [vmem:[%s12747_s3 + $0xc18] ss:$28 sps:$4 sm:$0xff]  }
 0x362   : > { %8360 = vmatprep.subr.bf16.mxu0 %v9743_v61 }
 0x363   : > { %6398 = vmatpush1.bf16.msra.mxu1 %v9683_v62  ;;  %v9753_v62 = vld [vmem:[%s12749_s5 + $0xc0] sm:$0xff]  }
 0x364   : > { %6399 = vmatprep.subr.bf16.mxu1 %v9688_v0 }
 0x365   : > { %8361 = vmatpush3.bf16.msra.mxu0 %v9744_v48  ;;  %v9777_v48 = vld [vmem:[%s12749_s5 + $0x140] sm:$0xff]  }
 0x366   : > { %8362 = vmatprep.subr.bf16.mxu0 %v9748_v10  ;;  %v9778_v10 = vld [vmem:[%s12749_s5 + $0x100] sm:$0xff]  }
 0x367   : > { %6400 = vmatpush1.bf16.msra.mxu1 %v9686_v1  ;;  %v9779_v1 = vld [vmem:[%s12749_s5 + $0x148] sm:$0xff]  }
 0x368   : > { %6401 = vmatprep.subr.bf16.mxu1 %v9691_v19  ;;  %v9754_v19 = vld [vmem:[%s12749_s5 + $0x80] sm:$0xff]  }
 0x369   : > { %8363 = vmatpush3.bf16.msra.mxu0 %v9749_v2  ;;  %v9755_v2 = vld [vmem:[%s12749_s5 + $0xc8] sm:$0xff]  }
 0x36a   : > { %8392 = vmatprep.subr.bf16.mxu0 %v9777_v48 }
 0x36b   : > { %6402 = vmatpush1.bf16.msra.mxu1 %v9689_v23  ;;  %v9780_v23 = vld [vmem:[%s12749_s5 + $0x108] sm:$0xff]  }
 0x36c   : > { %6403 = vmatprep.subr.bf16.mxu1 %v9694_v8 }
 0x36f   : > { %6404 = vmatpush1.bf16.msra.mxu1 %v9692_v12  ;;  %v9781_v12 = vld [vmem:[%s12749_s5 + $0x150] sm:$0xff]  }
 0x370   : > { %6405 = vmatprep.subr.bf16.mxu1 %v9697_v14  ;;  %v9756_v14 = vld [vmem:[%s12749_s5 + $0x88] sm:$0xff]  }
 0x373   : > { %6406 = vmatpush1.bf16.msra.mxu1 %v9695_v16  ;;  %v9757_v16 = vld [vmem:[%s12749_s5 + $0xd0] sm:$0xff]  }
 0x374   : > { %6407 = vmatprep.subr.bf16.mxu1 %v9700_v17  ;;  %v9782_v17 = vld [vmem:[%s12749_s5 + $0x110] sm:$0xff]  }
 0x377   : > { %6408 = vmatpush1.bf16.msra.mxu1 %v9698_v20  ;;  %v9758_v20 = vld [vmem:[%s12749_s5 + $0x90] sm:$0xff]  }
 0x378   : > { %6409 = vmatprep.subr.bf16.mxu1 %v9703_v21  ;;  %v9759_v21 = vld [vmem:[%s12749_s5 + $0xd8] sm:$0xff]  }
 0x37b   : > { %6410 = vmatpush1.bf16.msra.mxu1 %v9701_v38  ;;  %v9784_v38 = vld [vmem:[%s12749_s5 + $0x118] sm:$0xff]  }
 0x37c   : > { %6411 = vmatprep.subr.bf16.mxu1 %v9706_v22  ;;  %v9785_v22 = vld [vmem:[%s12749_s5 + $0x160] sm:$0xff]  }
 0x37f   : > { %6412 = vmatpush1.bf16.msra.mxu1 %v9704_v13  ;;  %v9760_v13 = vld [vmem:[%s12749_s5 + $0x98] sm:$0xff]  }
 0x380   : > { %6413 = vmatprep.subr.bf16.mxu1 %v9709_v24  ;;  %v9761_v24 = vld [vmem:[%s12749_s5 + $0xe0] sm:$0xff]  }
 0x383   : > { %6414 = vmatpush1.bf16.msra.mxu1 %v9707_v25  ;;  %v9786_v25 = vld [vmem:[%s12749_s5 + $0x120] sm:$0xff]  }
 0x384   : > { %6415 = vmatprep.subr.bf16.mxu1 %v9712_v26  ;;  %v9762_v26 = vld [vmem:[%s12749_s5 + $0xa0] sm:$0xff]  }
 0x387   : > { %6416 = vmatpush1.bf16.msra.mxu1 %v9710_v29  ;;  %v9763_v29 = vld [vmem:[%s12749_s5 + $0xe8] sm:$0xff]  }
 0x388   : > { %6426 = vmatprep.subr.bf16.mxu1 %v9717_v31  ;;  %v9764_v31 = vld [vmem:[%s12749_s5 + $0xa8] sm:$0xff]  }
 0x38a   : > { %6418 = vmatmul.mubr.bf16.vlgmr.msra.gmra.mrb[24].mxu1 %v11861_v32  ;;  %v9732_v32 = vld [vmem:[%s12747_s3 + $0xb3c] ss:$28 sps:$4 sm:$0xff]  }
 0x38b   : > { %6427 = vmatpush1.bf16.msra.mxu1 %v9715_v34  ;;  %6458 = vmatprep.mubr.bf16.mxu1 %v9863_v27  ;;  %v9730_v27 = vld [vmem:[%s12747_s3 + $0xb38] ss:$28 sps:$4 sm:$0xff]   ;;  %v3935_v34 = vrot.slane %v12519_v44, %v742_v40 }
 0x38c   : > { %6428 = vmatprep.subr.bf16.mxu1 %v9722_v35  ;;  %v9765_v35 = vld [vmem:[%s12749_s5 + $0xf0] sm:$0xff]   ;;  %v9767_v40 = vld [vmem:[%s12749_s5 + $0xf8] sm:$0xff]  }
 0x38f   : > { %6429 = vmatpush1.bf16.msra.mxu1 %v9720_v36 }
 0x390   : > { %6430 = vmatprep.subr.bf16.mxu1 %v9727_v37 }
 0x393   : > { %6431 = vmatpush1.bf16.msra.mxu1 %v9725_v39  ;;  %v9766_v39 = vld [vmem:[%s12749_s5 + $0xb0] sm:$0xff]  }
 0x394   : > { %6432 = vmatprep.subr.bf16.mxu1 %v9732_v32 }
 0x397   : > { %6433 = vmatpush1.bf16.msra.mxu1 %v9730_v27 }
 0x398   : > { %6434 = vmatprep.subr.bf16.mxu1 %v9737_v41 }
 0x39b   : > { %6435 = vmatpush1.bf16.msra.mxu1 %v9735_v42 }
 0x39c   : > { %6436 = vmatprep.subr.bf16.mxu1 %v9742_v45  ;;  %v9768_v45 = vld [vmem:[%s12749_s5 + $0xb8] sm:$0xff]  }
 0x39d   : > { %v6132_v28 = vpop.f32.mrb[20].mxu1  ;;  %v12536_v50 = vpop.f32.mrb[8].mxu0 }
 0x39e   : > { %v8489_v63 = vadd.f32 %v6132_v28, %v3927_v46  ;;  %v6134_v51 = vpop.f32.mrb[21].mxu1  ;;  %v6298_v52 = vpop.f32.mrb[9].mxu0  ;;  %v8491_v32 = vadd.f32 %v12536_v50, %v3935_v34  ;;  %v9771_v28 = vld [vmem:[%s12749_s5 + $0x190] sm:$0xff]   ;;  %v9772_v50 = vld [vmem:[%s12749_s5 + $0x198] sm:$0xff]  }
 0x39f   : > { %v8490_v6 = vadd.f32 %v6134_v51, %v3931_v47  ;;  %v6136_v53 = vpop.f32.mrb[22].mxu1  ;;  %v6300_v54 = vpop.f32.mrb[10].mxu0  ;;  %6437 = vmatpush1.bf16.msra.mxu1 %v9740_v3  ;;  %v8492_v18 = vadd.f32 %v6298_v52, %v3939_v30  ;;  %v9769_v47 = vld [vmem:[%s12749_s5 + $0x180] sm:$0xff]   ;;  %v3951_v51 = vrot.slane %v12519_v44, %v758_v43  ;;  %v9776_v43 = vld [vmem:[%s12749_s5 + $0x1b8] sm:$0xff]  }
 0x3a0   : > { %v6627_v55 = vmax.f32 %v8489_v63, 0.0  ;;  %v6137_v56 = vpop.f32.mrb[23].mxu1  ;;  %v6301_v57 = vpop.f32.mrb[11].mxu0  ;;  %6438 = vmatprep.subr.bf16.mxu1 %v9747_v49  ;;  %v6629_v46 = vmax.f32 %v8491_v32, 0.0  ;;  %v9770_v49 = vld [vmem:[%s12749_s5 + $0x188] sm:$0xff]   ;;  %v9773_v30 = vld [vmem:[%s12749_s5 + $0x1a0] sm:$0xff]  }
 0x3a1   : > { %v6628_v7 = vmax.f32 %v8490_v6, 0.0  ;;  %v6630_v0 = vmax.f32 %v8492_v18, 0.0  ;;  %v9774_v63 = vld [vmem:[%s12749_s5 + $0x1a8] sm:$0xff]   ;;  %v9775_v53 = vld [vmem:[%s12749_s5 + $0x1b0] sm:$0xff]  }
 0x3a2   : > { %v6634_v61 = vpack.c.bf16 %v6627_v55, %v6627_v55  ;;  %v6636_v3 = vpack.c.bf16 %v6629_v46, %v6629_v46 }
 0x3a3   : > { %v6635_v59 = vpack.c.bf16 %v6628_v7, %v6628_v7  ;;  %6439 = vmatpush1.bf16.msra.mxu1 %v9745_v4  ;;  %v6637_v8 = vpack.c.bf16 %v6630_v0, %v6630_v0  ;;  %v9788_v7 = vld [vmem:[%s12749_s5 + $0x128] sm:$0xff]  }
 0x3a4   : > { %6440 = vmatprep.subr.bf16.mxu1 %v9752_v58  ;;  %v9787_v58 = vld [vmem:[%s12749_s5 + $0x168] sm:$0xff]  }
 0x3a5   : > { %7128 = vmatprep.mubr.bf16.mxu0 %v6635_v59  ;;  %v9789_v59 = vld [vmem:[%s12749_s5 + $0x170] sm:$0xff]  }
 0x3a6   : > { %7129 = vmatmul.mubr.bf16.vlgmr.msra.gmra.mrb[28].mxu0 %v6634_v61 }
 0x3a7   : > { %6441 = vmatpush1.bf16.msra.mxu1 %v9750_v60  ;;  %8393 = vmatpush3.bf16.msra.mxu0 %v9778_v10  ;;  %v9791_v10 = vld [vmem:[%s12749_s5 + $0x178] sm:$0xff]  }
 0x3a8   : > { %8370 = vmatprep.subr.bf16.mxu1 %v9753_v62  ;;  %8394 = vmatprep.subr.bf16.mxu0 %v9779_v1  ;;  %v9792_v1 = vld [vmem:[%s12749_s5 + $0x138] sm:$0xff]  }
 0x3aa   : > { %6459 = vmatmul.mubr.bf16.vlgmr.msra.gmra.mrb[24].mxu1 %v11963_v15  ;;  %v9783_v15 = vld [vmem:[%s12749_s5 + $0x158] sm:$0xff]  }
 0x3ab   : > { %8371 = vmatpush3.bf16.msra.mxu1 %v9754_v19  ;;  %7168 = vmatprep.mubr.bf16.mxu1 %v6637_v8 }
 0x3ac   : > { %8372 = vmatprep.subr.bf16.mxu1 %v9755_v2  ;;  %8395 = vmatpush3.bf16.msra.mxu0 %v9780_v23 }
 0x3ad   : > { %8396 = vmatprep.subr.bf16.mxu0 %v9781_v12 }
 0x3af   : > { %8373 = vmatpush3.bf16.msra.mxu1 %v9756_v14 }
 0x3b0   : > { %8374 = vmatprep.subr.bf16.mxu1 %v9757_v16  ;;  %8397 = vmatpush3.bf16.msra.mxu0 %v9782_v17 }
 0x3b1   : > { %8398 = vmatprep.subr.bf16.mxu0 %v9783_v15 }
 0x3b3   : > { %8375 = vmatpush3.bf16.msra.mxu1 %v9758_v20  ;;  %v3943_v20 = vrot.slane %v12519_v44, %v750_v9  ;;  %v8137_v9 = vld [vmem:[%s12750_s6] ss:$0 sm:$0xff] }
 0x3b4   : > { %8376 = vmatprep.subr.bf16.mxu1 %v9759_v21  ;;  %8399 = vmatpush3.bf16.msra.mxu0 %v9784_v38 }
 0x3b5   : > { %8400 = vmatprep.subr.bf16.mxu0 %v9785_v22  ;;  %v3947_v22 = vrot.slane %v12519_v44, %v754_v11 }
 0x3b7   : > { %8377 = vmatpush3.bf16.msra.mxu1 %v9760_v13 }
 0x3b8   : > { %8378 = vmatprep.subr.bf16.mxu1 %v9761_v24  ;;  %8401 = vmatpush3.bf16.msra.mxu0 %v9786_v25 }
 0x3b9   : > { %8402 = vmatprep.subr.bf16.mxu0 %v9787_v58 }
 0x3bb   : > { %8379 = vmatpush3.bf16.msra.mxu1 %v9762_v26 }
 0x3bc   : > { %8380 = vmatprep.subr.bf16.mxu1 %v9763_v29  ;;  %8403 = vmatpush3.bf16.msra.mxu0 %v9788_v7 }
 0x3bd   : > { %8404 = vmatprep.subr.bf16.mxu0 %v9789_v59 }
 0x3be   : > { %v8289_v36 = vpop.f32.mrb[12].mxu0 }
 0x3bf   : > { %v8290_v37 = vpop.f32.mrb[13].mxu0  ;;  %8381 = vmatpush3.bf16.msra.mxu1 %v9764_v31 }
 0x3c0   : > { %v8291_v27 = vadd.f32 %v8290_v37, %v8289_v36  ;;  %v8292_v41 = vpop.f32.mrb[14].mxu0  ;;  %8382 = vmatprep.subr.bf16.mxu1 %v9765_v35 }
 0x3c1   : > { %v8293_v42 = vpop.f32.mrb[15].mxu0 }
 0x3c2   : > { %v6502_v54 = vadd.f32 %v8291_v27, %v3951_v51 }
 0x3c3   : > { %8383 = vmatpush3.bf16.msra.mxu1 %v9766_v39 }
 0x3c4   : > { %8384 = vmatprep.subr.bf16.mxu1 %v9767_v40 }
 0x3c7   : > { %8385 = vmatpush3.bf16.msra.mxu1 %v9768_v45 }
 0x3c8   : > { %8463 = vmatprep.subr.bf16.mxu1 %v9864_v33 }
 0x3ca   : > { %7169 = vmatmul.mubr.bf16.vlgmr.msra.gmra.mrb[28].mxu1 %v6636_v3 }
 0x3cb   : > { %8464 = vmatpush3.bf16.msra.mxu1 %v9769_v47  ;;  %8479 = vmatprep.mubr.msk.bf16.mxu1 %vm9865_vm0, %v9864_v33 }
 0x3cc   : > { %8465 = vmatprep.subr.bf16.mxu1 %v9864_v33 }
 0x3cf   : > { %8466 = vmatpush3.bf16.msra.mxu1 %v9770_v49 }
 0x3d0   : > { %8467 = vmatprep.subr.bf16.mxu1 %v9864_v33 }
 0x3d3   : > { %8468 = vmatpush3.bf16.msra.mxu1 %v9771_v28 }
 0x3d4   : > { %8469 = vmatprep.subr.bf16.mxu1 %v9864_v33 }
 0x3d7   : > { %8470 = vmatpush3.bf16.msra.mxu1 %v9772_v50 }
 0x3d8   : > { %8471 = vmatprep.subr.bf16.mxu1 %v9864_v33 }
 0x3db   : > { %8472 = vmatpush3.bf16.msra.mxu1 %v9773_v30 }
 0x3dc   : > { %8473 = vmatprep.subr.bf16.mxu1 %v9864_v33 }
 0x3de   : > { %v8311_v52 = vpop.f32.mrb[16].mxu0 }
 0x3df   : > { %v8312_v6 = vpop.f32.mrb[17].mxu0  ;;  %8474 = vmatpush3.bf16.msra.mxu1 %v9774_v63 }
 0x3e0   : > { %v8313_v4 = vadd.f32 %v8312_v6, %v8311_v52  ;;  %v8314_v55 = vpop.f32.mrb[18].mxu0  ;;  %8475 = vmatprep.subr.bf16.mxu1 %v9864_v33 }
 0x3e1   : > { %v8315_v56 = vpop.f32.mrb[19].mxu0 }
 0x3e2   : > { %v6542_v57 = vadd.f32 %v8313_v4, %v6502_v54 }
 0x3e3   : > { %8476 = vmatpush3.bf16.msra.mxu1 %v9775_v53 }
 0x3e4   : > { %8477 = vmatprep.subr.bf16.mxu1 %v9864_v33  ;;  %v9790_v33 = vld [vmem:[%s12749_s5 + $0x130] sm:$0xff]  }
 0x3e5   : > { %8405 = vmatpush3.bf16.msra.mxu0 %v9790_v33 }
 0x3e6   : > { %8406 = vmatprep.subr.bf16.mxu0 %v9791_v10 }
 0x3e7   : > { %8478 = vmatpush3.bf16.msra.mxu1 %v9776_v43 }
 0x3e9   : > { %8407 = vmatpush3.bf16.msra.mxu0 %v9792_v1 }
 0x3fe   : > { %v8333_v18 = vpop.f32.mrb[20].mxu0 }
 0x3ff   : > { %v8334_v60 = vpop.f32.mrb[21].mxu0 }
 0x400   : > { %v8335_v61 = vadd.f32 %v8334_v60, %v8333_v18  ;;  %v8336_v62 = vpop.f32.mrb[22].mxu0 }
 0x401   : > { %v8337_v0 = vpop.f32.mrb[23].mxu0 }
 0x402   : > { %v6582_v48 = vadd.f32 %v8335_v61, %v6542_v57 }
 0x41e   : > { %v6621_v19 = vpop.f32.mrb[24].mxu0 }
 0x41f   : > { %v6622_v2 = vadd.f32 %v6621_v19, %v6582_v48  ;;  %v8461_v23 = vpop.f32.mrb[25].mxu0 }
 0x420   : > { %v6624_v8 = vpop.f32.mrb[26].mxu0 }
 0x421   : > { %v6633_v12 = vmax.f32 %v6622_v2, 0.0  ;;  %v8462_v14 = vpop.f32.mrb[27].mxu0 }
 0x423   : > { %v6640_v16 = vpack.c.bf16 %v6633_v12, %v6633_v12 }
 0x425   : > { %8480 = vmatmul.mubr.bf16.vlgmr.msra.gmra.mrb[32].mxu1 %v6640_v16 }
 0x479   : > { %v8364_v17 = vpop.f32.mrb[28].mxu0 }
 0x47a   : > { %v8365_v15 = vpop.f32.mrb[29].mxu0 }
 0x47b   : > { %v8366_v21 = vadd.f32 %v8365_v15, %v8364_v17  ;;  %v8367_v38 = vpop.f32.mrb[30].mxu0 }
 0x47c   : > { %v8368_v13 = vpop.f32.mrb[31].mxu0 }
 0x47d   : > { %v6460_v24 = vpop.f32.mrb[24].mxu1  ;;  %v7131_v11 = vadd.f32 %v8366_v21, %v8137_v9 }
 0x47e   : > { %v8493_v25 = vadd.f32 %v6460_v24, %v3943_v20  ;;  %v6462_v26 = vpop.f32.mrb[25].mxu1 }
 0x47f   : > { %v8494_v29 = vadd.f32 %v6462_v26, %v3947_v22  ;;  %v6464_v31 = vpop.f32.mrb[26].mxu1 }
 0x480   : > { %v6631_v34 = vmax.f32 %v8493_v25, 0.0  ;;  %v6465_v35 = vpop.f32.mrb[27].mxu1 }
 0x481   : > { %v6632_v36 = vmax.f32 %v8494_v29, 0.0 }
 0x482   : > { %v6638_v39 = vpack.c.bf16 %v6631_v34, %v6631_v34 }
 0x483   : > { %v6639_v37 = vpack.c.bf16 %v6632_v36, %v6632_v36 }
 0x485   : > { %7208 = vmatprep.mubr.bf16.mxu0 %v6639_v37 }
 0x486   : > { %7209 = vmatmul.mubr.bf16.vlgmr.msra.gmra.mrb[32].mxu0 %v6638_v39 }
 0x49d   : > { %v8386_v5 = vpop.f32.mrb[28].mxu1 }
 0x49e   : > { %v8387_v32 = vpop.f32.mrb[29].mxu1 }
 0x49f   : > { %v8388_v44 = vadd.f32 %v8387_v32, %v8386_v5  ;;  %v8389_v27 = vpop.f32.mrb[30].mxu1 }
 0x4a0   : > { %v8390_v41 = vpop.f32.mrb[31].mxu1 }
 0x4a1   : > { %v7171_v40 = vadd.f32 %v8388_v44, %v7131_v11 }
 0x4f8   : > { %v7250_v42 = vpop.f32.mrb[32].mxu1 }
 0x4f9   : > { %v8481_v45 = vpop.f32.mrb[33].mxu1 }
 0x4fa   : > { %v7253_v46 = vpop.f32.mrb[34].mxu1 }
 0x4fb   : > { %v8482_v47 = vpop.f32.mrb[35].mxu1 }
 0x559   : > { %v8408_v3 = vpop.f32.mrb[32].mxu0 }
 0x55a   : > { %v8409_v49 = vpop.f32.mrb[33].mxu0 }
 0x55b   : > { %v8410_v28 = vadd.f32 %v8409_v49, %v8408_v3  ;;  %v8411_v50 = vpop.f32.mrb[34].mxu0 }
 0x55c   : > { %v8412_v30 = vpop.f32.mrb[35].mxu0 }
 0x55d   : > { %v7211_v63 = vadd.f32 %v8410_v28, %v7171_v40 }
 0x55f   : > { %v7251_v51 = vadd.f32 %v7250_v42, %v7211_v63 }
 0x561   : > { %7256 = vmax.xlane.f32.xlu0 %v7251_v51 }
 0x5ee   : > { %v7257_v52 = vpop.xlane.xlu0 %7256 }
 0x5ef   : > { %v7258_v6 = vsub.f32 %v7251_v51, %v7257_v52 }
 0x5f1   : > { %v7259_v53 = vmul.f32 1.442695, %v7258_v6 }
 0x5f3   : > { %9793 = vpow2.f32 %v7259_v53 }
 0x5fd   : > { %v9794_v54 = vpop.eup %9793 }
 0x5fe   : > { %7261 = vadd.xlane.f32.xlu0 %v9794_v54 }
 0x68b   : > { %v7262_v4 = vpop.xlane.xlu0 %7261 }
 0x68c   : > { %9795 = vlog2.f32 %v7262_v4 }
 0x696   : > { %v9796_v55 = vpop.eup %9795 }
 0x697   : > { %v7264_v56 = vmul.f32 0.6931472, %v9796_v55 }
 0x699   : > { %v7265_v57 = vsub.f32 %v7258_v6, %v7264_v56 }
 0x69b   : > { %7266 = vst [vmem:[%s271_s19] sm:$0xff] %v7265_v57 }
 0x69c   : > { %9812 = shalt.err (!%p9809_p3)
}
 0x69d   : > { %s9813_s16 = scalar_lea.hbm %s12702_s8, 128  ;;  %s9817_s18 = scalar_lea.hbm %s12751_s7, 256 }
 0x69e   : > { %p9814_p4 = scmp.ne.s32.totalorder %s12702_s8, %s9813_s16  ;;  %p9818_p9 = scmp.lt.u32.totalorder %s12702_s8, %s12751_s7 }
 0x69f   : > { %p9819_p10 = scmp.lt.u32.totalorder %s9817_s18, %s9813_s16  ;;  %p9821_p12 = scmp.lt.u32.totalorder %s9813_s16, %s12702_s8 }
 0x6a0   : > { %p9815_p7 = pnand %p9814_p4, %p9945_p5 }
 0x6a1   : > { %p9820_p11 = por %p9819_p10, %p9818_p9 }
 0x6a2   : > { %p9816_p8 = pneg %p9815_p7 }
 0x6a3   : > { %p9822_p13 = por %p9821_p12, %p9820_p11 }
 0x6a5   : > { %p9823_p0 = pnand %p9822_p13, %p9816_p8 }
 0x6a7   : > { %9826 = shalt.err (!%p9823_p0)
}
 0x6a8   : > { %8568 = dma.vmem_to_hbm [thread:$0]  (%p9945_p5), %s12704_s20, 128, %s12702_s8, %s7268_s9  }
 0x6a9 PF: > { %p8574_p1 = scmp.ge.s32.totalorder %s9861_s27, 2  ;;  %s7293_s23 = sand.u32 1, %s9849_s24  }
 0x6aa   : > { %s7294_s29 = scalar_lea.sflag [#allocation3], %s7293_s23 }
 0x6ab   : > { %p8571_p2 = pnand %p8574_p1, %p9949_p6 }
 0x6ad   : > { %9844 = dma.done.wait (!%p8571_p2), %s7294_s29, 128  }
 0x6ae   : > { %9846 = vsyncadd (!%p8571_p2), %s7294_s29, 4294967168  ;;  %p17_p3 = scmp.ge.s32.totalorder %s9932_s30, 4   ;;  %s12754_s24 = smov %s9853_s25 }
 0x6af   : > { %s12755_s25 = smov %s9857_s26  ;;  %s12756_s26 = smov %s9943_s10 }
 0x6b0   : > { %s12757_s27 = smov %s9932_s30  ;;  %19 = sbr.rel (!%p17_p3) target bundleno = 3 (0x3), region = 83 }
 0x6b7   :  { %7299 = vsyncpa [#allocation3], 1 }
 0x6b8   :  { %7301 = vsyncpa [#allocation3 + $0x1], 1 }

</bundles_post_ra>
